<compile_context>
chip_gen: v7x
topology: tpu7x:2x2x1
jax: 0.10.0
libtpu: 0.0.40
codegen_flags: <defaults>
</compile_context>

<pallas_src>
import functools

import jax
import jax.numpy as jnp
from jax import lax
from jax.experimental import pallas as pl
from jax.experimental.pallas import tpu as pltpu

HIDDEN = 200     # hidden_size -> num_layers * hidden_size must equal 200 (fc1 in_features)
NUM_LAYERS = 1
INPUT = 5        # data_mode == 0 slices first 5 features
H_PAD = 256      # per-gate hidden padded so 4*H_PAD = 1024 (128-lane aligned gate slices)
B_PAD = 8        # batch padded to the f32 sublane count


def _lstm_kernel(x_ref, wih_ref, whh_ref, b_ref, wfc_ref, bfc_ref, out_ref,
                 xg_ref, *, batch):
    # x_ref:   (S*Bp, I)        time-major input, (seq, batch) flattened
    # wih_ref: (I, 4*Hp)        input->gate weights (transposed, gate-padded)
    # whh_ref: (Hp, 4*Hp)       hidden->gate weights (transposed, padded both dims)
    # b_ref:   (1, 4*Hp)        b_ih + b_hh (gate-padded)
    # wfc_ref: (Hp, 1)          fc1 weight transposed (padded rows are zero)
    # bfc_ref: (1, 1)
    # out_ref: (Bp, 1)
    # xg_ref:  (S*Bp, 4*Hp)     VMEM scratch: precomputed input projection
    B = batch
    S = x_ref.shape[0] // B
    H = whh_ref.shape[0]

    # Input projection hoisted out of the recurrence: one MXU matmul + one
    # bias broadcast covers every timestep.
    xg_ref[...] = (
        jnp.dot(x_ref[...], wih_ref[...], preferred_element_type=jnp.float32)
        + b_ref[...]
    )

    whh = whh_ref[...]

    def step(t, carry):
        h, c = carry
        row = pl.multiple_of(t * B, B)
        gates = xg_ref[pl.ds(row, B), :] + jnp.dot(
            h, whh, preferred_element_type=jnp.float32)      # (B, 4*Hp)
        # 128-lane aligned gate slices (H == 256)
        i_g = jax.nn.sigmoid(gates[:, 0 * H:1 * H])
        f_g = jax.nn.sigmoid(gates[:, 1 * H:2 * H])
        g_g = jnp.tanh(gates[:, 2 * H:3 * H])
        o_g = jax.nn.sigmoid(gates[:, 3 * H:4 * H])
        c_new = f_g * c + i_g * g_g
        h_new = o_g * jnp.tanh(c_new)
        return (h_new, c_new)

    h0 = jnp.zeros((B, H), jnp.float32)
    c0 = jnp.zeros((B, H), jnp.float32)
    # Short static sequence: fully unroll so the scheduler can overlap the
    # Whh matmul / EUP sigmoid-tanh / VPU elementwise of adjacent steps.
    h_n, _ = lax.fori_loop(0, S, step, (h0, c0), unroll=True)

    # fc1 + sigmoid on final hidden state (h_n.reshape(batch, -1), num_layers=1)
    y = jnp.dot(h_n, wfc_ref[...], preferred_element_type=jnp.float32) + bfc_ref[...]
    out_ref[...] = jax.nn.sigmoid(y)


def prepare_params(params):
    """One-time weight prep (call once, reuse per forward):
    fold the two biases, transpose to (in, out), and zero-pad each gate's
    hidden dim 200 -> 256 so gate slices are 128-lane aligned in the kernel.
    Zero padding of Wih columns, Whh rows+columns, bias and Wfc rows keeps the
    padded h/c lanes at exactly 0 and out of the output."""
    H, Hp = HIDDEN, H_PAD

    def pad_gate_rows(w):                                   # (4H, X) -> (4Hp, X)
        w4 = w.reshape(4, H, w.shape[-1])
        return jnp.pad(w4, ((0, 0), (0, Hp - H), (0, 0))).reshape(4 * Hp, w.shape[-1])

    w_ih = pad_gate_rows(params["w_ih"].astype(jnp.float32))        # (4Hp, I)
    w_hh = pad_gate_rows(params["w_hh"].astype(jnp.float32))        # (4Hp, H)
    w_hh = jnp.pad(w_hh, ((0, 0), (0, Hp - H)))                     # (4Hp, Hp)
    bias = (params["b_ih"] + params["b_hh"]).astype(jnp.float32).reshape(4, H)
    bias = jnp.pad(bias, ((0, 0), (0, Hp - H))).reshape(1, 4 * Hp)  # (1, 4Hp)
    w_fc = jnp.pad(params["w_fc"].astype(jnp.float32),
                   ((0, 0), (0, Hp - H)))                           # (1, Hp)

    return {
        "wih_t": jnp.asarray(w_ih.T),                               # (I, 4Hp)
        "whh_t": jnp.asarray(w_hh.T),                               # (Hp, 4Hp)
        "bias": bias,                                               # (1, 4Hp)
        "wfc_t": jnp.asarray(w_fc.T),                               # (Hp, 1)
        "bfc": params["b_fc"].astype(jnp.float32).reshape(1, 1),    # (1, 1)
    }


@jax.jit
def lstm_forward(x_stock, x_news, prepped):
    """Pallas implementation of LSTM.forward for data_mode == 0. x_news unused."""
    del x_news
    x = x_stock[:, :, :INPUT].astype(jnp.float32)        # (B, S, 5)
    B, S, I = x.shape
    Bp = ((B + B_PAD - 1) // B_PAD) * B_PAD               # pad batch to sublane count

    # time-major, batch-padded, flattened to 2D (no reshapes inside the kernel)
    x_tm = jnp.transpose(x, (1, 0, 2))                    # (S, B, I)
    x_tm = jnp.pad(x_tm, ((0, 0), (0, Bp - B), (0, 0)))   # (S, Bp, I)
    x2d = x_tm.reshape(S * Bp, I)

    full = lambda shape: pl.BlockSpec(shape, lambda i: (0,) * len(shape))

    out = pl.pallas_call(
        functools.partial(_lstm_kernel, batch=Bp),
        out_shape=jax.ShapeDtypeStruct((Bp, 1), jnp.float32),
        grid=(1,),
        in_specs=[
            full((S * Bp, I)),
            full((I, 4 * H_PAD)),
            full((H_PAD, 4 * H_PAD)),
            full((1, 4 * H_PAD)),
            full((H_PAD, 1)),
            full((1, 1)),
        ],
        out_specs=full((Bp, 1)),
        scratch_shapes=[pltpu.VMEM((S * Bp, 4 * H_PAD), jnp.float32)],
        compiler_params=pltpu.CompilerParams(
            dimension_semantics=("arbitrary",)),
    )(x2d, prepped["wih_t"], prepped["whh_t"], prepped["bias"],
      prepped["wfc_t"], prepped["bfc"])
    return out[:B]


def init_params(key):
    """Deterministic synthetic weights matching nn.LSTM / nn.Linear shapes."""
    ks = jax.random.split(key, 6)
    scale = 1.0 / jnp.sqrt(HIDDEN)
    return {
        "w_ih": jax.random.uniform(ks[0], (4 * HIDDEN, INPUT), jnp.float32, -scale, scale),
        "w_hh": jax.random.uniform(ks[1], (4 * HIDDEN, HIDDEN), jnp.float32, -scale, scale),
        "b_ih": jax.random.uniform(ks[2], (4 * HIDDEN,), jnp.float32, -scale, scale),
        "b_hh": jax.random.uniform(ks[3], (4 * HIDDEN,), jnp.float32, -scale, scale),
        "w_fc": jax.random.uniform(ks[4], (1, NUM_LAYERS * HIDDEN), jnp.float32, -scale, scale),
        "b_fc": jax.random.uniform(ks[5], (1,), jnp.float32, -scale, scale),
    }


def lstm_reference(x_stock, params):
    """Pure-JAX reference (unpadded) for correctness checking."""
    x = x_stock[:, :, :INPUT].astype(jnp.float32)
    B, S, _ = x.shape
    wih, whh = params["w_ih"], params["w_hh"]
    b = params["b_ih"] + params["b_hh"]
    h = jnp.zeros((B, HIDDEN), jnp.float32)
    c = jnp.zeros((B, HIDDEN), jnp.float32)
    for t in range(S):
        gates = x[:, t, :] @ wih.T + h @ whh.T + b
        i_g = jax.nn.sigmoid(gates[:, 0 * HIDDEN:1 * HIDDEN])
        f_g = jax.nn.sigmoid(gates[:, 1 * HIDDEN:2 * HIDDEN])
        g_g = jnp.tanh(gates[:, 2 * HIDDEN:3 * HIDDEN])
        o_g = jax.nn.sigmoid(gates[:, 3 * HIDDEN:4 * HIDDEN])
        c = f_g * c + i_g * g_g
        h = o_g * jnp.tanh(c)
    return jax.nn.sigmoid(h @ params["w_fc"].T + params["b_fc"])


if __name__ == "__main__":
    key = jax.random.PRNGKey(0)
    k_x, k_n, k_p = jax.random.split(key, 3)

    batch, seq, num_feature = 2, 8, 8          # forward slices to first 5 features
    x_stock = jax.random.normal(k_x, (batch, seq, num_feature), jnp.float32)
    x_news = jax.random.normal(k_n, (batch, seq, 3), jnp.float32)   # unused in data_mode=0

    params = init_params(k_p)
    prepped = prepare_params(params)           # one-time weight prep (hoisted out of forward)

    y = lstm_forward(x_stock, x_news, prepped)
    jax.block_until_ready(y)
    assert y.shape == (batch, 1)

    y_ref = lstm_reference(x_stock, params)
    assert jnp.allclose(y, y_ref, atol=2e-3), (y, y_ref)
    print("KERNEL_OK")
</pallas_src>

<mosaic_0001>
module attributes {stable_mosaic.version = 11 : i64} {
  func.func @_lstm_kernel(%arg0: i32, %arg1: memref<64x5xf32, #tpu.memory_space<vmem>>, %arg2: memref<5x1024xf32, #tpu.memory_space<vmem>>, %arg3: memref<256x1024xf32, #tpu.memory_space<vmem>>, %arg4: memref<1x1024xf32, #tpu.memory_space<vmem>>, %arg5: memref<256x1xf32, #tpu.memory_space<vmem>>, %arg6: memref<1x1xf32, #tpu.memory_space<vmem>>, %arg7: memref<8x1xf32, #tpu.memory_space<vmem>>, %arg8: memref<64x1024xf32, #tpu.memory_space<vmem>>) attributes {dimension_semantics = [#tpu.dimension_semantics<arbitrary>], iteration_bounds = array<i64: 1>, scalar_prefetch = 0 : i64, scratch_operands = 1 : i64, tpu.core_type = #tpu.core_type<tc>, window_params = [{pipeline_mode = #tpu.pipeline_mode<synchronous>, transform_indices = @transform_0, window_bounds = array<i64: 64, 5>}, {pipeline_mode = #tpu.pipeline_mode<synchronous>, transform_indices = @transform_1, window_bounds = array<i64: 5, 1024>}, {pipeline_mode = #tpu.pipeline_mode<synchronous>, transform_indices = @transform_2, window_bounds = array<i64: 256, 1024>}, {pipeline_mode = #tpu.pipeline_mode<synchronous>, transform_indices = @transform_3, window_bounds = array<i64: 1, 1024>}, {pipeline_mode = #tpu.pipeline_mode<synchronous>, transform_indices = @transform_4, window_bounds = array<i64: 256, 1>}, {pipeline_mode = #tpu.pipeline_mode<synchronous>, transform_indices = @transform_5, window_bounds = array<i64: 1, 1>}, {pipeline_mode = #tpu.pipeline_mode<synchronous>, transform_indices = @transform_6, window_bounds = array<i64: 8, 1>}]} {
    %c0 = arith.constant 0 : index
    %c0_0 = arith.constant 0 : index
    %0 = vector.load %arg1[%c0, %c0_0] : memref<64x5xf32, #tpu.memory_space<vmem>>, vector<64x5xf32>
    %c0_1 = arith.constant 0 : index
    %c0_2 = arith.constant 0 : index
    %1 = vector.load %arg2[%c0_1, %c0_2] : memref<5x1024xf32, #tpu.memory_space<vmem>>, vector<5x1024xf32>
    %cst = arith.constant dense<0.000000e+00> : vector<64x1024xf32>
    %2 = tpu.matmul %0, %1, %cst {dimension_numbers = #tpu.dot_dimension_numbers<[1], [0], [0], [1], [0, 0, 1, 1], [], []>} : vector<64x5xf32>, vector<5x1024xf32>, vector<64x1024xf32> -> vector<64x1024xf32>
    %c0_3 = arith.constant 0 : index
    %c0_4 = arith.constant 0 : index
    %3 = vector.load %arg4[%c0_3, %c0_4] : memref<1x1024xf32, #tpu.memory_space<vmem>>, vector<1x1024xf32>
    %4 = vector.broadcast %3 : vector<1x1024xf32> to vector<64x1024xf32>
    %5 = arith.addf %2, %4 : vector<64x1024xf32>
    %c0_5 = arith.constant 0 : index
    %c0_6 = arith.constant 0 : index
    %6 = vector.load %arg8[%c0_5, %c0_6] : memref<64x1024xf32, #tpu.memory_space<vmem>>, vector<64x1024xf32>
    tpu.vector_store %arg8[%c0_5, %c0_6], %5 {strides = array<i32>} : memref<64x1024xf32, #tpu.memory_space<vmem>>, vector<64x1024xf32>,
    %c0_7 = arith.constant 0 : index
    %c0_8 = arith.constant 0 : index
    %7 = vector.load %arg3[%c0_7, %c0_8] : memref<256x1024xf32, #tpu.memory_space<vmem>>, vector<256x1024xf32>
    %cst_9 = arith.constant 0.000000e+00 : f32
    %8 = vector.broadcast %cst_9 : f32 to vector<8x256xf32>
    %cst_10 = arith.constant 0.000000e+00 : f32
    %9 = vector.broadcast %cst_10 : f32 to vector<8x256xf32>
    %c0_i32 = arith.constant 0 : i32
    %c8_i32 = arith.constant 8 : i32
    %10 = arith.muli %c0_i32, %c8_i32 : i32
    %11 = tpu.assume_multiple %10, 8 : i32
    %12 = arith.index_cast %11 : i32 to index
    %c0_11 = arith.constant 0 : index
    %13 = vector.load %arg8[%12, %c0_11] : memref<64x1024xf32, #tpu.memory_space<vmem>>, vector<8x1024xf32>
    %cst_12 = arith.constant dense<0.000000e+00> : vector<8x1024xf32>
    %14 = tpu.matmul %8, %7, %cst_12 {dimension_numbers = #tpu.dot_dimension_numbers<[1], [0], [0], [1], [0, 0, 1, 1], [], []>} : vector<8x256xf32>, vector<256x1024xf32>, vector<8x1024xf32> -> vector<8x1024xf32>
    %15 = arith.addf %13, %14 : vector<8x1024xf32>
    %16 = vector.extract_strided_slice %15 {offsets = [0, 0], sizes = [8, 256], strides = [1, 1]} : vector<8x1024xf32> to vector<8x256xf32>
    %17 = arith.negf %16 : vector<8x256xf32>
    %18 = math.exp %17 : vector<8x256xf32>
    %cst_13 = arith.constant 1.000000e+00 : f32
    %19 = vector.broadcast %cst_13 : f32 to vector<8x256xf32>
    %20 = arith.addf %19, %18 : vector<8x256xf32>
    %21 = arith.divf %19, %20 : vector<8x256xf32>
    %22 = vector.extract_strided_slice %15 {offsets = [0, 256], sizes = [8, 256], strides = [1, 1]} : vector<8x1024xf32> to vector<8x256xf32>
    %23 = arith.negf %22 : vector<8x256xf32>
    %24 = math.exp %23 : vector<8x256xf32>
    %cst_14 = arith.constant 1.000000e+00 : f32
    %25 = vector.broadcast %cst_14 : f32 to vector<8x256xf32>
    %26 = arith.addf %25, %24 : vector<8x256xf32>
    %27 = arith.divf %25, %26 : vector<8x256xf32>
    %28 = vector.extract_strided_slice %15 {offsets = [0, 512], sizes = [8, 256], strides = [1, 1]} : vector<8x1024xf32> to vector<8x256xf32>
    %29 = math.tanh %28 : vector<8x256xf32>
    %30 = vector.extract_strided_slice %15 {offsets = [0, 768], sizes = [8, 256], strides = [1, 1]} : vector<8x1024xf32> to vector<8x256xf32>
    %31 = arith.negf %30 : vector<8x256xf32>
    %32 = math.exp %31 : vector<8x256xf32>
    %cst_15 = arith.constant 1.000000e+00 : f32
    %33 = vector.broadcast %cst_15 : f32 to vector<8x256xf32>
    %34 = arith.addf %33, %32 : vector<8x256xf32>
    %35 = arith.divf %33, %34 : vector<8x256xf32>
    %36 = arith.mulf %27, %9 : vector<8x256xf32>
    %37 = arith.mulf %21, %29 : vector<8x256xf32>
    %38 = arith.addf %36, %37 : vector<8x256xf32>
    %39 = math.tanh %38 : vector<8x256xf32>
    %40 = arith.mulf %35, %39 : vector<8x256xf32>
    %c1_i32 = arith.constant 1 : i32
    %c8_i32_16 = arith.constant 8 : i32
    %41 = arith.muli %c1_i32, %c8_i32_16 : i32
    %42 = tpu.assume_multiple %41, 8 : i32
    %43 = arith.index_cast %42 : i32 to index
    %c0_17 = arith.constant 0 : index
    %44 = vector.load %arg8[%43, %c0_17] : memref<64x1024xf32, #tpu.memory_space<vmem>>, vector<8x1024xf32>
    %cst_18 = arith.constant dense<0.000000e+00> : vector<8x1024xf32>
    %45 = tpu.matmul %40, %7, %cst_18 {dimension_numbers = #tpu.dot_dimension_numbers<[1], [0], [0], [1], [0, 0, 1, 1], [], []>} : vector<8x256xf32>, vector<256x1024xf32>, vector<8x1024xf32> -> vector<8x1024xf32>
    %46 = arith.addf %44, %45 : vector<8x1024xf32>
    %47 = vector.extract_strided_slice %46 {offsets = [0, 0], sizes = [8, 256], strides = [1, 1]} : vector<8x1024xf32> to vector<8x256xf32>
    %48 = arith.negf %47 : vector<8x256xf32>
    %49 = math.exp %48 : vector<8x256xf32>
    %cst_19 = arith.constant 1.000000e+00 : f32
    %50 = vector.broadcast %cst_19 : f32 to vector<8x256xf32>
    %51 = arith.addf %50, %49 : vector<8x256xf32>
    %52 = arith.divf %50, %51 : vector<8x256xf32>
    %53 = vector.extract_strided_slice %46 {offsets = [0, 256], sizes = [8, 256], strides = [1, 1]} : vector<8x1024xf32> to vector<8x256xf32>
    %54 = arith.negf %53 : vector<8x256xf32>
    %55 = math.exp %54 : vector<8x256xf32>
    %cst_20 = arith.constant 1.000000e+00 : f32
    %56 = vector.broadcast %cst_20 : f32 to vector<8x256xf32>
    %57 = arith.addf %56, %55 : vector<8x256xf32>
    %58 = arith.divf %56, %57 : vector<8x256xf32>
    %59 = vector.extract_strided_slice %46 {offsets = [0, 512], sizes = [8, 256], strides = [1, 1]} : vector<8x1024xf32> to vector<8x256xf32>
    %60 = math.tanh %59 : vector<8x256xf32>
    %61 = vector.extract_strided_slice %46 {offsets = [0, 768], sizes = [8, 256], strides = [1, 1]} : vector<8x1024xf32> to vector<8x256xf32>
    %62 = arith.negf %61 : vector<8x256xf32>
    %63 = math.exp %62 : vector<8x256xf32>
    %cst_21 = arith.constant 1.000000e+00 : f32
    %64 = vector.broadcast %cst_21 : f32 to vector<8x256xf32>
    %65 = arith.addf %64, %63 : vector<8x256xf32>
    %66 = arith.divf %64, %65 : vector<8x256xf32>
    %67 = arith.mulf %58, %38 : vector<8x256xf32>
    %68 = arith.mulf %52, %60 : vector<8x256xf32>
    %69 = arith.addf %67, %68 : vector<8x256xf32>
    %70 = math.tanh %69 : vector<8x256xf32>
    %71 = arith.mulf %66, %70 : vector<8x256xf32>
    %c2_i32 = arith.constant 2 : i32
    %c8_i32_22 = arith.constant 8 : i32
    %72 = arith.muli %c2_i32, %c8_i32_22 : i32
    %73 = tpu.assume_multiple %72, 8 : i32
    %74 = arith.index_cast %73 : i32 to index
    %c0_23 = arith.constant 0 : index
    %75 = vector.load %arg8[%74, %c0_23] : memref<64x1024xf32, #tpu.memory_space<vmem>>, vector<8x1024xf32>
    %cst_24 = arith.constant dense<0.000000e+00> : vector<8x1024xf32>
    %76 = tpu.matmul %71, %7, %cst_24 {dimension_numbers = #tpu.dot_dimension_numbers<[1], [0], [0], [1], [0, 0, 1, 1], [], []>} : vector<8x256xf32>, vector<256x1024xf32>, vector<8x1024xf32> -> vector<8x1024xf32>
    %77 = arith.addf %75, %76 : vector<8x1024xf32>
    %78 = vector.extract_strided_slice %77 {offsets = [0, 0], sizes = [8, 256], strides = [1, 1]} : vector<8x1024xf32> to vector<8x256xf32>
    %79 = arith.negf %78 : vector<8x256xf32>
    %80 = math.exp %79 : vector<8x256xf32>
    %cst_25 = arith.constant 1.000000e+00 : f32
    %81 = vector.broadcast %cst_25 : f32 to vector<8x256xf32>
    %82 = arith.addf %81, %80 : vector<8x256xf32>
    %83 = arith.divf %81, %82 : vector<8x256xf32>
    %84 = vector.extract_strided_slice %77 {offsets = [0, 256], sizes = [8, 256], strides = [1, 1]} : vector<8x1024xf32> to vector<8x256xf32>
    %85 = arith.negf %84 : vector<8x256xf32>
    %86 = math.exp %85 : vector<8x256xf32>
    %cst_26 = arith.constant 1.000000e+00 : f32
    %87 = vector.broadcast %cst_26 : f32 to vector<8x256xf32>
    %88 = arith.addf %87, %86 : vector<8x256xf32>
    %89 = arith.divf %87, %88 : vector<8x256xf32>
    %90 = vector.extract_strided_slice %77 {offsets = [0, 512], sizes = [8, 256], strides = [1, 1]} : vector<8x1024xf32> to vector<8x256xf32>
    %91 = math.tanh %90 : vector<8x256xf32>
    %92 = vector.extract_strided_slice %77 {offsets = [0, 768], sizes = [8, 256], strides = [1, 1]} : vector<8x1024xf32> to vector<8x256xf32>
    %93 = arith.negf %92 : vector<8x256xf32>
    %94 = math.exp %93 : vector<8x256xf32>
    %cst_27 = arith.constant 1.000000e+00 : f32
    %95 = vector.broadcast %cst_27 : f32 to vector<8x256xf32>
    %96 = arith.addf %95, %94 : vector<8x256xf32>
    %97 = arith.divf %95, %96 : vector<8x256xf32>
    %98 = arith.mulf %89, %69 : vector<8x256xf32>
    %99 = arith.mulf %83, %91 : vector<8x256xf32>
    %100 = arith.addf %98, %99 : vector<8x256xf32>
    %101 = math.tanh %100 : vector<8x256xf32>
    %102 = arith.mulf %97, %101 : vector<8x256xf32>
    %c3_i32 = arith.constant 3 : i32
    %c8_i32_28 = arith.constant 8 : i32
    %103 = arith.muli %c3_i32, %c8_i32_28 : i32
    %104 = tpu.assume_multiple %103, 8 : i32
    %105 = arith.index_cast %104 : i32 to index
    %c0_29 = arith.constant 0 : index
    %106 = vector.load %arg8[%105, %c0_29] : memref<64x1024xf32, #tpu.memory_space<vmem>>, vector<8x1024xf32>
    %cst_30 = arith.constant dense<0.000000e+00> : vector<8x1024xf32>
    %107 = tpu.matmul %102, %7, %cst_30 {dimension_numbers = #tpu.dot_dimension_numbers<[1], [0], [0], [1], [0, 0, 1, 1], [], []>} : vector<8x256xf32>, vector<256x1024xf32>, vector<8x1024xf32> -> vector<8x1024xf32>
    %108 = arith.addf %106, %107 : vector<8x1024xf32>
    %109 = vector.extract_strided_slice %108 {offsets = [0, 0], sizes = [8, 256], strides = [1, 1]} : vector<8x1024xf32> to vector<8x256xf32>
    %110 = arith.negf %109 : vector<8x256xf32>
    %111 = math.exp %110 : vector<8x256xf32>
    %cst_31 = arith.constant 1.000000e+00 : f32
    %112 = vector.broadcast %cst_31 : f32 to vector<8x256xf32>
    %113 = arith.addf %112, %111 : vector<8x256xf32>
    %114 = arith.divf %112, %113 : vector<8x256xf32>
    %115 = vector.extract_strided_slice %108 {offsets = [0, 256], sizes = [8, 256], strides = [1, 1]} : vector<8x1024xf32> to vector<8x256xf32>
    %116 = arith.negf %115 : vector<8x256xf32>
    %117 = math.exp %116 : vector<8x256xf32>
    %cst_32 = arith.constant 1.000000e+00 : f32
    %118 = vector.broadcast %cst_32 : f32 to vector<8x256xf32>
    %119 = arith.addf %118, %117 : vector<8x256xf32>
    %120 = arith.divf %118, %119 : vector<8x256xf32>
    %121 = vector.extract_strided_slice %108 {offsets = [0, 512], sizes = [8, 256], strides = [1, 1]} : vector<8x1024xf32> to vector<8x256xf32>
    %122 = math.tanh %121 : vector<8x256xf32>
    %123 = vector.extract_strided_slice %108 {offsets = [0, 768], sizes = [8, 256], strides = [1, 1]} : vector<8x1024xf32> to vector<8x256xf32>
    %124 = arith.negf %123 : vector<8x256xf32>
    %125 = math.exp %124 : vector<8x256xf32>
    %cst_33 = arith.constant 1.000000e+00 : f32
    %126 = vector.broadcast %cst_33 : f32 to vector<8x256xf32>
    %127 = arith.addf %126, %125 : vector<8x256xf32>
    %128 = arith.divf %126, %127 : vector<8x256xf32>
    %129 = arith.mulf %120, %100 : vector<8x256xf32>
    %130 = arith.mulf %114, %122 : vector<8x256xf32>
    %131 = arith.addf %129, %130 : vector<8x256xf32>
    %132 = math.tanh %131 : vector<8x256xf32>
    %133 = arith.mulf %128, %132 : vector<8x256xf32>
    %c4_i32 = arith.constant 4 : i32
    %c8_i32_34 = arith.constant 8 : i32
    %134 = arith.muli %c4_i32, %c8_i32_34 : i32
    %135 = tpu.assume_multiple %134, 8 : i32
    %136 = arith.index_cast %135 : i32 to index
    %c0_35 = arith.constant 0 : index
    %137 = vector.load %arg8[%136, %c0_35] : memref<64x1024xf32, #tpu.memory_space<vmem>>, vector<8x1024xf32>
    %cst_36 = arith.constant dense<0.000000e+00> : vector<8x1024xf32>
    %138 = tpu.matmul %133, %7, %cst_36 {dimension_numbers = #tpu.dot_dimension_numbers<[1], [0], [0], [1], [0, 0, 1, 1], [], []>} : vector<8x256xf32>, vector<256x1024xf32>, vector<8x1024xf32> -> vector<8x1024xf32>
    %139 = arith.addf %137, %138 : vector<8x1024xf32>
    %140 = vector.extract_strided_slice %139 {offsets = [0, 0], sizes = [8, 256], strides = [1, 1]} : vector<8x1024xf32> to vector<8x256xf32>
    %141 = arith.negf %140 : vector<8x256xf32>
    %142 = math.exp %141 : vector<8x256xf32>
    %cst_37 = arith.constant 1.000000e+00 : f32
    %143 = vector.broadcast %cst_37 : f32 to vector<8x256xf32>
    %144 = arith.addf %143, %142 : vector<8x256xf32>
    %145 = arith.divf %143, %144 : vector<8x256xf32>
    %146 = vector.extract_strided_slice %139 {offsets = [0, 256], sizes = [8, 256], strides = [1, 1]} : vector<8x1024xf32> to vector<8x256xf32>
    %147 = arith.negf %146 : vector<8x256xf32>
    %148 = math.exp %147 : vector<8x256xf32>
    %cst_38 = arith.constant 1.000000e+00 : f32
    %149 = vector.broadcast %cst_38 : f32 to vector<8x256xf32>
    %150 = arith.addf %149, %148 : vector<8x256xf32>
    %151 = arith.divf %149, %150 : vector<8x256xf32>
    %152 = vector.extract_strided_slice %139 {offsets = [0, 512], sizes = [8, 256], strides = [1, 1]} : vector<8x1024xf32> to vector<8x256xf32>
    %153 = math.tanh %152 : vector<8x256xf32>
    %154 = vector.extract_strided_slice %139 {offsets = [0, 768], sizes = [8, 256], strides = [1, 1]} : vector<8x1024xf32> to vector<8x256xf32>
    %155 = arith.negf %154 : vector<8x256xf32>
    %156 = math.exp %155 : vector<8x256xf32>
    %cst_39 = arith.constant 1.000000e+00 : f32
    %157 = vector.broadcast %cst_39 : f32 to vector<8x256xf32>
    %158 = arith.addf %157, %156 : vector<8x256xf32>
    %159 = arith.divf %157, %158 : vector<8x256xf32>
    %160 = arith.mulf %151, %131 : vector<8x256xf32>
    %161 = arith.mulf %145, %153 : vector<8x256xf32>
    %162 = arith.addf %160, %161 : vector<8x256xf32>
    %163 = math.tanh %162 : vector<8x256xf32>
    %164 = arith.mulf %159, %163 : vector<8x256xf32>
    %c5_i32 = arith.constant 5 : i32
    %c8_i32_40 = arith.constant 8 : i32
    %165 = arith.muli %c5_i32, %c8_i32_40 : i32
    %166 = tpu.assume_multiple %165, 8 : i32
    %167 = arith.index_cast %166 : i32 to index
    %c0_41 = arith.constant 0 : index
    %168 = vector.load %arg8[%167, %c0_41] : memref<64x1024xf32, #tpu.memory_space<vmem>>, vector<8x1024xf32>
    %cst_42 = arith.constant dense<0.000000e+00> : vector<8x1024xf32>
    %169 = tpu.matmul %164, %7, %cst_42 {dimension_numbers = #tpu.dot_dimension_numbers<[1], [0], [0], [1], [0, 0, 1, 1], [], []>} : vector<8x256xf32>, vector<256x1024xf32>, vector<8x1024xf32> -> vector<8x1024xf32>
    %170 = arith.addf %168, %169 : vector<8x1024xf32>
    %171 = vector.extract_strided_slice %170 {offsets = [0, 0], sizes = [8, 256], strides = [1, 1]} : vector<8x1024xf32> to vector<8x256xf32>
    %172 = arith.negf %171 : vector<8x256xf32>
    %173 = math.exp %172 : vector<8x256xf32>
    %cst_43 = arith.constant 1.000000e+00 : f32
    %174 = vector.broadcast %cst_43 : f32 to vector<8x256xf32>
    %175 = arith.addf %174, %173 : vector<8x256xf32>
    %176 = arith.divf %174, %175 : vector<8x256xf32>
    %177 = vector.extract_strided_slice %170 {offsets = [0, 256], sizes = [8, 256], strides = [1, 1]} : vector<8x1024xf32> to vector<8x256xf32>
    %178 = arith.negf %177 : vector<8x256xf32>
    %179 = math.exp %178 : vector<8x256xf32>
    %cst_44 = arith.constant 1.000000e+00 : f32
    %180 = vector.broadcast %cst_44 : f32 to vector<8x256xf32>
    %181 = arith.addf %180, %179 : vector<8x256xf32>
    %182 = arith.divf %180, %181 : vector<8x256xf32>
    %183 = vector.extract_strided_slice %170 {offsets = [0, 512], sizes = [8, 256], strides = [1, 1]} : vector<8x1024xf32> to vector<8x256xf32>
    %184 = math.tanh %183 : vector<8x256xf32>
    %185 = vector.extract_strided_slice %170 {offsets = [0, 768], sizes = [8, 256], strides = [1, 1]} : vector<8x1024xf32> to vector<8x256xf32>
    %186 = arith.negf %185 : vector<8x256xf32>
    %187 = math.exp %186 : vector<8x256xf32>
    %cst_45 = arith.constant 1.000000e+00 : f32
    %188 = vector.broadcast %cst_45 : f32 to vector<8x256xf32>
    %189 = arith.addf %188, %187 : vector<8x256xf32>
    %190 = arith.divf %188, %189 : vector<8x256xf32>
    %191 = arith.mulf %182, %162 : vector<8x256xf32>
    %192 = arith.mulf %176, %184 : vector<8x256xf32>
    %193 = arith.addf %191, %192 : vector<8x256xf32>
    %194 = math.tanh %193 : vector<8x256xf32>
    %195 = arith.mulf %190, %194 : vector<8x256xf32>
    %c6_i32 = arith.constant 6 : i32
    %c8_i32_46 = arith.constant 8 : i32
    %196 = arith.muli %c6_i32, %c8_i32_46 : i32
    %197 = tpu.assume_multiple %196, 8 : i32
    %198 = arith.index_cast %197 : i32 to index
    %c0_47 = arith.constant 0 : index
    %199 = vector.load %arg8[%198, %c0_47] : memref<64x1024xf32, #tpu.memory_space<vmem>>, vector<8x1024xf32>
    %cst_48 = arith.constant dense<0.000000e+00> : vector<8x1024xf32>
    %200 = tpu.matmul %195, %7, %cst_48 {dimension_numbers = #tpu.dot_dimension_numbers<[1], [0], [0], [1], [0, 0, 1, 1], [], []>} : vector<8x256xf32>, vector<256x1024xf32>, vector<8x1024xf32> -> vector<8x1024xf32>
    %201 = arith.addf %199, %200 : vector<8x1024xf32>
    %202 = vector.extract_strided_slice %201 {offsets = [0, 0], sizes = [8, 256], strides = [1, 1]} : vector<8x1024xf32> to vector<8x256xf32>
    %203 = arith.negf %202 : vector<8x256xf32>
    %204 = math.exp %203 : vector<8x256xf32>
    %cst_49 = arith.constant 1.000000e+00 : f32
    %205 = vector.broadcast %cst_49 : f32 to vector<8x256xf32>
    %206 = arith.addf %205, %204 : vector<8x256xf32>
    %207 = arith.divf %205, %206 : vector<8x256xf32>
    %208 = vector.extract_strided_slice %201 {offsets = [0, 256], sizes = [8, 256], strides = [1, 1]} : vector<8x1024xf32> to vector<8x256xf32>
    %209 = arith.negf %208 : vector<8x256xf32>
    %210 = math.exp %209 : vector<8x256xf32>
    %cst_50 = arith.constant 1.000000e+00 : f32
    %211 = vector.broadcast %cst_50 : f32 to vector<8x256xf32>
    %212 = arith.addf %211, %210 : vector<8x256xf32>
    %213 = arith.divf %211, %212 : vector<8x256xf32>
    %214 = vector.extract_strided_slice %201 {offsets = [0, 512], sizes = [8, 256], strides = [1, 1]} : vector<8x1024xf32> to vector<8x256xf32>
    %215 = math.tanh %214 : vector<8x256xf32>
    %216 = vector.extract_strided_slice %201 {offsets = [0, 768], sizes = [8, 256], strides = [1, 1]} : vector<8x1024xf32> to vector<8x256xf32>
    %217 = arith.negf %216 : vector<8x256xf32>
    %218 = math.exp %217 : vector<8x256xf32>
    %cst_51 = arith.constant 1.000000e+00 : f32
    %219 = vector.broadcast %cst_51 : f32 to vector<8x256xf32>
    %220 = arith.addf %219, %218 : vector<8x256xf32>
    %221 = arith.divf %219, %220 : vector<8x256xf32>
    %222 = arith.mulf %213, %193 : vector<8x256xf32>
    %223 = arith.mulf %207, %215 : vector<8x256xf32>
    %224 = arith.addf %222, %223 : vector<8x256xf32>
    %225 = math.tanh %224 : vector<8x256xf32>
    %226 = arith.mulf %221, %225 : vector<8x256xf32>
    %c7_i32 = arith.constant 7 : i32
    %c8_i32_52 = arith.constant 8 : i32
    %227 = arith.muli %c7_i32, %c8_i32_52 : i32
    %228 = tpu.assume_multiple %227, 8 : i32
    %229 = arith.index_cast %228 : i32 to index
    %c0_53 = arith.constant 0 : index
    %230 = vector.load %arg8[%229, %c0_53] : memref<64x1024xf32, #tpu.memory_space<vmem>>, vector<8x1024xf32>
    %cst_54 = arith.constant dense<0.000000e+00> : vector<8x1024xf32>
    %231 = tpu.matmul %226, %7, %cst_54 {dimension_numbers = #tpu.dot_dimension_numbers<[1], [0], [0], [1], [0, 0, 1, 1], [], []>} : vector<8x256xf32>, vector<256x1024xf32>, vector<8x1024xf32> -> vector<8x1024xf32>
    %232 = arith.addf %230, %231 : vector<8x1024xf32>
    %233 = vector.extract_strided_slice %232 {offsets = [0, 0], sizes = [8, 256], strides = [1, 1]} : vector<8x1024xf32> to vector<8x256xf32>
    %234 = arith.negf %233 : vector<8x256xf32>
    %235 = math.exp %234 : vector<8x256xf32>
    %cst_55 = arith.constant 1.000000e+00 : f32
    %236 = vector.broadcast %cst_55 : f32 to vector<8x256xf32>
    %237 = arith.addf %236, %235 : vector<8x256xf32>
    %238 = arith.divf %236, %237 : vector<8x256xf32>
    %239 = vector.extract_strided_slice %232 {offsets = [0, 256], sizes = [8, 256], strides = [1, 1]} : vector<8x1024xf32> to vector<8x256xf32>
    %240 = arith.negf %239 : vector<8x256xf32>
    %241 = math.exp %240 : vector<8x256xf32>
    %cst_56 = arith.constant 1.000000e+00 : f32
    %242 = vector.broadcast %cst_56 : f32 to vector<8x256xf32>
    %243 = arith.addf %242, %241 : vector<8x256xf32>
    %244 = arith.divf %242, %243 : vector<8x256xf32>
    %245 = vector.extract_strided_slice %232 {offsets = [0, 512], sizes = [8, 256], strides = [1, 1]} : vector<8x1024xf32> to vector<8x256xf32>
    %246 = math.tanh %245 : vector<8x256xf32>
    %247 = vector.extract_strided_slice %232 {offsets = [0, 768], sizes = [8, 256], strides = [1, 1]} : vector<8x1024xf32> to vector<8x256xf32>
    %248 = arith.negf %247 : vector<8x256xf32>
    %249 = math.exp %248 : vector<8x256xf32>
    %cst_57 = arith.constant 1.000000e+00 : f32
    %250 = vector.broadcast %cst_57 : f32 to vector<8x256xf32>
    %251 = arith.addf %250, %249 : vector<8x256xf32>
    %252 = arith.divf %250, %251 : vector<8x256xf32>
    %253 = arith.mulf %244, %224 : vector<8x256xf32>
    %254 = arith.mulf %238, %246 : vector<8x256xf32>
    %255 = arith.addf %253, %254 : vector<8x256xf32>
    %256 = math.tanh %255 : vector<8x256xf32>
    %257 = arith.mulf %252, %256 : vector<8x256xf32>
    %c8_i32_58 = arith.constant 8 : i32
    %c0_59 = arith.constant 0 : index
    %c0_60 = arith.constant 0 : index
    %258 = vector.load %arg5[%c0_59, %c0_60] : memref<256x1xf32, #tpu.memory_space<vmem>>, vector<256x1xf32>
    %cst_61 = arith.constant dense<0.000000e+00> : vector<8x1xf32>
    %259 = tpu.matmul %257, %258, %cst_61 {dimension_numbers = #tpu.dot_dimension_numbers<[1], [0], [0], [1], [0, 0, 1, 1], [], []>} : vector<8x256xf32>, vector<256x1xf32>, vector<8x1xf32> -> vector<8x1xf32>
    %c0_62 = arith.constant 0 : index
    %c0_63 = arith.constant 0 : index
    %260 = vector.load %arg6[%c0_62, %c0_63] : memref<1x1xf32, #tpu.memory_space<vmem>>, vector<1x1xf32>
    %261 = vector.broadcast %260 : vector<1x1xf32> to vector<8x1xf32>
    %262 = arith.addf %259, %261 : vector<8x1xf32>
    %263 = arith.negf %262 : vector<8x1xf32>
    %264 = math.exp %263 : vector<8x1xf32>
    %cst_64 = arith.constant 1.000000e+00 : f32
    %265 = vector.broadcast %cst_64 : f32 to vector<8x1xf32>
    %266 = arith.addf %265, %264 : vector<8x1xf32>
    %267 = arith.divf %265, %266 : vector<8x1xf32>
    %c0_65 = arith.constant 0 : index
    %c0_66 = arith.constant 0 : index
    %268 = vector.load %arg7[%c0_65, %c0_66] : memref<8x1xf32, #tpu.memory_space<vmem>>, vector<8x1xf32>
    tpu.vector_store %arg7[%c0_65, %c0_66], %267 {strides = array<i32>} : memref<8x1xf32, #tpu.memory_space<vmem>>, vector<8x1xf32>,
    return
  }
  func.func @transform_0(%arg0: i32) -> (i32, i32) {
    %c0_i32 = arith.constant 0 : i32
    %c0_i32_0 = arith.constant 0 : i32
    %c0_i32_1 = arith.constant 0 : i32
    return %c0_i32, %c0_i32_0 : i32, i32
  }
  func.func @transform_1(%arg0: i32) -> (i32, i32) {
    %c0_i32 = arith.constant 0 : i32
    %c0_i32_0 = arith.constant 0 : i32
    %c0_i32_1 = arith.constant 0 : i32
    return %c0_i32, %c0_i32_0 : i32, i32
  }
  func.func @transform_2(%arg0: i32) -> (i32, i32) {
    %c0_i32 = arith.constant 0 : i32
    %c0_i32_0 = arith.constant 0 : i32
    %c0_i32_1 = arith.constant 0 : i32
    return %c0_i32, %c0_i32_0 : i32, i32
  }
  func.func @transform_3(%arg0: i32) -> (i32, i32) {
    %c0_i32 = arith.constant 0 : i32
    %c0_i32_0 = arith.constant 0 : i32
    %c0_i32_1 = arith.constant 0 : i32
    return %c0_i32, %c0_i32_0 : i32, i32
  }
  func.func @transform_4(%arg0: i32) -> (i32, i32) {
    %c0_i32 = arith.constant 0 : i32
    %c0_i32_0 = arith.constant 0 : i32
    %c0_i32_1 = arith.constant 0 : i32
    return %c0_i32, %c0_i32_0 : i32, i32
  }
  func.func @transform_5(%arg0: i32) -> (i32, i32) {
    %c0_i32 = arith.constant 0 : i32
    %c0_i32_0 = arith.constant 0 : i32
    %c0_i32_1 = arith.constant 0 : i32
    return %c0_i32, %c0_i32_0 : i32, i32
  }
  func.func @transform_6(%arg0: i32) -> (i32, i32) {
    %c0_i32 = arith.constant 0 : i32
    %c0_i32_0 = arith.constant 0 : i32
    %c0_i32_1 = arith.constant 0 : i32
    return %c0_i32, %c0_i32_0 : i32, i32
  }
}

</mosaic_0001>

<bundles_post_ra>
// kernel: lstm_forward.1
= control target key start
LH: loop header
LB: loop body
LE: loop exit
PB: predicated region body
PF: predicated region fallthrough
CT: control target
= control target key end

     0   :  { %s8295_s0 = inlined_call_operand.vmem [shape: f32[64,5], index: 0, kind: input, shape index: {}]   ;;  %s8296_s1 = inlined_call_operand.vmem [shape: f32[5,1024], index: 1, kind: input, shape index: {}]   ;;  %s8297_s2 = inlined_call_operand.hbm [shape: f32[256,1024], index: 2, kind: input, shape index: {}]   ;;  %s8298_s3 = inlined_call_operand.vmem [shape: f32[1,1024], index: 3, kind: input, shape index: {}]   ;;  %s8299_s4 = inlined_call_operand.vmem [shape: f32[256,1], index: 4, kind: input, shape index: {}]   ;;  %s8300_s5 = inlined_call_operand.<no memory space> [shape: f32[1,1], index: 5, kind: input, shape index: {}]   ;;  %s8301_s6 = inlined_call_operand.vmem [shape: f32[8,1], index: 6, kind: output, shape index: {}]  }
   0x1   :  { %v11_v0 = vstv %s8300_s5 }
   0x2   :  { %12 = vst [vmem:[#allocation3] sm:$0x1] %v11_v0 }
   0x3   :  { %13 = vsyncpa [#allocation5], 0  ;;  %s6479_s23 = smov [#allocation4]   ;;  %s6455_s27 = scalar_lea.hbm %s8297_s2, 32768 }
   0x4   :  { %s23_s24 = sshll.u32 %s6479_s23, 4  ;;  %p6456_p0 = scmp.ne.s32.totalorder %s8297_s2, %s6455_s27  ;;  %s24_s24 = int_to_ptr.vmem [resolvable:$true] %s23_s24 }
   0x5   :  { %p6459_p1 = scmp.lt.u32.totalorder %s6455_s27, %s8297_s2 }
   0x7   :  { %p6461_p2 = pnand %p6459_p1, %p6456_p0 }
   0x9   :  { %6464 = shalt.err (!%p6461_p2)
}
   0xa   :  { %s6465_s5 = scalar_lea.vmem %s24_s24, 32768  ;;  %p6470_p4 = scmp.lt.s32.totalorder %s24_s24, %s24_s24 }
   0xb   :  { %p6466_p3 = scmp.ne.s32.totalorder %s24_s24, %s6465_s5  ;;  %p6471_p5 = scmp.lt.s32.totalorder %s6465_s5, %s6465_s5 }
   0xd   :  { %p6472_p6 = por %p6471_p5, %p6470_p4 }
   0xf   :  { %p6473_p7 = pnand %p6472_p6, %p6466_p3 }
  0x11   :  { %6476 = shalt.err (!%p6473_p7)
}
  0x12   :  { %s6480_s8 = smov 1024   ;;  %s6481_s9 = smov 64  }
  0x13   :  { %29 = dma.hbm_to_vmem [thread:$0]  %s8297_s2, 32768, %s24_s24, [#allocation5], %s6480_s8, %s6480_s8, %s6481_s9  }
  0x14   :  { %6477 = dma.done.wait [#allocation5], 32768  }
  0x15   :  { %6478 = vsyncadd [#allocation5], 4294934528  ;;  %v8302_v1 = vmov 0.0   ;;  %vm122_vm0 = vcmask 1044480   ;;  %v48_v2 = vld [vmem:[%s8296_s1 + $0x8] sm:$0x1f] }
  0x16   :  { %211 = vmatprep.mubr.f32.mxu0 %v8302_v1  ;;  %235 = vmatprep.mubr.f32.mxu1 %v8302_v1  ;;  %v47_v3 = vld [vmem:[%s8296_s1] sm:$0x1f]  ;;  %vm97_vm1 = vcmask 39936   ;;  %v50_v6 = vld [vmem:[%s8296_s1 + $0x18] sm:$0x1f]  ;;  %v6568_v8 = vld [vmem:[%s8295_s0 + $0x8] sm:$0xff] }
  0x17   :  { %v6544_v4 = vld [vmem:[%s8295_s0] sm:$0xff]  ;;  %3856 = vmatprep.subr.msk.mxu0 %vm122_vm0, %v48_v2  ;;  %6061 = vmatprep.subr.msk.mxu1 %vm122_vm0, %v48_v2  ;;  %v49_v7 = vld [vmem:[%s8296_s1 + $0x10] sm:$0x1f]  ;;  %v6575_v9 = vld [vmem:[%s8295_s0 + $0x28] sm:$0xff]  ;;  %vm3842_vm2 = vcmask 7168  }
  0x18   :  { %v6551_v5 = vld [vmem:[%s8295_s0 + $0x20] sm:$0xff]  ;;  %3857 = vmatpush1.msk.msra.mxu0 %vm122_vm0, %v47_v3  ;;  %6062 = vmatpush1.msk.msra.mxu1 %vm122_vm0, %v47_v3  ;;  %v52_v10 = vld [vmem:[%s8296_s1 + $0x28] sm:$0x1f]  ;;  %v54_v13 = vld [vmem:[%s8296_s1 + $0x38] sm:$0x1f] }
  0x19   :  { %3858 = vmatmul.mubr.msk.f32.vlgmr.msra.gmra.mrb[0].mxu0 %vm97_vm1, %v6544_v4  ;;  %3862 = vmatmul.mubr.msk.f32.vlgmr.msra.gmra.mrb[0].mxu1 %vm97_vm1, %v6551_v5  ;;  %v664_v11 = vld [vmem:[#allocation4 + $0x8] sm:$0xff]  ;;  %v51_v14 = vld [vmem:[%s8296_s1 + $0x20] sm:$0x1f]  ;;  %v6619_v18 = vld [vmem:[%s8295_s0 + $0x18] sm:$0xff] }
  0x1a   :  { %3866 = vmatprep.subr.msk.mxu1 %vm122_vm0, %v50_v6  ;;  %217 = vmatprep.mubr.f32.mxu0 %v8302_v1  ;;  %v672_v12 = vld [vmem:[#allocation4 + $0x48] sm:$0xff]  ;;  %v6624_v19 = vld [vmem:[%s8295_s0 + $0x38] sm:$0xff]  ;;  %v663_v20 = vld [vmem:[#allocation4] sm:$0xff] }
  0x1b   :  { %3867 = vmatpush1.msk.msra.mxu1 %vm122_vm0, %v49_v7  ;;  %241 = vmatprep.mubr.f32.mxu1 %v8302_v1  ;;  %v6589_v15 = vpack.c.bf16 %v672_v12, %v664_v11  ;;  %v6601_v16 = vld [vmem:[%s8295_s0 + $0x10] sm:$0xff]  ;;  %v671_v21 = vld [vmem:[#allocation4 + $0x40] sm:$0xff]  ;;  %v666_v26 = vld [vmem:[#allocation4 + $0x18] sm:$0xff] }
  0x1c   :  { %3876 = vmatprep.subr.msk.mxu0 %vm122_vm0, %v52_v10  ;;  %3886 = vmatprep.subr.msk.mxu1 %vm122_vm0, %v54_v13  ;;  %v6606_v17 = vld [vmem:[%s8295_s0 + $0x30] sm:$0xff]  ;;  %v6632_v24 = vpack.c.bf16 %v671_v21, %v663_v20  ;;  %v679_v28 = vld [vmem:[#allocation4 + $0x80] sm:$0xff]  ;;  %v674_v30 = vld [vmem:[#allocation4 + $0x58] sm:$0xff] }
  0x1d   :  { %8591 = vst [vmem:[#allocation7_spill] sm:$0xff] %v6589_v15  ;;  %3859 = vmatmul.mubr.msk.f32.gmra.mrb[2].mxu0 %vm97_vm1, %v6568_v8  ;;  %3863 = vmatmul.mubr.msk.f32.gmra.mrb[2].mxu1 %vm97_vm1, %v6575_v9  ;;  %v680_v22 = vld [vmem:[#allocation4 + $0x88] sm:$0xff]  ;;  %v687_v29 = vld [vmem:[#allocation4 + $0xc0] sm:$0xff]  ;;  %v6639_v33 = vpack.c.bf16 %v674_v30, %v666_v26  ;;  %v665_v20 = vld [vmem:[#allocation4 + $0x10] sm:$0xff] }
  0x1e   :  { %223 = vmatprep.mubr.f32.mxu0 %v8302_v1  ;;  %247 = vmatprep.mubr.f32.mxu1 %v8302_v1  ;;  %v688_v23 = vld [vmem:[#allocation4 + $0xc8] sm:$0xff]  ;;  %8592 = vst [vmem:[#allocation8_spill] sm:$0xff] %v6632_v24  ;;  %v6647_v34 = vpack.c.bf16 %v687_v29, %v679_v28  ;;  %v695_v36 = vld [vmem:[#allocation4 + $0x100] sm:$0xff]  ;;  %v673_v21 = vld [vmem:[#allocation4 + $0x50] sm:$0xff] }
  0x1f   :  { %3877 = vmatpush1.msk.msra.mxu0 %vm122_vm0, %v51_v14  ;;  %v53_v25 = vld [vmem:[%s8296_s1 + $0x30] sm:$0x1f]  ;;  %v6637_v27 = vpack.c.bf16 %v688_v23, %v680_v22  ;;  %8594 = vst [vmem:[#allocation10_spill] sm:$0xff] %v6639_v33  ;;  %v703_v37 = vld [vmem:[#allocation4 + $0x140] sm:$0xff]  ;;  %v690_v26 = vld [vmem:[#allocation4 + $0xd8] sm:$0xff]  ;;  %v6735_v29 = vpack.c.bf16 %v673_v21, %v665_v20 }
  0x20   :  { %3982 = vmatprep.subr.bf16.mxu0 %v6589_v15  ;;  %v696_v31 = vld [vmem:[#allocation4 + $0x108] sm:$0xff]  ;;  %8595 = vst [vmem:[#allocation11_spill] sm:$0xff] %v6647_v34  ;;  %v6661_v40 = vpack.c.bf16 %v703_v37, %v695_v36  ;;  %v711_v42 = vld [vmem:[#allocation4 + $0x180] sm:$0xff]  ;;  %v681_v37 = vld [vmem:[#allocation4 + $0x90] sm:$0xff] }
  0x21   :  { %3860 = vmatmul.mubr.msk.f32.gmra.mrb[4].mxu0 %vm97_vm1, %v6601_v16  ;;  %3864 = vmatmul.mubr.msk.f32.gmra.mrb[4].mxu1 %vm97_vm1, %v6606_v17  ;;  %8593 = vst [vmem:[#allocation9_spill] sm:$0xff] %v6637_v27  ;;  %v704_v32 = vld [vmem:[#allocation4 + $0x148] sm:$0xff]  ;;  %v719_v43 = vld [vmem:[#allocation4 + $0x1c0] sm:$0xff]  ;;  %8610 = vst [vmem:[#allocation26_spill] sm:$0xff] %v6735_v29 }
  0x22   :  { %229 = vmatprep.mubr.f32.mxu0 %v8302_v1  ;;  %253 = vmatprep.mubr.f32.mxu1 %v8302_v1  ;;  %v6651_v35 = vpack.c.bf16 %v704_v32, %v696_v31  ;;  %v712_v38 = vld [vmem:[#allocation4 + $0x188] sm:$0xff]  ;;  %8597 = vst [vmem:[#allocation13_spill] sm:$0xff] %v6661_v40  ;;  %v6673_v46 = vpack.c.bf16 %v719_v43, %v711_v42  ;;  %v727_v48 = vld [vmem:[#allocation4 + $0x200] sm:$0xff]  ;;  %v698_v43 = vld [vmem:[#allocation4 + $0x118] sm:$0xff] }
  0x23   :  { %v720_v39 = vld [vmem:[#allocation4 + $0x1c8] sm:$0xff]  ;;  %v735_v49 = vld [vmem:[#allocation4 + $0x240] sm:$0xff]  ;;  %v730_v21 = vld [vmem:[#allocation4 + $0x218] sm:$0xff] }
  0x24   :  { %8596 = vst [vmem:[#allocation12_spill] sm:$0xff] %v6651_v35  ;;  %v6664_v41 = vpack.c.bf16 %v720_v39, %v712_v38  ;;  %v728_v44 = vld [vmem:[#allocation4 + $0x208] sm:$0xff]  ;;  %8599 = vst [vmem:[#allocation15_spill] sm:$0xff] %v6673_v46  ;;  %v6685_v52 = vpack.c.bf16 %v735_v49, %v727_v48  ;;  %v743_v54 = vld [vmem:[#allocation4 + $0x280] sm:$0xff] }
  0x25   :  { %3861 = vmatmul.mubr.msk.f32.gmra.mrb[6].mxu0 %vm97_vm1, %v6619_v18  ;;  %3865 = vmatmul.mubr.msk.f32.gmra.mrb[6].mxu1 %vm97_vm1, %v6624_v19  ;;  %v736_v45 = vld [vmem:[#allocation4 + $0x248] sm:$0xff]  ;;  %v751_v55 = vld [vmem:[#allocation4 + $0x2c0] sm:$0xff]  ;;  %v689_v38 = vld [vmem:[#allocation4 + $0xd0] sm:$0xff] }
  0x26   :  { %324 = vmatprep.mubr.f32.mxu1 %v8302_v1  ;;  %437 = vmatprep.mubr.f32.mxu0 %v8302_v1  ;;  %8598 = vst [vmem:[#allocation14_spill] sm:$0xff] %v6664_v41  ;;  %v6676_v47 = vpack.c.bf16 %v736_v45, %v728_v44  ;;  %v744_v50 = vld [vmem:[#allocation4 + $0x288] sm:$0xff]  ;;  %8601 = vst [vmem:[#allocation17_spill] sm:$0xff] %v6685_v52  ;;  %v6697_v58 = vpack.c.bf16 %v751_v55, %v743_v54  ;;  %v759_v60 = vld [vmem:[#allocation4 + $0x300] sm:$0xff] }
  0x27   :  { %v752_v51 = vld [vmem:[#allocation4 + $0x2c8] sm:$0xff]  ;;  %v767_v61 = vld [vmem:[#allocation4 + $0x340] sm:$0xff]  ;;  %v706_v44 = vld [vmem:[#allocation4 + $0x158] sm:$0xff]  ;;  %v6749_v48 = vpack.c.bf16 %v689_v38, %v681_v37 }
  0x28   :  { %8600 = vst [vmem:[#allocation16_spill] sm:$0xff] %v6676_v47  ;;  %v6688_v53 = vpack.c.bf16 %v752_v51, %v744_v50  ;;  %v760_v56 = vld [vmem:[#allocation4 + $0x308] sm:$0xff]  ;;  %8603 = vst [vmem:[#allocation19_spill] sm:$0xff] %v6697_v58  ;;  %v6709_v0 = vpack.c.bf16 %v767_v61, %v759_v60  ;;  %v775_v3 = vld [vmem:[#allocation4 + $0x380] sm:$0xff]  ;;  %v6755_v54 = vpack.c.bf16 %v706_v44, %v698_v43 }
  0x29   :  { %3868 = vmatmul.mubr.msk.f32.vlgmr.msra.gmra.mrb[8].mxu1 %vm97_vm1, %v6544_v4  ;;  %3878 = vmatmul.mubr.msk.f32.vlgmr.msra.gmra.mrb[8].mxu0 %vm97_vm1, %v6544_v4  ;;  %v768_v57 = vld [vmem:[#allocation4 + $0x348] sm:$0xff]  ;;  %v783_v6 = vld [vmem:[#allocation4 + $0x3c0] sm:$0xff]  ;;  %8614 = vst [vmem:[#allocation30_spill] sm:$0xff] %v6749_v48  ;;  %v697_v55 = vld [vmem:[#allocation4 + $0x110] sm:$0xff] }
  0x2a   :  { %3984 = vmatpush1.bf16.msra.mxu0 %v6632_v24  ;;  %3887 = vmatpush1.msk.msra.mxu1 %vm122_vm0, %v53_v25  ;;  %8602 = vst [vmem:[#allocation18_spill] sm:$0xff] %v6688_v53  ;;  %v6700_v59 = vpack.c.bf16 %v768_v57, %v760_v56  ;;  %v776_v62 = vld [vmem:[#allocation4 + $0x388] sm:$0xff]  ;;  %8605 = vst [vmem:[#allocation21_spill] sm:$0xff] %v6709_v0  ;;  %v6721_v11 = vpack.c.bf16 %v783_v6, %v775_v3  ;;  %v791_v12 = vld [vmem:[#allocation4 + $0x400] sm:$0xff] }
  0x2b   :  { %330 = vmatprep.mubr.f32.mxu1 %v8302_v1  ;;  %3986 = vmatprep.subr.bf16.mxu0 %v6637_v27  ;;  %v784_v63 = vld [vmem:[#allocation4 + $0x3c8] sm:$0xff]  ;;  %v799_v13 = vld [vmem:[#allocation4 + $0x440] sm:$0xff]  ;;  %v682_v25 = vld [vmem:[#allocation4 + $0x98] sm:$0xff]  ;;  %8616 = vst [vmem:[#allocation32_spill] sm:$0xff] %v6755_v54 }
  0x2c   :  { %4046 = vmatprep.subr.bf16.mxu1 %v6639_v33  ;;  %443 = vmatprep.mubr.f32.mxu0 %v8302_v1  ;;  %8604 = vst [vmem:[#allocation20_spill] sm:$0xff] %v6700_v59  ;;  %v6712_v2 = vpack.c.bf16 %v784_v63, %v776_v62  ;;  %v792_v7 = vld [vmem:[#allocation4 + $0x408] sm:$0xff]  ;;  %8607 = vst [vmem:[#allocation23_spill] sm:$0xff] %v6721_v11  ;;  %v6733_v28 = vpack.c.bf16 %v799_v13, %v791_v12  ;;  %v807_v30 = vld [vmem:[#allocation4 + $0x480] sm:$0xff] }
  0x2d   :  { %3869 = vmatmul.mubr.msk.f32.gmra.mrb[10].mxu1 %vm97_vm1, %v6568_v8  ;;  %3879 = vmatmul.mubr.msk.f32.gmra.mrb[10].mxu0 %vm97_vm1, %v6568_v8  ;;  %v800_v10 = vld [vmem:[#allocation4 + $0x448] sm:$0xff]  ;;  %v815_v31 = vld [vmem:[#allocation4 + $0x4c0] sm:$0xff]  ;;  %v6740_v36 = vpack.c.bf16 %v690_v26, %v682_v25  ;;  %v714_v60 = vld [vmem:[#allocation4 + $0x198] sm:$0xff] }
  0x2e   :  { %3988 = vmatpush1.bf16.msra.mxu0 %v6647_v34  ;;  %336 = vmatprep.mubr.f32.mxu1 %v8302_v1  ;;  %8606 = vst [vmem:[#allocation22_spill] sm:$0xff] %v6712_v2  ;;  %v6724_v14 = vpack.c.bf16 %v800_v10, %v792_v7  ;;  %v808_v22 = vld [vmem:[#allocation4 + $0x488] sm:$0xff]  ;;  %8609 = vst [vmem:[#allocation25_spill] sm:$0xff] %v6733_v28  ;;  %v6747_v45 = vpack.c.bf16 %v815_v31, %v807_v30  ;;  %v823_v49 = vld [vmem:[#allocation4 + $0x500] sm:$0xff] }
  0x2f   :  { %3990 = vmatprep.subr.bf16.mxu0 %v6651_v35  ;;  %449 = vmatprep.mubr.f32.mxu0 %v8302_v1  ;;  %v816_v23 = vld [vmem:[#allocation4 + $0x4c8] sm:$0xff]  ;;  %8612 = vst [vmem:[#allocation28_spill] sm:$0xff] %v6740_v36  ;;  %v831_v50 = vld [vmem:[#allocation4 + $0x540] sm:$0xff]  ;;  %v722_v61 = vld [vmem:[#allocation4 + $0x1d8] sm:$0xff] }
  0x30   :  { %8608 = vst [vmem:[#allocation24_spill] sm:$0xff] %v6724_v14  ;;  %v6738_v32 = vpack.c.bf16 %v816_v23, %v808_v22  ;;  %v824_v39 = vld [vmem:[#allocation4 + $0x508] sm:$0xff]  ;;  %8613 = vst [vmem:[#allocation29_spill] sm:$0xff] %v6747_v45  ;;  %v6762_v62 = vpack.c.bf16 %v831_v50, %v823_v49  ;;  %v839_v3 = vld [vmem:[#allocation4 + $0x580] sm:$0xff]  ;;  %v6770_v10 = vpack.c.bf16 %v722_v61, %v714_v60 }
  0x31   :  { %3870 = vmatmul.mubr.msk.f32.gmra.mrb[12].mxu1 %vm97_vm1, %v6601_v16  ;;  %3880 = vmatmul.mubr.msk.f32.gmra.mrb[12].mxu0 %vm97_vm1, %v6601_v16  ;;  %v832_v42 = vld [vmem:[#allocation4 + $0x548] sm:$0xff]  ;;  %v847_v6 = vld [vmem:[#allocation4 + $0x5c0] sm:$0xff]  ;;  %v713_v12 = vld [vmem:[#allocation4 + $0x190] sm:$0xff] }
  0x32   :  { %3992 = vmatpush1.bf16.msra.mxu0 %v6661_v40  ;;  %342 = vmatprep.mubr.f32.mxu1 %v8302_v1  ;;  %8611 = vst [vmem:[#allocation27_spill] sm:$0xff] %v6738_v32  ;;  %v6753_v51 = vpack.c.bf16 %v832_v42, %v824_v39  ;;  %v840_v56 = vld [vmem:[#allocation4 + $0x588] sm:$0xff]  ;;  %8617 = vst [vmem:[#allocation33_spill] sm:$0xff] %v6762_v62  ;;  %v738_v22 = vld [vmem:[#allocation4 + $0x258] sm:$0xff]  ;;  %v6777_v23 = vpack.c.bf16 %v847_v6, %v839_v3 }
  0x33   :  { %3994 = vmatprep.subr.bf16.mxu0 %v6664_v41  ;;  %455 = vmatprep.mubr.f32.mxu0 %v8302_v1  ;;  %v848_v57 = vld [vmem:[#allocation4 + $0x5c8] sm:$0xff]  ;;  %8620 = vst [vmem:[#allocation36_spill] sm:$0xff] %v6770_v10  ;;  %v855_v26 = vld [vmem:[#allocation4 + $0x600] sm:$0xff]  ;;  %v6785_v37 = vpack.c.bf16 %v738_v22, %v730_v21  ;;  %v729_v38 = vld [vmem:[#allocation4 + $0x210] sm:$0xff] }
  0x34   :  { %8615 = vst [vmem:[#allocation31_spill] sm:$0xff] %v6753_v51  ;;  %v6768_v7 = vpack.c.bf16 %v848_v57, %v840_v56  ;;  %v856_v13 = vld [vmem:[#allocation4 + $0x608] sm:$0xff]  ;;  %8621 = vst [vmem:[#allocation37_spill] sm:$0xff] %v6777_v23  ;;  %v863_v30 = vld [vmem:[#allocation4 + $0x640] sm:$0xff] }
  0x35   :  { %3871 = vmatmul.mubr.msk.f32.gmra.mrb[14].mxu1 %vm97_vm1, %v6619_v18  ;;  %3881 = vmatmul.mubr.msk.f32.gmra.mrb[14].mxu0 %vm97_vm1, %v6619_v18  ;;  %v864_v20 = vld [vmem:[#allocation4 + $0x648] sm:$0xff]  ;;  %8624 = vst [vmem:[#allocation40_spill] sm:$0xff] %v6785_v37  ;;  %v746_v43 = vld [vmem:[#allocation4 + $0x298] sm:$0xff]  ;;  %v6792_v49 = vpack.c.bf16 %v863_v30, %v855_v26  ;;  %v745_v60 = vld [vmem:[#allocation4 + $0x290] sm:$0xff] }
  0x36   :  { %3996 = vmatpush1.bf16.msra.mxu0 %v6673_v46  ;;  %348 = vmatprep.mubr.f32.mxu1 %v8302_v1  ;;  %8619 = vst [vmem:[#allocation35_spill] sm:$0xff] %v6768_v7  ;;  %v6783_v31 = vpack.c.bf16 %v864_v20, %v856_v13  ;;  %v872_v39 = vld [vmem:[#allocation4 + $0x688] sm:$0xff]  ;;  %v754_v44 = vld [vmem:[#allocation4 + $0x2d8] sm:$0xff]  ;;  %v887_v20 = vld [vmem:[#allocation4 + $0x700] sm:$0xff] }
  0x37   :  { %3998 = vmatprep.subr.bf16.mxu0 %v6676_v47  ;;  %461 = vmatprep.mubr.f32.mxu0 %v8302_v1  ;;  %v880_v42 = vld [vmem:[#allocation4 + $0x6c8] sm:$0xff]  ;;  %8625 = vst [vmem:[#allocation41_spill] sm:$0xff] %v6792_v49  ;;  %v6800_v57 = vpack.c.bf16 %v754_v44, %v746_v43  ;;  %v762_v6 = vld [vmem:[#allocation4 + $0x318] sm:$0xff]  ;;  %v895_v21 = vld [vmem:[#allocation4 + $0x740] sm:$0xff] }
  0x38   :  { %8623 = vst [vmem:[#allocation39_spill] sm:$0xff] %v6783_v31  ;;  %v6798_v56 = vpack.c.bf16 %v880_v42, %v872_v39  ;;  %v888_v61 = vld [vmem:[#allocation4 + $0x708] sm:$0xff]  ;;  %v761_v30 = vld [vmem:[#allocation4 + $0x310] sm:$0xff]  ;;  %v778_v39 = vld [vmem:[#allocation4 + $0x398] sm:$0xff]  ;;  %v6822_v43 = vpack.c.bf16 %v895_v21, %v887_v20  ;;  %v8637_v20 = vmov 0.0  }
  0x39   :  { %3872 = vmatmul.mubr.msk.f32.gmra.mrb[16].mxu1 %vm97_vm1, %v6551_v5  ;;  %3882 = vmatmul.mubr.msk.f32.gmra.mrb[16].mxu0 %vm97_vm1, %v6551_v5  ;;  %8628 = vst [vmem:[#allocation44_spill] sm:$0xff] %v6800_v57  ;;  %v896_v3 = vld [vmem:[#allocation4 + $0x748] sm:$0xff]  ;;  %v786_v42 = vld [vmem:[#allocation4 + $0x3d8] sm:$0xff] }
  0x3a   :  { %4000 = vmatpush1.bf16.msra.mxu0 %v6685_v52  ;;  %354 = vmatprep.mubr.f32.mxu1 %v8302_v1  ;;  %8627 = vst [vmem:[#allocation43_spill] sm:$0xff] %v6798_v56  ;;  %v6813_v22 = vpack.c.bf16 %v896_v3, %v888_v61  ;;  %8633 = vst [vmem:[#allocation49_spill] sm:$0xff] %v6822_v43  ;;  %v777_v61 = vld [vmem:[#allocation4 + $0x390] sm:$0xff]  ;;  %v794_v3 = vld [vmem:[#allocation4 + $0x418] sm:$0xff] }
  0x3b   :  { %4002 = vmatprep.subr.bf16.mxu0 %v6688_v53  ;;  %467 = vmatprep.mubr.f32.mxu0 %v8302_v1 }
  0x3c   :  { %8631 = vst [vmem:[#allocation47_spill] sm:$0xff] %v6813_v22 }
  0x3d   :  { %3873 = vmatmul.mubr.msk.f32.gmra.mrb[18].mxu1 %vm97_vm1, %v6575_v9  ;;  %3883 = vmatmul.mubr.msk.f32.gmra.mrb[18].mxu0 %vm97_vm1, %v6575_v9 }
  0x3e   :  { %4004 = vmatpush1.bf16.msra.mxu0 %v6697_v58  ;;  %360 = vmatprep.mubr.f32.mxu1 %v8302_v1 }
  0x3f   :  { %4006 = vmatprep.subr.bf16.mxu0 %v6700_v59  ;;  %473 = vmatprep.mubr.f32.mxu0 %v8302_v1 }
  0x41   :  { %3874 = vmatmul.mubr.msk.f32.gmra.mrb[20].mxu1 %vm97_vm1, %v6606_v17  ;;  %3884 = vmatmul.mubr.msk.f32.gmra.mrb[20].mxu0 %vm97_vm1, %v6606_v17 }
  0x42   :  { %4008 = vmatpush1.bf16.msra.mxu0 %v6709_v0  ;;  %366 = vmatprep.mubr.f32.mxu1 %v8302_v1 }
  0x43   :  { %4010 = vmatprep.subr.bf16.mxu0 %v6712_v2  ;;  %479 = vmatprep.mubr.f32.mxu0 %v8302_v1 }
  0x45   :  { %3875 = vmatmul.mubr.msk.f32.gmra.mrb[22].mxu1 %vm97_vm1, %v6624_v19  ;;  %3885 = vmatmul.mubr.msk.f32.gmra.mrb[22].mxu0 %vm97_vm1, %v6624_v19 }
  0x46   :  { %4012 = vmatpush1.bf16.msra.mxu0 %v6721_v11  ;;  %550 = vmatprep.mubr.f32.mxu1 %v8302_v1 }
  0x47   :  { %4014 = vmatprep.subr.bf16.mxu0 %v6724_v14  ;;  %994 = vmatprep.mubr.f32.mxu0 %v8302_v1 }
  0x49   :  { %3888 = vmatmul.mubr.msk.f32.vlgmr.msra.gmra.mrb[24].mxu1 %vm97_vm1, %v6544_v4  ;;  %v705_v4 = vld [vmem:[#allocation4 + $0x150] sm:$0xff] }
  0x4a   :  { %4016 = vmatpush1.bf16.msra.mxu0 %v6733_v28  ;;  %4048 = vmatpush1.bf16.msra.mxu1 %v6735_v29  ;;  %v6764_v63 = vpack.c.bf16 %v705_v4, %v697_v55  ;;  %v871_v55 = vld [vmem:[#allocation4 + $0x680] sm:$0xff] }
  0x4b   :  { %4018 = vmatprep.subr.bf16.mxu0 %v6738_v32  ;;  %4050 = vmatprep.subr.bf16.mxu1 %v6740_v36  ;;  %v879_v4 = vld [vmem:[#allocation4 + $0x6c0] sm:$0xff] }
  0x4c   :  { %556 = vmatprep.mubr.f32.mxu1 %v8302_v1  ;;  %8618 = vst [vmem:[#allocation34_spill] sm:$0xff] %v6764_v63 }
  0x4d   :  { %3889 = vmatmul.mubr.msk.f32.gmra.mrb[26].mxu1 %vm97_vm1, %v6568_v8  ;;  %v721_v8 = vld [vmem:[#allocation4 + $0x1d0] sm:$0xff] }
  0x4e   :  { %4020 = vmatpush1.bf16.msra.mxu0 %v6747_v45  ;;  %4052 = vmatpush1.bf16.msra.mxu1 %v6749_v48  ;;  %v6779_v25 = vpack.c.bf16 %v721_v8, %v713_v12  ;;  %v770_v12 = vld [vmem:[#allocation4 + $0x358] sm:$0xff]  ;;  %v6807_v8 = vpack.c.bf16 %v879_v4, %v871_v55  ;;  %v903_v55 = vld [vmem:[#allocation4 + $0x780] sm:$0xff] }
  0x4f   :  { %4022 = vmatprep.subr.bf16.mxu0 %v6753_v51  ;;  %4054 = vmatprep.subr.bf16.mxu1 %v6755_v54  ;;  %v6815_v26 = vpack.c.bf16 %v770_v12, %v762_v6  ;;  %v911_v4 = vld [vmem:[#allocation4 + $0x7c0] sm:$0xff]  ;;  %v802_v6 = vld [vmem:[#allocation4 + $0x458] sm:$0xff]  ;;  %v668_v12 = vld [vmem:[#allocation4 + $0x28] sm:$0xff] }
  0x50   :  { %562 = vmatprep.mubr.f32.mxu1 %v8302_v1  ;;  %8622 = vst [vmem:[#allocation38_spill] sm:$0xff] %v6779_v25  ;;  %8629 = vst [vmem:[#allocation45_spill] sm:$0xff] %v6807_v8  ;;  %v6837_v21 = vpack.c.bf16 %v911_v4, %v903_v55 }
  0x51   :  { %3890 = vmatmul.mubr.msk.f32.gmra.mrb[28].mxu1 %vm97_vm1, %v6601_v16  ;;  %v737_v16 = vld [vmem:[#allocation4 + $0x250] sm:$0xff]  ;;  %8632 = vst [vmem:[#allocation48_spill] sm:$0xff] %v6815_v26 }
  0x52   :  { %4024 = vmatpush1.bf16.msra.mxu0 %v6762_v62  ;;  %4056 = vmatpush1.bf16.msra.mxu1 %v6764_v63  ;;  %v6794_v50 = vpack.c.bf16 %v737_v16, %v729_v38  ;;  %v904_v38 = vld [vmem:[#allocation4 + $0x788] sm:$0xff]  ;;  %8638 = vst [vmem:[#allocation53_spill] sm:$0xff] %v6837_v21 }
  0x53   :  { %4026 = vmatprep.subr.bf16.mxu0 %v6768_v7  ;;  %4058 = vmatprep.subr.bf16.mxu1 %v6770_v10  ;;  %v912_v16 = vld [vmem:[#allocation4 + $0x7c8] sm:$0xff] }
  0x54   :  { %568 = vmatprep.mubr.f32.mxu1 %v8302_v1  ;;  %8626 = vst [vmem:[#allocation42_spill] sm:$0xff] %v6794_v50 }
  0x55   :  { %3891 = vmatmul.mubr.msk.f32.gmra.mrb[30].mxu1 %vm97_vm1, %v6619_v18  ;;  %v753_v18 = vld [vmem:[#allocation4 + $0x2d0] sm:$0xff] }
  0x56   :  { %4028 = vmatpush1.bf16.msra.mxu0 %v6777_v23  ;;  %4060 = vmatpush1.bf16.msra.mxu1 %v6779_v25  ;;  %v6809_v13 = vpack.c.bf16 %v753_v18, %v745_v60  ;;  %v6828_v60 = vpack.c.bf16 %v912_v16, %v904_v38  ;;  %v6830_v18 = vpack.c.bf16 %v786_v42, %v778_v39  ;;  %v801_v38 = vld [vmem:[#allocation4 + $0x450] sm:$0xff]  ;;  %v667_v42 = vld [vmem:[#allocation4 + $0x20] sm:$0xff] }
  0x57   :  { %4030 = vmatprep.subr.bf16.mxu0 %v6783_v31  ;;  %4062 = vmatprep.subr.bf16.mxu1 %v6785_v37  ;;  %v6843_v16 = vpack.c.bf16 %v802_v6, %v794_v3  ;;  %v683_v6 = vld [vmem:[#allocation4 + $0xa0] sm:$0xff] }
  0x58   :  { %574 = vmatprep.mubr.f32.mxu1 %v8302_v1  ;;  %8630 = vst [vmem:[#allocation46_spill] sm:$0xff] %v6809_v13  ;;  %8635 = vst [vmem:[#allocation51_spill] sm:$0xff] %v6828_v60 }
  0x59   :  { %3892 = vmatmul.mubr.msk.f32.gmra.mrb[32].mxu1 %vm97_vm1, %v6551_v5  ;;  %v769_v5 = vld [vmem:[#allocation4 + $0x350] sm:$0xff]  ;;  %8636 = vst [vmem:[#allocation52_spill] sm:$0xff] %v6830_v18  ;;  %8640 = vst [vmem:[#allocation55_spill] sm:$0xff] %v6843_v16 }
  0x5a   :  { %4032 = vmatpush1.bf16.msra.mxu0 %v6792_v49  ;;  %4064 = vmatpush1.bf16.msra.mxu1 %v6794_v50  ;;  %v6824_v44 = vpack.c.bf16 %v769_v5, %v761_v30  ;;  %v793_v5 = vld [vmem:[#allocation4 + $0x410] sm:$0xff] }
  0x5b   :  { %4034 = vmatprep.subr.bf16.mxu0 %v6798_v56  ;;  %4066 = vmatprep.subr.bf16.mxu1 %v6800_v57  ;;  %v6852_v55 = vpack.c.bf16 %v801_v38, %v793_v5 }
  0x5c   :  { %580 = vmatprep.mubr.f32.mxu1 %v8302_v1  ;;  %8634 = vst [vmem:[#allocation50_spill] sm:$0xff] %v6824_v44  ;;  %v676_v1 = vld [vmem:[#allocation4 + $0x68] sm:$0xff] }
  0x5d   :  { %3893 = vmatmul.mubr.msk.f32.gmra.mrb[34].mxu1 %vm97_vm1, %v6575_v9  ;;  %v785_v9 = vld [vmem:[#allocation4 + $0x3d0] sm:$0xff]  ;;  %v6845_v39 = vpack.c.bf16 %v676_v1, %v668_v12  ;;  %8642 = vst [vmem:[#allocation57_spill] sm:$0xff] %v6852_v55  ;;  %v826_v12 = vld [vmem:[#allocation4 + $0x518] sm:$0xff] }
  0x5e   :  { %4036 = vmatpush1.bf16.msra.mxu0 %v6807_v8  ;;  %4068 = vmatpush1.bf16.msra.mxu1 %v6809_v13  ;;  %v6839_v30 = vpack.c.bf16 %v785_v9, %v777_v61  ;;  %v809_v1 = vld [vmem:[#allocation4 + $0x490] sm:$0xff] }
  0x5f   :  { %4038 = vmatprep.subr.bf16.mxu0 %v6813_v22  ;;  %4070 = vmatprep.subr.bf16.mxu1 %v6815_v26  ;;  %8641 = vst [vmem:[#allocation56_spill] sm:$0xff] %v6845_v39  ;;  %v810_v22 = vld [vmem:[#allocation4 + $0x498] sm:$0xff]  ;;  %v684_v26 = vld [vmem:[#allocation4 + $0xa8] sm:$0xff]  ;;  %v817_v61 = vld [vmem:[#allocation4 + $0x4d0] sm:$0xff] }
  0x60   :  { %586 = vmatprep.mubr.f32.mxu1 %v8637_v20  ;;  %8639 = vst [vmem:[#allocation54_spill] sm:$0xff] %v6839_v30  ;;  %v6866_v5 = vpack.c.bf16 %v817_v61, %v809_v1 }
  0x61   :  { %3894 = vmatmul.mubr.msk.f32.gmra.mrb[36].mxu1 %vm97_vm1, %v6606_v17  ;;  %v675_v17 = vld [vmem:[#allocation4 + $0x60] sm:$0xff] }
  0x62   :  { %4040 = vmatpush1.bf16.msra.mxu0 %v6822_v43  ;;  %4072 = vmatpush1.bf16.msra.mxu1 %v6824_v44  ;;  %v818_v43 = vld [vmem:[#allocation4 + $0x4d8] sm:$0xff]  ;;  %v692_v44 = vld [vmem:[#allocation4 + $0xe8] sm:$0xff]  ;;  %v6854_v4 = vpack.c.bf16 %v675_v17, %v667_v42  ;;  %8646 = vst [vmem:[#allocation61_spill] sm:$0xff] %v6866_v5  ;;  %v699_v42 = vld [vmem:[#allocation4 + $0x120] sm:$0xff] }
  0x63   :  { %4042 = vmatprep.subr.bf16.mxu0 %v6828_v60  ;;  %4074 = vmatprep.subr.bf16.mxu1 %v6830_v18  ;;  %v6858_v9 = vpack.c.bf16 %v818_v43, %v810_v22  ;;  %v6860_v3 = vpack.c.bf16 %v692_v44, %v684_v26  ;;  %v700_v60 = vld [vmem:[#allocation4 + $0x128] sm:$0xff]  ;;  %v825_v26 = vld [vmem:[#allocation4 + $0x510] sm:$0xff]  ;;  %v707_v17 = vld [vmem:[#allocation4 + $0x160] sm:$0xff] }
  0x64   :  { %592 = vmatprep.mubr.f32.mxu1 %v8637_v20  ;;  %8643 = vst [vmem:[#allocation58_spill] sm:$0xff] %v6854_v4  ;;  %v833_v43 = vld [vmem:[#allocation4 + $0x550] sm:$0xff]  ;;  %v6881_v61 = vpack.c.bf16 %v707_v17, %v699_v42 }
  0x65   :  { %3895 = vmatmul.mubr.msk.f32.gmra.mrb[38].mxu1 %vm97_vm1, %v6624_v19  ;;  %8644 = vst [vmem:[#allocation59_spill] sm:$0xff] %v6858_v9  ;;  %8645 = vst [vmem:[#allocation60_spill] sm:$0xff] %v6860_v3  ;;  %v691_v19 = vld [vmem:[#allocation4 + $0xe0] sm:$0xff]  ;;  %v6879_v1 = vpack.c.bf16 %v833_v43, %v825_v26  ;;  %v857_v42 = vld [vmem:[#allocation4 + $0x610] sm:$0xff] }
  0x66   :  { %4044 = vmatpush1.bf16.msra.mxu0 %v6837_v21  ;;  %4076 = vmatpush1.bf16.msra.mxu1 %v6839_v30  ;;  %v834_v21 = vld [vmem:[#allocation4 + $0x558] sm:$0xff]  ;;  %v708_v30 = vld [vmem:[#allocation4 + $0x168] sm:$0xff]  ;;  %v6868_v22 = vpack.c.bf16 %v691_v19, %v683_v6  ;;  %8651 = vst [vmem:[#allocation66_spill] sm:$0xff] %v6881_v61  ;;  %v849_v6 = vld [vmem:[#allocation4 + $0x5d0] sm:$0xff] }
  0x67   :  { %4078 = vmatprep.subr.bf16.mxu1 %v6843_v16  ;;  %4110 = vmatprep.subr.bf16.mxu0 %v6845_v39  ;;  %v6872_v44 = vpack.c.bf16 %v834_v21, %v826_v12  ;;  %v6874_v38 = vpack.c.bf16 %v708_v30, %v700_v60  ;;  %v842_v39 = vld [vmem:[#allocation4 + $0x598] sm:$0xff]  ;;  %v716_v16 = vld [vmem:[#allocation4 + $0x1a8] sm:$0xff]  ;;  %8650 = vst [vmem:[#allocation65_spill] sm:$0xff] %v6879_v1  ;;  %v841_v21 = vld [vmem:[#allocation4 + $0x590] sm:$0xff] }
  0x68   :  { %1065 = vmatprep.mubr.f32.mxu1 %v8637_v20  ;;  %8647 = vst [vmem:[#allocation62_spill] sm:$0xff] %v6868_v22  ;;  %v715_v19 = vld [vmem:[#allocation4 + $0x1a0] sm:$0xff]  ;;  %v6891_v26 = vpack.c.bf16 %v849_v6, %v841_v21  ;;  %v865_v17 = vld [vmem:[#allocation4 + $0x650] sm:$0xff] }
  0x69   :  { %995 = vmatmul.mubr.f32.vlgmr.msra.gmra.mrb[0].mxu0 %v8637_v20  ;;  %8648 = vst [vmem:[#allocation63_spill] sm:$0xff] %v6872_v44  ;;  %8649 = vst [vmem:[#allocation64_spill] sm:$0xff] %v6874_v38  ;;  %v723_v12 = vld [vmem:[#allocation4 + $0x1e0] sm:$0xff]  ;;  %v6903_v21 = vpack.c.bf16 %v865_v17, %v857_v42 }
  0x6a   :  { %4080 = vmatpush1.bf16.msra.mxu1 %v6852_v55  ;;  %4112 = vmatpush1.bf16.msra.mxu0 %v6854_v4  ;;  %v850_v55 = vld [vmem:[#allocation4 + $0x5d8] sm:$0xff]  ;;  %v724_v4 = vld [vmem:[#allocation4 + $0x1e8] sm:$0xff]  ;;  %8654 = vst [vmem:[#allocation69_spill] sm:$0xff] %v6891_v26  ;;  %v6893_v43 = vpack.c.bf16 %v723_v12, %v715_v19  ;;  %v873_v19 = vld [vmem:[#allocation4 + $0x690] sm:$0xff] }
  0x6b   :  { %4082 = vmatprep.subr.bf16.mxu1 %v6858_v9  ;;  %4114 = vmatprep.subr.bf16.mxu0 %v6860_v3  ;;  %v6885_v60 = vpack.c.bf16 %v850_v55, %v842_v39  ;;  %v6887_v30 = vpack.c.bf16 %v724_v4, %v716_v16  ;;  %v858_v3 = vld [vmem:[#allocation4 + $0x618] sm:$0xff]  ;;  %v732_v9 = vld [vmem:[#allocation4 + $0x228] sm:$0xff]  ;;  %v731_v55 = vld [vmem:[#allocation4 + $0x220] sm:$0xff]  ;;  %8658 = vst [vmem:[#allocation73_spill] sm:$0xff] %v6903_v21 }
  0x6c   :  { %1136 = vmatprep.mubr.f32.mxu0 %v8637_v20  ;;  %8655 = vst [vmem:[#allocation70_spill] sm:$0xff] %v6893_v43  ;;  %v739_v4 = vld [vmem:[#allocation4 + $0x260] sm:$0xff]  ;;  %v881_v12 = vld [vmem:[#allocation4 + $0x6d0] sm:$0xff] }
  0x6d   :  { %8652 = vst [vmem:[#allocation67_spill] sm:$0xff] %v6885_v60  ;;  %8653 = vst [vmem:[#allocation68_spill] sm:$0xff] %v6887_v30  ;;  %v6905_v6 = vpack.c.bf16 %v739_v4, %v731_v55  ;;  %v6915_v42 = vpack.c.bf16 %v881_v12, %v873_v19  ;;  %v889_v55 = vld [vmem:[#allocation4 + $0x710] sm:$0xff] }
  0x6e   :  { %4084 = vmatpush1.bf16.msra.mxu1 %v6866_v5  ;;  %4116 = vmatpush1.bf16.msra.mxu0 %v6868_v22  ;;  %v866_v5 = vld [vmem:[#allocation4 + $0x658] sm:$0xff]  ;;  %v740_v22 = vld [vmem:[#allocation4 + $0x268] sm:$0xff]  ;;  %v897_v4 = vld [vmem:[#allocation4 + $0x750] sm:$0xff] }
  0x6f   :  { %4086 = vmatprep.subr.bf16.mxu1 %v6872_v44  ;;  %4118 = vmatprep.subr.bf16.mxu0 %v6874_v38  ;;  %v6897_v16 = vpack.c.bf16 %v866_v5, %v858_v3  ;;  %v6899_v39 = vpack.c.bf16 %v740_v22, %v732_v9  ;;  %v874_v38 = vld [vmem:[#allocation4 + $0x698] sm:$0xff]  ;;  %v748_v44 = vld [vmem:[#allocation4 + $0x2a8] sm:$0xff]  ;;  %8659 = vst [vmem:[#allocation74_spill] sm:$0xff] %v6905_v6  ;;  %v747_v5 = vld [vmem:[#allocation4 + $0x2a0] sm:$0xff] }
  0x70   :  { %v755_v22 = vld [vmem:[#allocation4 + $0x2e0] sm:$0xff]  ;;  %8662 = vst [vmem:[#allocation77_spill] sm:$0xff] %v6915_v42  ;;  %v6927_v19 = vpack.c.bf16 %v897_v4, %v889_v55 }
  0x71   :  { %8656 = vst [vmem:[#allocation71_spill] sm:$0xff] %v6897_v16  ;;  %8657 = vst [vmem:[#allocation72_spill] sm:$0xff] %v6899_v39  ;;  %v6917_v17 = vpack.c.bf16 %v755_v22, %v747_v5  ;;  %v905_v5 = vld [vmem:[#allocation4 + $0x790] sm:$0xff] }
  0x72   :  { %4088 = vmatpush1.bf16.msra.mxu1 %v6879_v1  ;;  %4120 = vmatpush1.bf16.msra.mxu0 %v6881_v61  ;;  %v882_v1 = vld [vmem:[#allocation4 + $0x6d8] sm:$0xff]  ;;  %v756_v61 = vld [vmem:[#allocation4 + $0x2e8] sm:$0xff]  ;;  %8666 = vst [vmem:[#allocation81_spill] sm:$0xff] %v6927_v19  ;;  %v913_v22 = vld [vmem:[#allocation4 + $0x7d0] sm:$0xff] }
  0x73   :  { %4090 = vmatprep.subr.bf16.mxu1 %v6885_v60  ;;  %4122 = vmatprep.subr.bf16.mxu0 %v6887_v30  ;;  %v6909_v9 = vpack.c.bf16 %v882_v1, %v874_v38  ;;  %v6911_v3 = vpack.c.bf16 %v756_v61, %v748_v44  ;;  %v890_v30 = vld [vmem:[#allocation4 + $0x718] sm:$0xff]  ;;  %v764_v60 = vld [vmem:[#allocation4 + $0x328] sm:$0xff]  ;;  %8663 = vst [vmem:[#allocation78_spill] sm:$0xff] %v6917_v17  ;;  %v763_v1 = vld [vmem:[#allocation4 + $0x320] sm:$0xff] }
  0x74   :  { %v771_v61 = vld [vmem:[#allocation4 + $0x360] sm:$0xff]  ;;  %v6939_v55 = vpack.c.bf16 %v913_v22, %v905_v5 }
  0x75   :  { %8660 = vst [vmem:[#allocation75_spill] sm:$0xff] %v6909_v9  ;;  %8661 = vst [vmem:[#allocation76_spill] sm:$0xff] %v6911_v3  ;;  %v6929_v12 = vpack.c.bf16 %v771_v61, %v763_v1  ;;  %v795_v1 = vld [vmem:[#allocation4 + $0x420] sm:$0xff] }
  0x76   :  { %4092 = vmatpush1.bf16.msra.mxu1 %v6891_v26  ;;  %4124 = vmatpush1.bf16.msra.mxu0 %v6893_v43  ;;  %v898_v26 = vld [vmem:[#allocation4 + $0x758] sm:$0xff]  ;;  %v772_v43 = vld [vmem:[#allocation4 + $0x368] sm:$0xff]  ;;  %8670 = vst [vmem:[#allocation85_spill] sm:$0xff] %v6939_v55  ;;  %v803_v61 = vld [vmem:[#allocation4 + $0x460] sm:$0xff] }
  0x77   :  { %4094 = vmatprep.subr.bf16.mxu1 %v6897_v16  ;;  %4126 = vmatprep.subr.bf16.mxu0 %v6899_v39  ;;  %v6921_v44 = vpack.c.bf16 %v898_v26, %v890_v30  ;;  %v6923_v38 = vpack.c.bf16 %v772_v43, %v764_v60  ;;  %v906_v39 = vld [vmem:[#allocation4 + $0x798] sm:$0xff]  ;;  %v780_v16 = vld [vmem:[#allocation4 + $0x3a8] sm:$0xff]  ;;  %8667 = vst [vmem:[#allocation82_spill] sm:$0xff] %v6929_v12  ;;  %v779_v26 = vld [vmem:[#allocation4 + $0x3a0] sm:$0xff] }
  0x78   :  { %v787_v43 = vld [vmem:[#allocation4 + $0x3e0] sm:$0xff]  ;;  %v6951_v5 = vpack.c.bf16 %v803_v61, %v795_v1 }
  0x79   :  { %8664 = vst [vmem:[#allocation79_spill] sm:$0xff] %v6921_v44  ;;  %8665 = vst [vmem:[#allocation80_spill] sm:$0xff] %v6923_v38  ;;  %v6941_v4 = vpack.c.bf16 %v787_v43, %v779_v26  ;;  %v811_v26 = vld [vmem:[#allocation4 + $0x4a0] sm:$0xff] }
  0x7a   :  { %4096 = vmatpush1.bf16.msra.mxu1 %v6903_v21  ;;  %4128 = vmatpush1.bf16.msra.mxu0 %v6905_v6  ;;  %v914_v21 = vld [vmem:[#allocation4 + $0x7d8] sm:$0xff]  ;;  %v788_v6 = vld [vmem:[#allocation4 + $0x3e8] sm:$0xff]  ;;  %8674 = vst [vmem:[#allocation89_spill] sm:$0xff] %v6951_v5  ;;  %v819_v43 = vld [vmem:[#allocation4 + $0x4e0] sm:$0xff] }
  0x7b   :  { %4098 = vmatprep.subr.bf16.mxu1 %v6909_v9  ;;  %4130 = vmatprep.subr.bf16.mxu0 %v6911_v3  ;;  %v6933_v60 = vpack.c.bf16 %v914_v21, %v906_v39  ;;  %v6935_v30 = vpack.c.bf16 %v788_v6, %v780_v16  ;;  %v796_v3 = vld [vmem:[#allocation4 + $0x428] sm:$0xff]  ;;  %v670_v9 = vld [vmem:[#allocation4 + $0x38] sm:$0xff]  ;;  %8671 = vst [vmem:[#allocation86_spill] sm:$0xff] %v6941_v4  ;;  %v669_v21 = vld [vmem:[#allocation4 + $0x30] sm:$0xff] }
  0x7c   :  { %v677_v6 = vld [vmem:[#allocation4 + $0x70] sm:$0xff]  ;;  %v6964_v1 = vpack.c.bf16 %v819_v43, %v811_v26 }
  0x7d   :  { %8668 = vst [vmem:[#allocation83_spill] sm:$0xff] %v6933_v60  ;;  %8669 = vst [vmem:[#allocation84_spill] sm:$0xff] %v6935_v30  ;;  %v6953_v22 = vpack.c.bf16 %v677_v6, %v669_v21  ;;  %v701_v21 = vld [vmem:[#allocation4 + $0x130] sm:$0xff] }
  0x7e   :  { %4100 = vmatpush1.bf16.msra.mxu1 %v6915_v42  ;;  %4132 = vmatpush1.bf16.msra.mxu0 %v6917_v17  ;;  %v804_v42 = vld [vmem:[#allocation4 + $0x468] sm:$0xff]  ;;  %v678_v17 = vld [vmem:[#allocation4 + $0x78] sm:$0xff]  ;;  %8678 = vst [vmem:[#allocation93_spill] sm:$0xff] %v6964_v1  ;;  %v709_v6 = vld [vmem:[#allocation4 + $0x170] sm:$0xff] }
  0x7f   :  { %4102 = vmatprep.subr.bf16.mxu1 %v6921_v44  ;;  %4134 = vmatprep.subr.bf16.mxu0 %v6923_v38  ;;  %v6945_v16 = vpack.c.bf16 %v804_v42, %v796_v3  ;;  %v6947_v39 = vpack.c.bf16 %v678_v17, %v670_v9  ;;  %v812_v38 = vld [vmem:[#allocation4 + $0x4a8] sm:$0xff]  ;;  %v686_v44 = vld [vmem:[#allocation4 + $0xb8] sm:$0xff]  ;;  %8675 = vst [vmem:[#allocation90_spill] sm:$0xff] %v6953_v22  ;;  %v685_v42 = vld [vmem:[#allocation4 + $0xb0] sm:$0xff] }
  0x80   :  { %v693_v17 = vld [vmem:[#allocation4 + $0xf0] sm:$0xff]  ;;  %v6979_v43 = vpack.c.bf16 %v709_v6, %v701_v21  ;;  %v859_v21 = vld [vmem:[#allocation4 + $0x620] sm:$0xff] }
  0x81   :  { %8672 = vst [vmem:[#allocation87_spill] sm:$0xff] %v6945_v16  ;;  %8673 = vst [vmem:[#allocation88_spill] sm:$0xff] %v6947_v39  ;;  %v6966_v61 = vpack.c.bf16 %v693_v17, %v685_v42  ;;  %v717_v42 = vld [vmem:[#allocation4 + $0x1b0] sm:$0xff]  ;;  %v867_v6 = vld [vmem:[#allocation4 + $0x660] sm:$0xff] }
  0x82   :  { %4104 = vmatpush1.bf16.msra.mxu1 %v6927_v19  ;;  %4136 = vmatpush1.bf16.msra.mxu0 %v6929_v12  ;;  %v820_v19 = vld [vmem:[#allocation4 + $0x4e8] sm:$0xff]  ;;  %v694_v12 = vld [vmem:[#allocation4 + $0xf8] sm:$0xff]  ;;  %8683 = vst [vmem:[#allocation98_spill] sm:$0xff] %v6979_v43  ;;  %v725_v17 = vld [vmem:[#allocation4 + $0x1f0] sm:$0xff] }
  0x83   :  { %4106 = vmatprep.subr.bf16.mxu1 %v6933_v60  ;;  %4138 = vmatprep.subr.bf16.mxu0 %v6935_v30  ;;  %v6957_v9 = vpack.c.bf16 %v820_v19, %v812_v38  ;;  %v6959_v3 = vpack.c.bf16 %v694_v12, %v686_v44  ;;  %v828_v30 = vld [vmem:[#allocation4 + $0x528] sm:$0xff]  ;;  %v702_v60 = vld [vmem:[#allocation4 + $0x138] sm:$0xff]  ;;  %8679 = vst [vmem:[#allocation94_spill] sm:$0xff] %v6966_v61  ;;  %v827_v38 = vld [vmem:[#allocation4 + $0x520] sm:$0xff] }
  0x84   :  { %v835_v19 = vld [vmem:[#allocation4 + $0x560] sm:$0xff] }
  0x85   :  { %8676 = vst [vmem:[#allocation91_spill] sm:$0xff] %v6957_v9  ;;  %8677 = vst [vmem:[#allocation92_spill] sm:$0xff] %v6959_v3  ;;  %v6977_v26 = vpack.c.bf16 %v835_v19, %v827_v38  ;;  %v6991_v19 = vpack.c.bf16 %v725_v17, %v717_v42  ;;  %v875_v42 = vld [vmem:[#allocation4 + $0x6a0] sm:$0xff] }
  0x86   :  { %4108 = vmatpush1.bf16.msra.mxu1 %v6939_v55  ;;  %4140 = vmatpush1.bf16.msra.mxu0 %v6941_v4  ;;  %v836_v55 = vld [vmem:[#allocation4 + $0x568] sm:$0xff]  ;;  %v710_v4 = vld [vmem:[#allocation4 + $0x178] sm:$0xff]  ;;  %v883_v17 = vld [vmem:[#allocation4 + $0x6e0] sm:$0xff] }
  0x87   :  { %4142 = vmatprep.subr.bf16.mxu0 %v6945_v16  ;;  %4174 = vmatprep.subr.bf16.mxu1 %v6947_v39  ;;  %v6970_v44 = vpack.c.bf16 %v836_v55, %v828_v30  ;;  %v6972_v12 = vpack.c.bf16 %v710_v4, %v702_v60  ;;  %v844_v16 = vld [vmem:[#allocation4 + $0x5a8] sm:$0xff]  ;;  %v718_v39 = vld [vmem:[#allocation4 + $0x1b8] sm:$0xff]  ;;  %8682 = vst [vmem:[#allocation97_spill] sm:$0xff] %v6977_v26  ;;  %v843_v30 = vld [vmem:[#allocation4 + $0x5a0] sm:$0xff] }
  0x88   :  { %v851_v55 = vld [vmem:[#allocation4 + $0x5e0] sm:$0xff]  ;;  %8687 = vst [vmem:[#allocation102_spill] sm:$0xff] %v6991_v19 }
  0x89   :  { %1066 = vmatmul.mubr.f32.vlgmr.msra.gmra.mrb[8].mxu1 %v8637_v20  ;;  %8680 = vst [vmem:[#allocation95_spill] sm:$0xff] %v6970_v44  ;;  %8681 = vst [vmem:[#allocation96_spill] sm:$0xff] %v6972_v12  ;;  %v6989_v38 = vpack.c.bf16 %v851_v55, %v843_v30  ;;  %v7001_v30 = vpack.c.bf16 %v867_v6, %v859_v21  ;;  %v7013_v21 = vpack.c.bf16 %v883_v17, %v875_v42 }
  0x8a   :  { %4144 = vmatpush1.bf16.msra.mxu0 %v6951_v5  ;;  %4176 = vmatpush1.bf16.msra.mxu1 %v6953_v22  ;;  %v852_v5 = vld [vmem:[#allocation4 + $0x5e8] sm:$0xff]  ;;  %v726_v22 = vld [vmem:[#allocation4 + $0x1f8] sm:$0xff] }
  0x8b   :  { %4146 = vmatprep.subr.bf16.mxu0 %v6957_v9  ;;  %4178 = vmatprep.subr.bf16.mxu1 %v6959_v3  ;;  %v6983_v60 = vpack.c.bf16 %v852_v5, %v844_v16  ;;  %v6985_v4 = vpack.c.bf16 %v726_v22, %v718_v39  ;;  %v860_v9 = vld [vmem:[#allocation4 + $0x628] sm:$0xff]  ;;  %v734_v3 = vld [vmem:[#allocation4 + $0x238] sm:$0xff]  ;;  %8686 = vst [vmem:[#allocation101_spill] sm:$0xff] %v6989_v38  ;;  %v733_v5 = vld [vmem:[#allocation4 + $0x230] sm:$0xff] }
  0x8c   :  { %1207 = vmatprep.mubr.f32.mxu1 %v8637_v20  ;;  %v741_v22 = vld [vmem:[#allocation4 + $0x270] sm:$0xff]  ;;  %8690 = vst [vmem:[#allocation105_spill] sm:$0xff] %v7001_v30  ;;  %8694 = vst [vmem:[#allocation109_spill] sm:$0xff] %v7013_v21 }
  0x8d   :  { %8684 = vst [vmem:[#allocation99_spill] sm:$0xff] %v6983_v60  ;;  %8685 = vst [vmem:[#allocation100_spill] sm:$0xff] %v6985_v4  ;;  %v7003_v55 = vpack.c.bf16 %v741_v22, %v733_v5  ;;  %v891_v5 = vld [vmem:[#allocation4 + $0x720] sm:$0xff] }
  0x8e   :  { %4148 = vmatpush1.bf16.msra.mxu0 %v6964_v1  ;;  %4180 = vmatpush1.bf16.msra.mxu1 %v6966_v61  ;;  %v868_v1 = vld [vmem:[#allocation4 + $0x668] sm:$0xff]  ;;  %v742_v61 = vld [vmem:[#allocation4 + $0x278] sm:$0xff]  ;;  %v899_v22 = vld [vmem:[#allocation4 + $0x760] sm:$0xff] }
  0x8f   :  { %4150 = vmatprep.subr.bf16.mxu0 %v6970_v44  ;;  %4182 = vmatprep.subr.bf16.mxu1 %v6972_v12  ;;  %v6995_v16 = vpack.c.bf16 %v868_v1, %v860_v9  ;;  %v6997_v39 = vpack.c.bf16 %v742_v61, %v734_v3  ;;  %v876_v44 = vld [vmem:[#allocation4 + $0x6a8] sm:$0xff]  ;;  %v750_v12 = vld [vmem:[#allocation4 + $0x2b8] sm:$0xff]  ;;  %8691 = vst [vmem:[#allocation106_spill] sm:$0xff] %v7003_v55  ;;  %v749_v1 = vld [vmem:[#allocation4 + $0x2b0] sm:$0xff] }
  0x90   :  { %v757_v61 = vld [vmem:[#allocation4 + $0x2f0] sm:$0xff]  ;;  %v7025_v42 = vpack.c.bf16 %v899_v22, %v891_v5 }
  0x91   :  { %8688 = vst [vmem:[#allocation103_spill] sm:$0xff] %v6995_v16  ;;  %8689 = vst [vmem:[#allocation104_spill] sm:$0xff] %v6997_v39  ;;  %v7015_v6 = vpack.c.bf16 %v757_v61, %v749_v1  ;;  %v907_v1 = vld [vmem:[#allocation4 + $0x7a0] sm:$0xff]  ;;  %v789_v61 = vld [vmem:[#allocation4 + $0x3f0] sm:$0xff] }
  0x92   :  { %4152 = vmatpush1.bf16.msra.mxu0 %v6977_v26  ;;  %4184 = vmatpush1.bf16.msra.mxu1 %v6979_v43  ;;  %v884_v26 = vld [vmem:[#allocation4 + $0x6e8] sm:$0xff]  ;;  %v758_v43 = vld [vmem:[#allocation4 + $0x2f8] sm:$0xff]  ;;  %8698 = vst [vmem:[#allocation113_spill] sm:$0xff] %v7025_v42 }
  0x93   :  { %4154 = vmatprep.subr.bf16.mxu0 %v6983_v60  ;;  %4186 = vmatprep.subr.bf16.mxu1 %v6985_v4  ;;  %v7007_v9 = vpack.c.bf16 %v884_v26, %v876_v44  ;;  %v7009_v3 = vpack.c.bf16 %v758_v43, %v750_v12  ;;  %v892_v60 = vld [vmem:[#allocation4 + $0x728] sm:$0xff]  ;;  %v766_v4 = vld [vmem:[#allocation4 + $0x338] sm:$0xff]  ;;  %8695 = vst [vmem:[#allocation110_spill] sm:$0xff] %v7015_v6  ;;  %v765_v26 = vld [vmem:[#allocation4 + $0x330] sm:$0xff] }
  0x94   :  { %v773_v43 = vld [vmem:[#allocation4 + $0x370] sm:$0xff] }
  0x95   :  { %8692 = vst [vmem:[#allocation107_spill] sm:$0xff] %v7007_v9  ;;  %8693 = vst [vmem:[#allocation108_spill] sm:$0xff] %v7009_v3  ;;  %v7027_v17 = vpack.c.bf16 %v773_v43, %v765_v26  ;;  %v822_v26 = vld [vmem:[#allocation4 + $0x4f8] sm:$0xff] }
  0x96   :  { %4156 = vmatpush1.bf16.msra.mxu0 %v6989_v38  ;;  %4188 = vmatpush1.bf16.msra.mxu1 %v6991_v19  ;;  %v900_v38 = vld [vmem:[#allocation4 + $0x768] sm:$0xff]  ;;  %v774_v19 = vld [vmem:[#allocation4 + $0x378] sm:$0xff] }
  0x97   :  { %4158 = vmatprep.subr.bf16.mxu0 %v6995_v16  ;;  %4190 = vmatprep.subr.bf16.mxu1 %v6997_v39  ;;  %v7019_v44 = vpack.c.bf16 %v900_v38, %v892_v60  ;;  %v7021_v12 = vpack.c.bf16 %v774_v19, %v766_v4  ;;  %v908_v16 = vld [vmem:[#allocation4 + $0x7a8] sm:$0xff]  ;;  %v782_v39 = vld [vmem:[#allocation4 + $0x3b8] sm:$0xff]  ;;  %8699 = vst [vmem:[#allocation114_spill] sm:$0xff] %v7027_v17  ;;  %v915_v38 = vld [vmem:[#allocation4 + $0x7e0] sm:$0xff] }
  0x98   :  { %v781_v19 = vld [vmem:[#allocation4 + $0x3b0] sm:$0xff]  ;;  %v7037_v5 = vpack.c.bf16 %v915_v38, %v907_v1 }
  0x99   :  { %8696 = vst [vmem:[#allocation111_spill] sm:$0xff] %v7019_v44  ;;  %8697 = vst [vmem:[#allocation112_spill] sm:$0xff] %v7021_v12  ;;  %v7039_v22 = vpack.c.bf16 %v789_v61, %v781_v19  ;;  %v813_v38 = vld [vmem:[#allocation4 + $0x4b0] sm:$0xff] }
  0x9a   :  { %4160 = vmatpush1.bf16.msra.mxu0 %v7001_v30  ;;  %4192 = vmatpush1.bf16.msra.mxu1 %v7003_v55  ;;  %v916_v30 = vld [vmem:[#allocation4 + $0x7e8] sm:$0xff]  ;;  %v790_v55 = vld [vmem:[#allocation4 + $0x3f8] sm:$0xff]  ;;  %8702 = vst [vmem:[#allocation117_spill] sm:$0xff] %v7037_v5  ;;  %v821_v19 = vld [vmem:[#allocation4 + $0x4f0] sm:$0xff] }
  0x9b   :  { %4162 = vmatprep.subr.bf16.mxu0 %v7007_v9  ;;  %4194 = vmatprep.subr.bf16.mxu1 %v7009_v3  ;;  %v7031_v60 = vpack.c.bf16 %v916_v30, %v908_v16  ;;  %v7033_v4 = vpack.c.bf16 %v790_v55, %v782_v39  ;;  %v798_v9 = vld [vmem:[#allocation4 + $0x438] sm:$0xff]  ;;  %8703 = vst [vmem:[#allocation118_spill] sm:$0xff] %v7039_v22  ;;  %v797_v39 = vld [vmem:[#allocation4 + $0x430] sm:$0xff] }
  0x9c   :  { %v805_v30 = vld [vmem:[#allocation4 + $0x470] sm:$0xff]  ;;  %v814_v55 = vld [vmem:[#allocation4 + $0x4b8] sm:$0xff]  ;;  %v7055_v61 = vpack.c.bf16 %v821_v19, %v813_v38 }
  0x9d   :  { %8700 = vst [vmem:[#allocation115_spill] sm:$0xff] %v7031_v60  ;;  %8701 = vst [vmem:[#allocation116_spill] sm:$0xff] %v7033_v4  ;;  %v7047_v43 = vpack.c.bf16 %v805_v30, %v797_v39  ;;  %v7050_v1 = vpack.c.bf16 %v822_v26, %v814_v55  ;;  %v829_v30 = vld [vmem:[#allocation4 + $0x530] sm:$0xff]  ;;  %v846_v26 = vld [vmem:[#allocation4 + $0x5b8] sm:$0xff] }
  0x9e   :  { %4164 = vmatpush1.bf16.msra.mxu0 %v7013_v21  ;;  %4196 = vmatpush1.bf16.msra.mxu1 %v7015_v6  ;;  %v806_v21 = vld [vmem:[#allocation4 + $0x478] sm:$0xff]  ;;  %8707 = vst [vmem:[#allocation122_spill] sm:$0xff] %v7055_v61  ;;  %v837_v55 = vld [vmem:[#allocation4 + $0x570] sm:$0xff] }
  0x9f   :  { %4166 = vmatprep.subr.bf16.mxu0 %v7019_v44  ;;  %4198 = vmatprep.subr.bf16.mxu1 %v7021_v12  ;;  %v7043_v16 = vpack.c.bf16 %v806_v21, %v798_v9  ;;  %8705 = vst [vmem:[#allocation120_spill] sm:$0xff] %v7047_v43  ;;  %8706 = vst [vmem:[#allocation121_spill] sm:$0xff] %v7050_v1  ;;  %v830_v9 = vld [vmem:[#allocation4 + $0x538] sm:$0xff]  ;;  %v845_v19 = vld [vmem:[#allocation4 + $0x5b0] sm:$0xff] }
  0xa0   :  { %v838_v21 = vld [vmem:[#allocation4 + $0x578] sm:$0xff] }
  0xa1   :  { %8704 = vst [vmem:[#allocation119_spill] sm:$0xff] %v7043_v16  ;;  %v7059_v39 = vpack.c.bf16 %v838_v21, %v830_v9  ;;  %v862_v9 = vld [vmem:[#allocation4 + $0x638] sm:$0xff] }
  0xa2   :  { %4168 = vmatpush1.bf16.msra.mxu0 %v7025_v42  ;;  %4200 = vmatpush1.bf16.msra.mxu1 %v7027_v17  ;;  %v870_v21 = vld [vmem:[#allocation4 + $0x678] sm:$0xff] }
  0xa3   :  { %4170 = vmatprep.subr.bf16.mxu0 %v7031_v60  ;;  %4202 = vmatprep.subr.bf16.mxu1 %v7033_v4  ;;  %8708 = vst [vmem:[#allocation123_spill] sm:$0xff] %v7059_v39 }
  0xa6   :  { %4172 = vmatpush1.bf16.msra.mxu0 %v7037_v5  ;;  %4204 = vmatpush1.bf16.msra.mxu1 %v7039_v22  ;;  %v7063_v5 = vpack.c.bf16 %v837_v55, %v829_v30  ;;  %v7075_v30 = vpack.c.bf16 %v870_v21, %v862_v9  ;;  %v861_v55 = vld [vmem:[#allocation4 + $0x630] sm:$0xff]  ;;  %v894_v9 = vld [vmem:[#allocation4 + $0x738] sm:$0xff] }
  0xa7   :  { %4206 = vmatprep.subr.bf16.mxu1 %v7043_v16  ;;  %4238 = vmatprep.subr.bf16.mxu0 %v6589_v15  ;;  %v854_v15 = vld [vmem:[#allocation4 + $0x5f8] sm:$0xff] }
  0xa8   :  { %8709 = vst [vmem:[#allocation124_spill] sm:$0xff] %v7063_v5  ;;  %v7067_v38 = vpack.c.bf16 %v854_v15, %v846_v26  ;;  %8712 = vst [vmem:[#allocation127_spill] sm:$0xff] %v7075_v30  ;;  %v878_v15 = vld [vmem:[#allocation4 + $0x6b8] sm:$0xff] }
  0xa9   :  { %1137 = vmatmul.mubr.f32.vlgmr.msra.gmra.mrb[8].mxu0 %v8637_v20  ;;  %v886_v26 = vld [vmem:[#allocation4 + $0x6f8] sm:$0xff] }
  0xaa   :  { %4208 = vmatpush1.bf16.msra.mxu1 %v7047_v43  ;;  %4240 = vmatpush1.bf16.msra.mxu0 %v6632_v24  ;;  %8710 = vst [vmem:[#allocation125_spill] sm:$0xff] %v7067_v38  ;;  %v853_v24 = vld [vmem:[#allocation4 + $0x5f0] sm:$0xff]  ;;  %v902_v21 = vld [vmem:[#allocation4 + $0x778] sm:$0xff] }
  0xab   :  { %4210 = vmatprep.subr.bf16.mxu1 %v7050_v1  ;;  %4242 = vmatprep.subr.bf16.mxu0 %v6637_v27  ;;  %v7071_v27 = vpack.c.bf16 %v853_v24, %v845_v19  ;;  %v7083_v24 = vpack.c.bf16 %v886_v26, %v878_v15  ;;  %v877_v19 = vld [vmem:[#allocation4 + $0x6b0] sm:$0xff]  ;;  %v910_v15 = vld [vmem:[#allocation4 + $0x7b8] sm:$0xff] }
  0xac   :  { %v918_v26 = vld [vmem:[#allocation4 + $0x7f8] sm:$0xff] }
  0xad   :  { %8711 = vst [vmem:[#allocation126_spill] sm:$0xff] %v7071_v27  ;;  %8714 = vst [vmem:[#allocation129_spill] sm:$0xff] %v7083_v24 }
  0xae   :  { %4212 = vmatpush1.bf16.msra.mxu1 %v7055_v61  ;;  %4244 = vmatpush1.bf16.msra.mxu0 %v6647_v34  ;;  %v869_v34 = vld [vmem:[#allocation4 + $0x670] sm:$0xff] }
  0xaf   :  { %4214 = vmatprep.subr.bf16.mxu1 %v7059_v39  ;;  %4246 = vmatprep.subr.bf16.mxu0 %v6651_v35  ;;  %v7079_v35 = vpack.c.bf16 %v869_v34, %v861_v55  ;;  %v7091_v34 = vpack.c.bf16 %v902_v21, %v894_v9  ;;  %v893_v55 = vld [vmem:[#allocation4 + $0x730] sm:$0xff] }
  0xb0   :  { %v8723_v21 = vld [vmem:[#allocation49_spill] sm:$0xff] }
  0xb1   :  { %8713 = vst [vmem:[#allocation128_spill] sm:$0xff] %v7079_v35  ;;  %8716 = vst [vmem:[#allocation131_spill] sm:$0xff] %v7091_v34 }
  0xb2   :  { %4216 = vmatpush1.bf16.msra.mxu1 %v7063_v5  ;;  %4248 = vmatpush1.bf16.msra.mxu0 %v6661_v40  ;;  %v885_v40 = vld [vmem:[#allocation4 + $0x6f0] sm:$0xff] }
  0xb3   :  { %4218 = vmatprep.subr.bf16.mxu1 %v7067_v38  ;;  %4250 = vmatprep.subr.bf16.mxu0 %v6664_v41  ;;  %v7087_v41 = vpack.c.bf16 %v885_v40, %v877_v19  ;;  %v7099_v40 = vpack.c.bf16 %v918_v26, %v910_v15  ;;  %v909_v19 = vld [vmem:[#allocation4 + $0x7b0] sm:$0xff]  ;;  %v8725_v15 = vld [vmem:[#allocation54_spill] sm:$0xff] }
  0xb4   :  { %v8726_v26 = vld [vmem:[#allocation53_spill] sm:$0xff] }
  0xb5   :  { %8715 = vst [vmem:[#allocation130_spill] sm:$0xff] %v7087_v41  ;;  %8718 = vst [vmem:[#allocation133_spill] sm:$0xff] %v7099_v40 }
  0xb6   :  { %4220 = vmatpush1.bf16.msra.mxu1 %v7071_v27  ;;  %4252 = vmatpush1.bf16.msra.mxu0 %v6673_v46  ;;  %v901_v46 = vld [vmem:[#allocation4 + $0x770] sm:$0xff] }
  0xb7   :  { %4222 = vmatprep.subr.bf16.mxu1 %v7075_v30  ;;  %4254 = vmatprep.subr.bf16.mxu0 %v6676_v47  ;;  %v7095_v47 = vpack.c.bf16 %v901_v46, %v893_v55  ;;  %v8720_v46 = vld [vmem:[#allocation48_spill] sm:$0xff]  ;;  %v8724_v55 = vld [vmem:[#allocation51_spill] sm:$0xff] }
  0xb9   :  { %8717 = vst [vmem:[#allocation132_spill] sm:$0xff] %v7095_v47 }
  0xba   :  { %4224 = vmatpush1.bf16.msra.mxu1 %v7079_v35  ;;  %4256 = vmatpush1.bf16.msra.mxu0 %v6685_v52  ;;  %v917_v52 = vld [vmem:[#allocation4 + $0x7f0] sm:$0xff] }
  0xbb   :  { %4226 = vmatprep.subr.bf16.mxu1 %v7083_v24  ;;  %4258 = vmatprep.subr.bf16.mxu0 %v6688_v53  ;;  %v7103_v9 = vpack.c.bf16 %v917_v52, %v909_v19  ;;  %v8721_v52 = vld [vmem:[#allocation47_spill] sm:$0xff] }
  0xbc   :  { %v8727_v19 = vld [vmem:[#allocation55_spill] sm:$0xff] }
  0xbd   :  { %8719 = vst [vmem:[#allocation134_spill] sm:$0xff] %v7103_v9 }
  0xbe   :  { %4228 = vmatpush1.bf16.msra.mxu1 %v7087_v41  ;;  %4260 = vmatpush1.bf16.msra.mxu0 %v6697_v58 }
  0xbf   :  { %4230 = vmatprep.subr.bf16.mxu1 %v7091_v34  ;;  %4262 = vmatprep.subr.bf16.mxu0 %v6700_v59 }
  0xc2   :  { %4232 = vmatpush1.bf16.msra.mxu1 %v7095_v47  ;;  %4264 = vmatpush1.bf16.msra.mxu0 %v6709_v0 }
  0xc3   :  { %4234 = vmatprep.subr.bf16.mxu1 %v7099_v40  ;;  %4266 = vmatprep.subr.bf16.mxu0 %v6712_v2 }
  0xc6   :  { %4236 = vmatpush1.bf16.msra.mxu1 %v7103_v9  ;;  %4268 = vmatpush1.bf16.msra.mxu0 %v6721_v11 }
  0xc7   :  { %4302 = vmatprep.subr.bf16.mxu1 %v6639_v33  ;;  %4270 = vmatprep.subr.bf16.mxu0 %v6724_v14 }
  0xc9   :  { %1208 = vmatmul.mubr.f32.vlgmr.msra.gmra.mrb[24].mxu1 %v8637_v20  ;;  %v8722_v20 = vld [vmem:[#allocation50_spill] sm:$0xff] }
  0xca   :  { %4304 = vmatpush1.bf16.msra.mxu1 %v6735_v29  ;;  %4272 = vmatpush1.bf16.msra.mxu0 %v6733_v28 }
  0xcb   :  { %4306 = vmatprep.subr.bf16.mxu1 %v6740_v36  ;;  %4274 = vmatprep.subr.bf16.mxu0 %v6738_v32 }
  0xce   :  { %4308 = vmatpush1.bf16.msra.mxu1 %v6749_v48  ;;  %4276 = vmatpush1.bf16.msra.mxu0 %v6747_v45  ;;  %v8741_v45 = vld [vmem:[#allocation69_spill] sm:$0xff] }
  0xcf   :  { %4310 = vmatprep.subr.bf16.mxu1 %v6755_v54  ;;  %4278 = vmatprep.subr.bf16.mxu0 %v6753_v51 }
  0xd2   :  { %4312 = vmatpush1.bf16.msra.mxu1 %v6764_v63  ;;  %4280 = vmatpush1.bf16.msra.mxu0 %v6762_v62  ;;  %v8738_v62 = vld [vmem:[#allocation67_spill] sm:$0xff] }
  0xd3   :  { %4314 = vmatprep.subr.bf16.mxu1 %v6770_v10  ;;  %4282 = vmatprep.subr.bf16.mxu0 %v6768_v7 }
  0xd6   :  { %4316 = vmatpush1.bf16.msra.mxu1 %v6779_v25  ;;  %4284 = vmatpush1.bf16.msra.mxu0 %v6777_v23  ;;  %v8734_v23 = vld [vmem:[#allocation63_spill] sm:$0xff] }
  0xd7   :  { %4318 = vmatprep.subr.bf16.mxu1 %v6785_v37  ;;  %4286 = vmatprep.subr.bf16.mxu0 %v6783_v31 }
  0xda   :  { %4320 = vmatpush1.bf16.msra.mxu1 %v6794_v50  ;;  %4288 = vmatpush1.bf16.msra.mxu0 %v6792_v49  ;;  %v8730_v49 = vld [vmem:[#allocation59_spill] sm:$0xff] }
  0xdb   :  { %4322 = vmatprep.subr.bf16.mxu1 %v6800_v57  ;;  %4290 = vmatprep.subr.bf16.mxu0 %v6798_v56  ;;  %v8728_v56 = vld [vmem:[#allocation56_spill] sm:$0xff] }
  0xde   :  { %4324 = vmatpush1.bf16.msra.mxu1 %v6809_v13  ;;  %4292 = vmatpush1.bf16.msra.mxu0 %v6807_v8  ;;  %v8729_v8 = vld [vmem:[#allocation57_spill] sm:$0xff] }
  0xdf   :  { %4326 = vmatprep.subr.bf16.mxu1 %v8720_v46  ;;  %4294 = vmatprep.subr.bf16.mxu0 %v8721_v52 }
  0xe2   :  { %4328 = vmatpush1.bf16.msra.mxu1 %v8722_v20  ;;  %4296 = vmatpush1.bf16.msra.mxu0 %v8723_v21  ;;  %v8733_v21 = vld [vmem:[#allocation61_spill] sm:$0xff] }
  0xe3   :  { %4330 = vmatprep.subr.bf16.mxu1 %v6830_v18  ;;  %4298 = vmatprep.subr.bf16.mxu0 %v8724_v55 }
  0xe6   :  { %4332 = vmatpush1.bf16.msra.mxu1 %v8725_v15  ;;  %4300 = vmatpush1.bf16.msra.mxu0 %v8726_v26  ;;  %v8737_v26 = vld [vmem:[#allocation65_spill] sm:$0xff] }
  0xe7   :  { %4334 = vmatprep.subr.bf16.mxu1 %v8727_v19  ;;  %4366 = vmatprep.subr.bf16.mxu0 %v8728_v56 }
  0xea   :  { %4336 = vmatpush1.bf16.msra.mxu1 %v8729_v8 }
  0xeb   :  { %4338 = vmatprep.subr.bf16.mxu1 %v8730_v49  ;;  %v57_v49 = vlaneseq }
  0xec   :  { %v7147_v52 = vpop.f32.mrb[0].mxu1 }
  0xed   :  { %8731 = vst [vmem:[#allocation135_spill] sm:$0xff] %v7147_v52  ;;  %v7149_v31 = vpop.f32.mrb[1].mxu1  ;;  %v8742_v52 = vld [vmem:[#allocation71_spill] sm:$0xff] }
  0xee   :  { %8732 = vst [vmem:[#allocation136_spill] sm:$0xff] %v7149_v31  ;;  %4340 = vmatpush1.bf16.msra.mxu1 %v8733_v21 }
  0xef   :  { %4342 = vmatprep.subr.bf16.mxu1 %v8734_v23  ;;  %v8745_v23 = vld [vmem:[#allocation73_spill] sm:$0xff] }
  0xf0   :  { %v7153_v55 = vpop.f32.mrb[2].mxu1 }
  0xf1   :  { %8735 = vst [vmem:[#allocation137_spill] sm:$0xff] %v7153_v55  ;;  %v7155_v7 = vpop.f32.mrb[3].mxu1  ;;  %v8746_v55 = vld [vmem:[#allocation75_spill] sm:$0xff] }
  0xf2   :  { %8736 = vst [vmem:[#allocation138_spill] sm:$0xff] %v7155_v7  ;;  %4344 = vmatpush1.bf16.msra.mxu1 %v8737_v26  ;;  %v8747_v7 = vld [vmem:[#allocation77_spill] sm:$0xff]  ;;  %v8748_v26 = vld [vmem:[#allocation79_spill] sm:$0xff] }
  0xf3   :  { %4346 = vmatprep.subr.bf16.mxu1 %v8738_v62  ;;  %v8749_v62 = vld [vmem:[#allocation81_spill] sm:$0xff] }
  0xf4   :  { %v7159_v56 = vpop.f32.mrb[4].mxu1 }
  0xf5   :  { %8739 = vst [vmem:[#allocation139_spill] sm:$0xff] %v7159_v56  ;;  %v7161_v51 = vpop.f32.mrb[5].mxu1  ;;  %v8750_v56 = vld [vmem:[#allocation83_spill] sm:$0xff] }
  0xf6   :  { %8740 = vst [vmem:[#allocation140_spill] sm:$0xff] %v7161_v51  ;;  %4348 = vmatpush1.bf16.msra.mxu1 %v8741_v45  ;;  %v8751_v51 = vld [vmem:[#allocation85_spill] sm:$0xff]  ;;  %v8752_v45 = vld [vmem:[#allocation88_spill] sm:$0xff] }
  0xf7   :  { %4350 = vmatprep.subr.bf16.mxu1 %v8742_v52 }
  0xf8   :  { %v7165_v31 = vpop.f32.mrb[6].mxu1 }
  0xf9   :  { %8743 = vst [vmem:[#allocation141_spill] sm:$0xff] %v7165_v31  ;;  %v7167_v21 = vpop.f32.mrb[7].mxu1 }
  0xfa   :  { %8744 = vst [vmem:[#allocation142_spill] sm:$0xff] %v7167_v21  ;;  %4352 = vmatpush1.bf16.msra.mxu1 %v8745_v23  ;;  %v58_v21 = vshrl.u32 %v57_v49, 7 }
  0xfb   :  { %4354 = vmatprep.subr.bf16.mxu1 %v8746_v55 }
  0xfc   :  { %v59_v32 = vsub.s32 0, %v58_v21  ;;  %v67_v23 = vsub.s32 2, %v58_v21  ;;  %v71_v55 = vsub.s32 3, %v58_v21  ;;  %v79_v0 = vsub.s32 5, %v58_v21 }
  0xfe   :  { %4356 = vmatpush1.bf16.msra.mxu1 %v8747_v7  ;;  %v55_v7 = vld [vmem:[%s8298_s3] sm:$0xff] }
  0xff   :  { %4358 = vmatprep.subr.bf16.mxu1 %v8748_v26  ;;  %v63_v26 = vsub.s32 1, %v58_v21  ;;  %v7180_v28 = vrot.slane %v55_v7, %v59_v32 }
 0x101   :  { %8753 = vst [vmem:[#allocation143_spill] sm:$0xff] %v7180_v28 }
 0x102   :  { %4360 = vmatpush1.bf16.msra.mxu1 %v8749_v62 }
 0x103   :  { %4362 = vmatprep.subr.bf16.mxu1 %v8750_v56  ;;  %v7182_v56 = vrot.slane %v55_v7, %v67_v23 }
 0x106   :  { %4364 = vmatpush1.bf16.msra.mxu1 %v8751_v51  ;;  %v7184_v51 = vrot.slane %v55_v7, %v63_v26 }
 0x107   :  { %4430 = vmatprep.subr.bf16.mxu1 %v8752_v45  ;;  %v7186_v45 = vrot.slane %v55_v7, %v71_v55  ;;  %v75_v55 = vsub.s32 4, %v58_v21 }
 0x108   :  { %8754 = vst [vmem:[#allocation144_spill] sm:$0xff] %v7184_v51 }
 0x109   :  { %8755 = vst [vmem:[#allocation145_spill] sm:$0xff] %v7186_v45 }
 0x13c   :  { %v996_v52 = vpop.f32.mrb[0].mxu0 }
 0x13d   :  { %v998_v31 = vpop.f32.mrb[1].mxu0  ;;  %v6063_v49 = vadd.f32 %v996_v52, %v7180_v28 }
 0x13e   :  { %v6064_v19 = vadd.f32 %v998_v31, %v7184_v51 }
 0x13f   :  { %v3896_v11 = vmul.f32 -1.442695, %v6063_v49  ;;  %v7194_v49 = vrot.slane %v55_v7, %v79_v0 }
 0x140   :  { %v3897_v18 = vmul.f32 -1.442695, %v6064_v19 }
 0x141   :  { %6195 = vpow2.f32 %v3896_v11  ;;  %8757 = vst [vmem:[#allocation147_spill] sm:$0xff] %v7194_v49 }
 0x142   :  { %6197 = vpow2.f32 %v3897_v18 }
 0x14b   :  { %v6196_v32 = vpop.eup %6195 }
 0x14c   :  { %v6198_v23 = vpop.eup %6197  ;;  %v1228_v28 = vadd.f32 1.0, %v6196_v32 }
 0x14d   :  { %v1229_v31 = vadd.f32 1.0, %v6198_v23 }
 0x15c   :  { %v1067_v8 = vpop.f32.mrb[8].mxu1 }
 0x15d   :  { %v1069_v62 = vpop.f32.mrb[9].mxu1  ;;  %v6087_v14 = vadd.f32 %v1067_v8, %v7182_v56  ;;  %v7192_v8 = vrot.slane %v55_v7, %v75_v55 }
 0x15e   :  { %v6088_v15 = vadd.f32 %v1069_v62, %v7186_v45 }
 0x15f   :  { %v3898_v2 = vmul.f32 -1.442695, %v6087_v14  ;;  %8756 = vst [vmem:[#allocation146_spill] sm:$0xff] %v7192_v8 }
 0x160   :  { %v3899_v20 = vmul.f32 -1.442695, %v6088_v15 }
 0x161   :  { %6199 = vpow2.f32 %v3898_v2 }
 0x162   :  { %6201 = vpow2.f32 %v3899_v20 }
 0x163   :  { %6203 = vrcp.f32 %v1228_v28 }
 0x164   :  { %6205 = vrcp.f32 %v1229_v31 }
 0x16b   :  { %v6200_v26 = vpop.eup %6199 }
 0x16c   :  { %v6202_v52 = vpop.eup %6201  ;;  %v1240_v51 = vadd.f32 1.0, %v6200_v26 }
 0x16d   :  { %v1241_v62 = vadd.f32 1.0, %v6202_v52  ;;  %v6204_v20 = vpop.eup %6203 }
 0x16e   :  { %6207 = vrcp.f32 %v1240_v51  ;;  %v6206_v15 = vpop.eup %6205 }
 0x16f   :  { %6209 = vrcp.f32 %v1241_v62  ;;  %v87_v62 = vsub.s32 7, %v58_v21 }
 0x178   :  { %v6208_v19 = vpop.eup %6207 }
 0x179   :  { %v6210_v32 = vpop.eup %6209  ;;  %v1260_v0 = vmul.f32 0.0, %v6208_v19 }
 0x17a   :  { %v1261_v28 = vmul.f32 0.0, %v6210_v32 }
 0x17c   :  { %v1138_v11 = vpop.f32.mrb[8].mxu0 }
 0x17d   :  { %v6103_v2 = vadd.f32 %v1138_v11, %v7192_v8  ;;  %v1140_v14 = vpop.f32.mrb[9].mxu0  ;;  %v83_v11 = vsub.s32 6, %v58_v21 }
 0x17e   :  { %v6104_v18 = vadd.f32 %v1140_v14, %v7194_v49 }
 0x17f   :  { %6211 = vtanh.f32 %v6103_v2  ;;  %v7202_v8 = vrot.slane %v55_v7, %v83_v11  ;;  %v7204_v2 = vrot.slane %v55_v7, %v87_v62  ;;  %v8761_v11 = vld [vmem:[#allocation60_spill] sm:$0xff] }
 0x180   :  { %6213 = vtanh.f32 %v6104_v18  ;;  %v8762_v62 = vld [vmem:[#allocation92_spill] sm:$0xff] }
 0x181   :  { %8758 = vst [vmem:[#allocation148_spill] sm:$0xff] %v7202_v8 }
 0x189   :  { %v6212_v23 = vpop.eup %6211 }
 0x18a   :  { %v6214_v55 = vpop.eup %6213  ;;  %v1262_v26 = vmul.f32 %v6212_v23, %v6204_v20 }
 0x18b   :  { %v1263_v52 = vmul.f32 %v6214_v55, %v6206_v15 }
 0x18c   :  { %v7198_v31 = vadd.f32 %v1262_v26, %v1260_v0 }
 0x18d   :  { %v7200_v51 = vadd.f32 %v1263_v52, %v1261_v28  ;;  %v8760_v52 = vld [vmem:[#allocation90_spill] sm:$0xff] }
 0x19c   :  { %v1209_v14 = vpop.f32.mrb[24].mxu1 }
 0x19d   :  { %v6119_v18 = vadd.f32 %v1209_v14, %v7202_v8  ;;  %v1211_v49 = vpop.f32.mrb[25].mxu1  ;;  %v8763_v14 = vld [vmem:[#allocation62_spill] sm:$0xff] }
 0x19e   :  { %v6120_v45 = vadd.f32 %v1211_v49, %v7204_v2 }
 0x19f   :  { %v3900_v19 = vmul.f32 -1.442695, %v6119_v18  ;;  %v8764_v18 = vld [vmem:[#allocation94_spill] sm:$0xff] }
 0x1a0   :  { %v3901_v20 = vmul.f32 -1.442695, %v6120_v45  ;;  %v8759_v45 = vld [vmem:[#allocation58_spill] sm:$0xff] }
 0x1a1   :  { %6215 = vpow2.f32 %v3900_v19  ;;  %v8765_v19 = vld [vmem:[#allocation64_spill] sm:$0xff] }
 0x1a2   :  { %6217 = vpow2.f32 %v3901_v20  ;;  %v8766_v20 = vld [vmem:[#allocation96_spill] sm:$0xff] }
 0x1a3   :  { %6219 = vtanh.f32 %v7200_v51 }
 0x1ab   :  { %v6216_v15 = vpop.eup %6215 }
 0x1ac   :  { %v6218_v32 = vpop.eup %6217  ;;  %v1254_v23 = vadd.f32 1.0, %v6216_v15  ;;  %v8767_v15 = vld [vmem:[#allocation66_spill] sm:$0xff] }
 0x1ad   :  { %v1255_v21 = vadd.f32 1.0, %v6218_v32  ;;  %v6220_v7 = vpop.eup %6219  ;;  %v8768_v32 = vld [vmem:[#allocation98_spill] sm:$0xff] }
 0x1ae   :  { %6221 = vrcp.f32 %v1254_v23  ;;  %v8769_v23 = vld [vmem:[#allocation68_spill] sm:$0xff] }
 0x1af   :  { %6223 = vrcp.f32 %v1255_v21  ;;  %v8770_v21 = vld [vmem:[#allocation100_spill] sm:$0xff] }
 0x1b0   :  { %6225 = vtanh.f32 %v7198_v31 }
 0x1b8   :  { %v6222_v55 = vpop.eup %6221 }
 0x1b9   :  { %v6224_v0 = vpop.eup %6223 }
 0x1ba   :  { %v6226_v26 = vpop.eup %6225  ;;  %v1269_v28 = vmul.f32 %v6224_v0, %v6220_v7  ;;  %v8771_v7 = vld [vmem:[#allocation70_spill] sm:$0xff]  ;;  %v8773_v0 = vld [vmem:[#allocation72_spill] sm:$0xff] }
 0x1bb   :  { %v7210_v49 = vmul.f32 %v6226_v26, %v6222_v55  ;;  %v8772_v55 = vld [vmem:[#allocation102_spill] sm:$0xff]  ;;  %v8774_v26 = vld [vmem:[#allocation104_spill] sm:$0xff] }
 0x1bc   :  { %1345 = vmatprep.mubr.f32.mxu0 %v1269_v28  ;;  %1416 = vmatprep.mubr.f32.mxu1 %v1269_v28 }
 0x1bd   :  { %1346 = vmatmul.mubr.f32.vlgmr.msra.gmra.mrb[2].mxu0 %v7210_v49  ;;  %1417 = vmatmul.mubr.f32.vlgmr.msra.gmra.mrb[10].mxu1 %v7210_v49 }
 0x1be   :  { %4368 = vmatpush1.bf16.msra.mxu0 %v8759_v45  ;;  %4432 = vmatpush1.bf16.msra.mxu1 %v8760_v52 }
 0x1bf   :  { %1487 = vmatprep.mubr.f32.mxu0 %v1269_v28  ;;  %1558 = vmatprep.mubr.f32.mxu1 %v1269_v28  ;;  %v8775_v28 = vld [vmem:[#allocation74_spill] sm:$0xff] }
 0x1c0   :  { %4370 = vmatprep.subr.bf16.mxu0 %v8761_v11  ;;  %4434 = vmatprep.subr.bf16.mxu1 %v8762_v62 }
 0x1c2   :  { %4372 = vmatpush1.bf16.msra.mxu0 %v8763_v14  ;;  %4436 = vmatpush1.bf16.msra.mxu1 %v8764_v18 }
 0x1c3   :  { %4374 = vmatprep.subr.bf16.mxu0 %v8765_v19  ;;  %4438 = vmatprep.subr.bf16.mxu1 %v8766_v20  ;;  %v8776_v19 = vld [vmem:[#allocation106_spill] sm:$0xff]  ;;  %v8777_v20 = vld [vmem:[#allocation76_spill] sm:$0xff] }
 0x1c6   :  { %4376 = vmatpush1.bf16.msra.mxu0 %v8767_v15  ;;  %4440 = vmatpush1.bf16.msra.mxu1 %v8768_v32  ;;  %v8778_v32 = vld [vmem:[#allocation78_spill] sm:$0xff] }
 0x1c7   :  { %4378 = vmatprep.subr.bf16.mxu0 %v8769_v23  ;;  %4442 = vmatprep.subr.bf16.mxu1 %v8770_v21  ;;  %v8779_v21 = vld [vmem:[#allocation80_spill] sm:$0xff] }
 0x1ca   :  { %4380 = vmatpush1.bf16.msra.mxu0 %v8771_v7  ;;  %4444 = vmatpush1.bf16.msra.mxu1 %v8772_v55  ;;  %v8780_v55 = vld [vmem:[#allocation82_spill] sm:$0xff] }
 0x1cb   :  { %4382 = vmatprep.subr.bf16.mxu0 %v8773_v0  ;;  %4446 = vmatprep.subr.bf16.mxu1 %v8774_v26  ;;  %v8781_v26 = vld [vmem:[#allocation84_spill] sm:$0xff] }
 0x1ce   :  { %4384 = vmatpush1.bf16.msra.mxu0 %v8775_v28  ;;  %4448 = vmatpush1.bf16.msra.mxu1 %v8776_v19  ;;  %v8782_v19 = vld [vmem:[#allocation86_spill] sm:$0xff] }
 0x1cf   :  { %4386 = vmatprep.subr.bf16.mxu0 %v8777_v20  ;;  %4450 = vmatprep.subr.bf16.mxu1 %v7009_v3  ;;  %v8783_v3 = vld [vmem:[#allocation87_spill] sm:$0xff] }
 0x1d2   :  { %4388 = vmatpush1.bf16.msra.mxu0 %v8778_v32  ;;  %4452 = vmatpush1.bf16.msra.mxu1 %v7015_v6  ;;  %v8784_v6 = vld [vmem:[#allocation89_spill] sm:$0xff] }
 0x1d3   :  { %4390 = vmatprep.subr.bf16.mxu0 %v8779_v21  ;;  %4454 = vmatprep.subr.bf16.mxu1 %v7021_v12  ;;  %v8785_v12 = vld [vmem:[#allocation91_spill] sm:$0xff] }
 0x1d6   :  { %4392 = vmatpush1.bf16.msra.mxu0 %v8780_v55  ;;  %4456 = vmatpush1.bf16.msra.mxu1 %v7027_v17  ;;  %v8786_v17 = vld [vmem:[#allocation93_spill] sm:$0xff] }
 0x1d7   :  { %4394 = vmatprep.subr.bf16.mxu0 %v8781_v26  ;;  %4458 = vmatprep.subr.bf16.mxu1 %v7033_v4  ;;  %v8787_v4 = vld [vmem:[#allocation95_spill] sm:$0xff] }
 0x1da   :  { %4396 = vmatpush1.bf16.msra.mxu0 %v8782_v19  ;;  %4460 = vmatpush1.bf16.msra.mxu1 %v7039_v22  ;;  %v8788_v22 = vld [vmem:[#allocation97_spill] sm:$0xff] }
 0x1db   :  { %4398 = vmatprep.subr.bf16.mxu0 %v8783_v3  ;;  %4462 = vmatprep.subr.bf16.mxu1 %v7043_v16  ;;  %v8789_v16 = vld [vmem:[#allocation99_spill] sm:$0xff] }
 0x1de   :  { %4400 = vmatpush1.bf16.msra.mxu0 %v8784_v6  ;;  %4464 = vmatpush1.bf16.msra.mxu1 %v7047_v43  ;;  %v8790_v43 = vld [vmem:[#allocation101_spill] sm:$0xff] }
 0x1df   :  { %4402 = vmatprep.subr.bf16.mxu0 %v8785_v12  ;;  %4466 = vmatprep.subr.bf16.mxu1 %v7050_v1  ;;  %v8791_v1 = vld [vmem:[#allocation103_spill] sm:$0xff] }
 0x1e2   :  { %4404 = vmatpush1.bf16.msra.mxu0 %v8786_v17  ;;  %4468 = vmatpush1.bf16.msra.mxu1 %v7055_v61  ;;  %v8792_v61 = vld [vmem:[#allocation105_spill] sm:$0xff] }
 0x1e3   :  { %4406 = vmatprep.subr.bf16.mxu0 %v8787_v4  ;;  %4470 = vmatprep.subr.bf16.mxu1 %v7059_v39  ;;  %v8793_v39 = vld [vmem:[#allocation107_spill] sm:$0xff] }
 0x1e6   :  { %4408 = vmatpush1.bf16.msra.mxu0 %v8788_v22  ;;  %4472 = vmatpush1.bf16.msra.mxu1 %v7063_v5  ;;  %v8794_v5 = vld [vmem:[#allocation109_spill] sm:$0xff] }
 0x1e7   :  { %4410 = vmatprep.subr.bf16.mxu0 %v8789_v16  ;;  %4474 = vmatprep.subr.bf16.mxu1 %v7067_v38 }
 0x1ea   :  { %4412 = vmatpush1.bf16.msra.mxu0 %v8790_v43  ;;  %4476 = vmatpush1.bf16.msra.mxu1 %v7071_v27 }
 0x1eb   :  { %4414 = vmatprep.subr.bf16.mxu0 %v8791_v1  ;;  %4478 = vmatprep.subr.bf16.mxu1 %v7075_v30 }
 0x1ee   :  { %4416 = vmatpush1.bf16.msra.mxu0 %v8792_v61  ;;  %4480 = vmatpush1.bf16.msra.mxu1 %v7079_v35  ;;  %v8795_v35 = vld [vmem:[#allocation117_spill] sm:$0xff] }
 0x1ef   :  { %4418 = vmatprep.subr.bf16.mxu0 %v8793_v39  ;;  %4482 = vmatprep.subr.bf16.mxu1 %v7083_v24  ;;  %v8796_v24 = vld [vmem:[#allocation7_spill] sm:$0xff] }
 0x1f2   :  { %4420 = vmatpush1.bf16.msra.mxu0 %v8794_v5  ;;  %4484 = vmatpush1.bf16.msra.mxu1 %v7087_v41 }
 0x1f3   :  { %4422 = vmatprep.subr.bf16.mxu0 %v7019_v44  ;;  %4486 = vmatprep.subr.bf16.mxu1 %v7091_v34  ;;  %v8797_v34 = vld [vmem:[#allocation8_spill] sm:$0xff] }
 0x1f6   :  { %4424 = vmatpush1.bf16.msra.mxu0 %v7025_v42  ;;  %4488 = vmatpush1.bf16.msra.mxu1 %v7095_v47  ;;  %v8798_v47 = vld [vmem:[#allocation9_spill] sm:$0xff] }
 0x1f7   :  { %4426 = vmatprep.subr.bf16.mxu0 %v7031_v60  ;;  %4490 = vmatprep.subr.bf16.mxu1 %v7099_v40  ;;  %v8799_v40 = vld [vmem:[#allocation11_spill] sm:$0xff] }
 0x1fa   :  { %4428 = vmatpush1.bf16.msra.mxu0 %v8795_v35  ;;  %4492 = vmatpush1.bf16.msra.mxu1 %v7103_v9  ;;  %v8800_v9 = vld [vmem:[#allocation12_spill] sm:$0xff] }
 0x1fb   :  { %4494 = vmatprep.subr.bf16.mxu0 %v8796_v24  ;;  %4558 = vmatprep.subr.bf16.mxu1 %v6639_v33  ;;  %v8801_v33 = vld [vmem:[#allocation13_spill] sm:$0xff] }
 0x1fd   :  { %1488 = vmatmul.mubr.f32.vlgmr.msra.gmra.mrb[10].mxu0 %v7210_v49  ;;  %1559 = vmatmul.mubr.f32.vlgmr.msra.gmra.mrb[26].mxu1 %v7210_v49  ;;  %v8802_v49 = vld [vmem:[#allocation14_spill] sm:$0xff] }
 0x1fe   :  { %4496 = vmatpush1.bf16.msra.mxu0 %v8797_v34  ;;  %4560 = vmatpush1.bf16.msra.mxu1 %v6735_v29  ;;  %v8803_v29 = vld [vmem:[#allocation15_spill] sm:$0xff] }
 0x1ff   :  { %4498 = vmatprep.subr.bf16.mxu0 %v8798_v47  ;;  %4562 = vmatprep.subr.bf16.mxu1 %v6740_v36  ;;  %v8804_v36 = vld [vmem:[#allocation16_spill] sm:$0xff] }
 0x202   :  { %4500 = vmatpush1.bf16.msra.mxu0 %v8799_v40  ;;  %4564 = vmatpush1.bf16.msra.mxu1 %v6749_v48  ;;  %v8805_v48 = vld [vmem:[#allocation17_spill] sm:$0xff] }
 0x203   :  { %4502 = vmatprep.subr.bf16.mxu0 %v8800_v9  ;;  %4566 = vmatprep.subr.bf16.mxu1 %v6755_v54 }
 0x206   :  { %4504 = vmatpush1.bf16.msra.mxu0 %v8801_v33  ;;  %4568 = vmatpush1.bf16.msra.mxu1 %v6764_v63  ;;  %v8848_v63 = vld [vmem:[#allocation145_spill] sm:$0xff] }
 0x207   :  { %4506 = vmatprep.subr.bf16.mxu0 %v8802_v49  ;;  %4570 = vmatprep.subr.bf16.mxu1 %v6770_v10  ;;  %v8846_v10 = vld [vmem:[#allocation143_spill] sm:$0xff]  ;;  %v8847_v49 = vld [vmem:[#allocation144_spill] sm:$0xff] }
 0x20a   :  { %4508 = vmatpush1.bf16.msra.mxu0 %v8803_v29  ;;  %4572 = vmatpush1.bf16.msra.mxu1 %v6779_v25  ;;  %v8806_v25 = vld [vmem:[#allocation21_spill] sm:$0xff] }
 0x20b   :  { %4510 = vmatprep.subr.bf16.mxu0 %v8804_v36  ;;  %4574 = vmatprep.subr.bf16.mxu1 %v6785_v37  ;;  %v8807_v36 = vld [vmem:[#allocation50_spill] sm:$0xff] }
 0x20c   :  { %v8808_v37 = vld [vmem:[#allocation22_spill] sm:$0xff] }
 0x20e   :  { %4512 = vmatpush1.bf16.msra.mxu0 %v8805_v48  ;;  %4576 = vmatpush1.bf16.msra.mxu1 %v6794_v50  ;;  %v8809_v48 = vld [vmem:[#allocation52_spill] sm:$0xff]  ;;  %v8810_v50 = vld [vmem:[#allocation23_spill] sm:$0xff] }
 0x20f   :  { %4514 = vmatprep.subr.bf16.mxu0 %v6688_v53  ;;  %4578 = vmatprep.subr.bf16.mxu1 %v6800_v57  ;;  %v8811_v53 = vld [vmem:[#allocation54_spill] sm:$0xff]  ;;  %v8812_v57 = vld [vmem:[#allocation24_spill] sm:$0xff] }
 0x212   :  { %4516 = vmatpush1.bf16.msra.mxu0 %v6697_v58  ;;  %4580 = vmatpush1.bf16.msra.mxu1 %v6809_v13  ;;  %v8813_v58 = vld [vmem:[#allocation55_spill] sm:$0xff]  ;;  %v8814_v13 = vld [vmem:[#allocation25_spill] sm:$0xff] }
 0x213   :  { %4518 = vmatprep.subr.bf16.mxu0 %v6700_v59  ;;  %4582 = vmatprep.subr.bf16.mxu1 %v8720_v46  ;;  %v8815_v59 = vld [vmem:[#allocation57_spill] sm:$0xff]  ;;  %v8816_v46 = vld [vmem:[#allocation27_spill] sm:$0xff] }
 0x216   :  { %4520 = vmatpush1.bf16.msra.mxu0 %v8806_v25  ;;  %4584 = vmatpush1.bf16.msra.mxu1 %v8807_v36  ;;  %v8817_v25 = vld [vmem:[#allocation59_spill] sm:$0xff]  ;;  %v8818_v36 = vld [vmem:[#allocation29_spill] sm:$0xff] }
 0x217   :  { %4522 = vmatprep.subr.bf16.mxu0 %v8808_v37  ;;  %4586 = vmatprep.subr.bf16.mxu1 %v8809_v48  ;;  %v8819_v37 = vld [vmem:[#allocation61_spill] sm:$0xff]  ;;  %v8820_v48 = vld [vmem:[#allocation31_spill] sm:$0xff] }
 0x21a   :  { %4524 = vmatpush1.bf16.msra.mxu0 %v8810_v50  ;;  %4588 = vmatpush1.bf16.msra.mxu1 %v8811_v53  ;;  %v8821_v50 = vld [vmem:[#allocation63_spill] sm:$0xff]  ;;  %v8822_v53 = vld [vmem:[#allocation33_spill] sm:$0xff] }
 0x21b   :  { %4526 = vmatprep.subr.bf16.mxu0 %v8812_v57  ;;  %4590 = vmatprep.subr.bf16.mxu1 %v8813_v58  ;;  %v8823_v57 = vld [vmem:[#allocation65_spill] sm:$0xff]  ;;  %v8824_v58 = vld [vmem:[#allocation35_spill] sm:$0xff] }
 0x21e   :  { %4528 = vmatpush1.bf16.msra.mxu0 %v8814_v13  ;;  %4592 = vmatpush1.bf16.msra.mxu1 %v8815_v59  ;;  %v8825_v13 = vld [vmem:[#allocation67_spill] sm:$0xff]  ;;  %v8826_v59 = vld [vmem:[#allocation37_spill] sm:$0xff] }
 0x21f   :  { %4530 = vmatprep.subr.bf16.mxu0 %v8816_v46  ;;  %4594 = vmatprep.subr.bf16.mxu1 %v8817_v25  ;;  %v8827_v46 = vld [vmem:[#allocation69_spill] sm:$0xff]  ;;  %v8828_v25 = vld [vmem:[#allocation39_spill] sm:$0xff] }
 0x222   :  { %4532 = vmatpush1.bf16.msra.mxu0 %v8818_v36  ;;  %4596 = vmatpush1.bf16.msra.mxu1 %v8819_v37  ;;  %v8829_v36 = vld [vmem:[#allocation71_spill] sm:$0xff]  ;;  %v8830_v37 = vld [vmem:[#allocation41_spill] sm:$0xff] }
 0x223   :  { %4534 = vmatprep.subr.bf16.mxu0 %v8820_v48  ;;  %4598 = vmatprep.subr.bf16.mxu1 %v8821_v50  ;;  %v8831_v48 = vld [vmem:[#allocation73_spill] sm:$0xff]  ;;  %v8832_v50 = vld [vmem:[#allocation43_spill] sm:$0xff] }
 0x226   :  { %4536 = vmatpush1.bf16.msra.mxu0 %v8822_v53  ;;  %4600 = vmatpush1.bf16.msra.mxu1 %v8823_v57  ;;  %v8833_v53 = vld [vmem:[#allocation75_spill] sm:$0xff]  ;;  %v8834_v57 = vld [vmem:[#allocation45_spill] sm:$0xff] }
 0x227   :  { %4538 = vmatprep.subr.bf16.mxu0 %v8824_v58  ;;  %4602 = vmatprep.subr.bf16.mxu1 %v8825_v13  ;;  %v8835_v58 = vld [vmem:[#allocation77_spill] sm:$0xff]  ;;  %v8836_v13 = vld [vmem:[#allocation47_spill] sm:$0xff] }
 0x22a   :  { %4540 = vmatpush1.bf16.msra.mxu0 %v8826_v59  ;;  %4604 = vmatpush1.bf16.msra.mxu1 %v8827_v46  ;;  %v8837_v59 = vld [vmem:[#allocation79_spill] sm:$0xff]  ;;  %v8838_v46 = vld [vmem:[#allocation49_spill] sm:$0xff] }
 0x22b   :  { %4542 = vmatprep.subr.bf16.mxu0 %v8828_v25  ;;  %4606 = vmatprep.subr.bf16.mxu1 %v8829_v36  ;;  %v8839_v25 = vld [vmem:[#allocation81_spill] sm:$0xff]  ;;  %v8840_v36 = vld [vmem:[#allocation51_spill] sm:$0xff] }
 0x22e   :  { %4544 = vmatpush1.bf16.msra.mxu0 %v8830_v37  ;;  %4608 = vmatpush1.bf16.msra.mxu1 %v8831_v48  ;;  %v8841_v37 = vld [vmem:[#allocation83_spill] sm:$0xff]  ;;  %v8842_v48 = vld [vmem:[#allocation53_spill] sm:$0xff] }
 0x22f   :  { %4546 = vmatprep.subr.bf16.mxu0 %v8832_v50  ;;  %4610 = vmatprep.subr.bf16.mxu1 %v8833_v53  ;;  %v8843_v50 = vld [vmem:[#allocation85_spill] sm:$0xff]  ;;  %v8844_v53 = vld [vmem:[#allocation56_spill] sm:$0xff] }
 0x232   :  { %4548 = vmatpush1.bf16.msra.mxu0 %v8834_v57  ;;  %4612 = vmatpush1.bf16.msra.mxu1 %v8835_v58  ;;  %v8845_v57 = vld [vmem:[#allocation88_spill] sm:$0xff] }
 0x233   :  { %4550 = vmatprep.subr.bf16.mxu0 %v8836_v13  ;;  %4614 = vmatprep.subr.bf16.mxu1 %v8837_v59 }
 0x236   :  { %4552 = vmatpush1.bf16.msra.mxu0 %v8838_v46  ;;  %4616 = vmatpush1.bf16.msra.mxu1 %v8839_v25 }
 0x237   :  { %4554 = vmatprep.subr.bf16.mxu0 %v8840_v36  ;;  %4618 = vmatprep.subr.bf16.mxu1 %v8841_v37 }
 0x23a   :  { %4556 = vmatpush1.bf16.msra.mxu0 %v8842_v48  ;;  %4620 = vmatpush1.bf16.msra.mxu1 %v8843_v50 }
 0x23b   :  { %4622 = vmatprep.subr.bf16.mxu0 %v8844_v53  ;;  %4686 = vmatprep.subr.bf16.mxu1 %v8845_v57 }
 0x290   :  { %v1347_v58 = vpop.f32.mrb[2].mxu0  ;;  %v1418_v13 = vpop.f32.mrb[10].mxu1 }
 0x291   :  { %v1349_v29 = vpop.f32.mrb[3].mxu0  ;;  %v1420_v59 = vpop.f32.mrb[11].mxu1  ;;  %v6065_v46 = vadd.f32 %v1347_v58, %v8846_v10  ;;  %v6089_v25 = vadd.f32 %v1418_v13, %v7182_v56 }
 0x292   :  { %v6066_v36 = vadd.f32 %v1349_v29, %v8847_v49  ;;  %v6090_v37 = vadd.f32 %v1420_v59, %v8848_v63 }
 0x293   :  { %v3902_v33 = vmul.f32 -1.442695, %v6065_v46  ;;  %v3904_v48 = vmul.f32 -1.442695, %v6089_v25  ;;  %v8849_v25 = vld [vmem:[#allocation146_spill] sm:$0xff] }
 0x294   :  { %v3903_v54 = vmul.f32 -1.442695, %v6066_v36  ;;  %v3905_v50 = vmul.f32 -1.442695, %v6090_v37  ;;  %v8850_v37 = vld [vmem:[#allocation147_spill] sm:$0xff] }
 0x295   :  { %6227 = vpow2.f32 %v3902_v33 }
 0x296   :  { %6229 = vpow2.f32 %v3904_v48 }
 0x297   :  { %6231 = vpow2.f32 %v3903_v54 }
 0x298   :  { %6233 = vpow2.f32 %v3905_v50 }
 0x29f   :  { %v6228_v57 = vpop.eup %6227 }
 0x2a0   :  { %v6230_v53 = vpop.eup %6229  ;;  %v1579_v47 = vadd.f32 1.0, %v6228_v57 }
 0x2a1   :  { %v6232_v9 = vpop.eup %6231  ;;  %v1591_v58 = vadd.f32 1.0, %v6230_v53 }
 0x2a2   :  { %v6234_v40 = vpop.eup %6233  ;;  %v1580_v10 = vadd.f32 1.0, %v6232_v9  ;;  %6235 = vrcp.f32 %v1579_v47 }
 0x2a3   :  { %v1592_v13 = vadd.f32 1.0, %v6234_v40  ;;  %6237 = vrcp.f32 %v1591_v58 }
 0x2a4   :  { %6239 = vrcp.f32 %v1580_v10 }
 0x2a5   :  { %6241 = vrcp.f32 %v1592_v13 }
 0x2ac   :  { %v6236_v47 = vpop.eup %6235 }
 0x2ad   :  { %v6238_v40 = vpop.eup %6237 }
 0x2ae   :  { %v6240_v10 = vpop.eup %6239 }
 0x2af   :  { %v6242_v9 = vpop.eup %6241 }
 0x2d0   :  { %v1489_v29 = vpop.f32.mrb[10].mxu0  ;;  %v1560_v59 = vpop.f32.mrb[26].mxu1 }
 0x2d1   :  { %v6105_v36 = vadd.f32 %v1489_v29, %v8849_v25  ;;  %v6121_v33 = vadd.f32 %v1560_v59, %v7202_v8  ;;  %v1491_v48 = vpop.f32.mrb[11].mxu0  ;;  %v1562_v54 = vpop.f32.mrb[27].mxu1  ;;  %v1611_v59 = vmul.f32 %v6238_v40, %v7198_v31 }
 0x2d2   :  { %v6106_v50 = vadd.f32 %v1491_v48, %v8850_v37  ;;  %v6122_v46 = vadd.f32 %v1562_v54, %v7204_v2  ;;  %v1612_v48 = vmul.f32 %v6242_v9, %v7200_v51  ;;  %v8854_v9 = vld [vmem:[#allocation100_spill] sm:$0xff] }
 0x2d3   :  { %6243 = vtanh.f32 %v6105_v36  ;;  %v3906_v53 = vmul.f32 -1.442695, %v6121_v33 }
 0x2d4   :  { %6245 = vtanh.f32 %v6106_v50  ;;  %v3907_v57 = vmul.f32 -1.442695, %v6122_v46 }
 0x2d5   :  { %6247 = vpow2.f32 %v3906_v53 }
 0x2d6   :  { %6249 = vpow2.f32 %v3907_v57 }
 0x2dd   :  { %v6244_v58 = vpop.eup %6243 }
 0x2de   :  { %v6246_v29 = vpop.eup %6245  ;;  %v1613_v8 = vmul.f32 %v6244_v58, %v6236_v47  ;;  %v8855_v58 = vld [vmem:[#allocation102_spill] sm:$0xff] }
 0x2df   :  { %v6248_v13 = vpop.eup %6247  ;;  %v1614_v37 = vmul.f32 %v6246_v29, %v6240_v10  ;;  %v8853_v10 = vld [vmem:[#allocation98_spill] sm:$0xff]  ;;  %v8856_v29 = vld [vmem:[#allocation104_spill] sm:$0xff] }
 0x2e0   :  { %v6250_v54 = vpop.eup %6249  ;;  %v7354_v36 = vadd.f32 %v1613_v8, %v1611_v59  ;;  %v1605_v33 = vadd.f32 1.0, %v6248_v13  ;;  %v8851_v8 = vld [vmem:[#allocation64_spill] sm:$0xff]  ;;  %v8857_v59 = vld [vmem:[#allocation106_spill] sm:$0xff] }
 0x2e1   :  { %v7356_v50 = vadd.f32 %v1614_v37, %v1612_v48  ;;  %v1606_v46 = vadd.f32 1.0, %v6250_v54  ;;  %v8852_v37 = vld [vmem:[#allocation96_spill] sm:$0xff]  ;;  %v8859_v48 = vld [vmem:[#allocation110_spill] sm:$0xff] }
 0x2e2   :  { %6251 = vtanh.f32 %v7354_v36  ;;  %v8858_v13 = vld [vmem:[#allocation108_spill] sm:$0xff] }
 0x2e3   :  { %6253 = vrcp.f32 %v1605_v33  ;;  %v8860_v54 = vld [vmem:[#allocation112_spill] sm:$0xff]  ;;  %v8861_v33 = vld [vmem:[#allocation114_spill] sm:$0xff] }
 0x2e4   :  { %6255 = vtanh.f32 %v7356_v50 }
 0x2e5   :  { %6257 = vrcp.f32 %v1606_v46  ;;  %v8862_v46 = vld [vmem:[#allocation116_spill] sm:$0xff] }
 0x2ec   :  { %v6252_v53 = vpop.eup %6251 }
 0x2ed   :  { %v6254_v31 = vpop.eup %6253 }
 0x2ee   :  { %v6256_v57 = vpop.eup %6255  ;;  %v7360_v51 = vmul.f32 %v6254_v31, %v6252_v53  ;;  %v8863_v53 = vld [vmem:[#allocation118_spill] sm:$0xff]  ;;  %v8864_v31 = vld [vmem:[#allocation119_spill] sm:$0xff] }
 0x2ef   :  { %v6258_v47 = vpop.eup %6257 }
 0x2f0   :  { %v1620_v40 = vmul.f32 %v6258_v47, %v6256_v57  ;;  %v8865_v57 = vld [vmem:[#allocation120_spill] sm:$0xff]  ;;  %v8866_v47 = vld [vmem:[#allocation121_spill] sm:$0xff] }
 0x2f2   :  { %1696 = vmatprep.mubr.f32.mxu0 %v1620_v40  ;;  %1767 = vmatprep.mubr.f32.mxu1 %v1620_v40 }
 0x2f3   :  { %1697 = vmatmul.mubr.f32.vlgmr.msra.gmra.mrb[4].mxu0 %v7360_v51  ;;  %1768 = vmatmul.mubr.f32.vlgmr.msra.gmra.mrb[12].mxu1 %v7360_v51 }
 0x2f4   :  { %4624 = vmatpush1.bf16.msra.mxu0 %v8759_v45  ;;  %4688 = vmatpush1.bf16.msra.mxu1 %v8760_v52 }
 0x2f5   :  { %1838 = vmatprep.mubr.f32.mxu0 %v1620_v40  ;;  %1909 = vmatprep.mubr.f32.mxu1 %v1620_v40  ;;  %v8867_v40 = vld [vmem:[#allocation122_spill] sm:$0xff] }
 0x2f6   :  { %4626 = vmatprep.subr.bf16.mxu0 %v8761_v11  ;;  %4690 = vmatprep.subr.bf16.mxu1 %v8762_v62 }
 0x2f8   :  { %4628 = vmatpush1.bf16.msra.mxu0 %v8763_v14  ;;  %4692 = vmatpush1.bf16.msra.mxu1 %v8764_v18 }
 0x2f9   :  { %4630 = vmatprep.subr.bf16.mxu0 %v8851_v8  ;;  %4694 = vmatprep.subr.bf16.mxu1 %v8852_v37 }
 0x2fc   :  { %4632 = vmatpush1.bf16.msra.mxu0 %v8767_v15  ;;  %4696 = vmatpush1.bf16.msra.mxu1 %v8853_v10 }
 0x2fd   :  { %4634 = vmatprep.subr.bf16.mxu0 %v8769_v23  ;;  %4698 = vmatprep.subr.bf16.mxu1 %v8854_v9 }
 0x300   :  { %4636 = vmatpush1.bf16.msra.mxu0 %v8771_v7  ;;  %4700 = vmatpush1.bf16.msra.mxu1 %v8855_v58 }
 0x301   :  { %4638 = vmatprep.subr.bf16.mxu0 %v8773_v0  ;;  %4702 = vmatprep.subr.bf16.mxu1 %v8856_v29 }
 0x304   :  { %4640 = vmatpush1.bf16.msra.mxu0 %v8775_v28  ;;  %4704 = vmatpush1.bf16.msra.mxu1 %v8857_v59 }
 0x305   :  { %4642 = vmatprep.subr.bf16.mxu0 %v8777_v20  ;;  %4706 = vmatprep.subr.bf16.mxu1 %v8858_v13 }
 0x308   :  { %4644 = vmatpush1.bf16.msra.mxu0 %v8778_v32  ;;  %4708 = vmatpush1.bf16.msra.mxu1 %v8859_v48 }
 0x309   :  { %4646 = vmatprep.subr.bf16.mxu0 %v8779_v21  ;;  %4710 = vmatprep.subr.bf16.mxu1 %v8860_v54 }
 0x30c   :  { %4648 = vmatpush1.bf16.msra.mxu0 %v8780_v55  ;;  %4712 = vmatpush1.bf16.msra.mxu1 %v8861_v33 }
 0x30d   :  { %4650 = vmatprep.subr.bf16.mxu0 %v8781_v26  ;;  %4714 = vmatprep.subr.bf16.mxu1 %v8862_v46 }
 0x310   :  { %4652 = vmatpush1.bf16.msra.mxu0 %v8782_v19  ;;  %4716 = vmatpush1.bf16.msra.mxu1 %v8863_v53  ;;  %v8868_v19 = vld [vmem:[#allocation123_spill] sm:$0xff] }
 0x311   :  { %4654 = vmatprep.subr.bf16.mxu0 %v8783_v3  ;;  %4718 = vmatprep.subr.bf16.mxu1 %v8864_v31  ;;  %v8869_v3 = vld [vmem:[#allocation124_spill] sm:$0xff] }
 0x314   :  { %4656 = vmatpush1.bf16.msra.mxu0 %v8784_v6  ;;  %4720 = vmatpush1.bf16.msra.mxu1 %v8865_v57 }
 0x315   :  { %4658 = vmatprep.subr.bf16.mxu0 %v8785_v12  ;;  %4722 = vmatprep.subr.bf16.mxu1 %v8866_v47 }
 0x318   :  { %4660 = vmatpush1.bf16.msra.mxu0 %v8786_v17  ;;  %4724 = vmatpush1.bf16.msra.mxu1 %v8867_v40 }
 0x319   :  { %4662 = vmatprep.subr.bf16.mxu0 %v8787_v4  ;;  %4726 = vmatprep.subr.bf16.mxu1 %v8868_v19  ;;  %v8870_v4 = vld [vmem:[#allocation128_spill] sm:$0xff] }
 0x31c   :  { %4664 = vmatpush1.bf16.msra.mxu0 %v8788_v22  ;;  %4728 = vmatpush1.bf16.msra.mxu1 %v8869_v3  ;;  %v8871_v22 = vld [vmem:[#allocation129_spill] sm:$0xff] }
 0x31d   :  { %4666 = vmatprep.subr.bf16.mxu0 %v8789_v16  ;;  %4730 = vmatprep.subr.bf16.mxu1 %v7067_v38 }
 0x320   :  { %4668 = vmatpush1.bf16.msra.mxu0 %v8790_v43  ;;  %4732 = vmatpush1.bf16.msra.mxu1 %v7071_v27  ;;  %v8872_v43 = vld [vmem:[#allocation131_spill] sm:$0xff] }
 0x321   :  { %4670 = vmatprep.subr.bf16.mxu0 %v8791_v1  ;;  %4734 = vmatprep.subr.bf16.mxu1 %v7075_v30  ;;  %v8873_v1 = vld [vmem:[#allocation132_spill] sm:$0xff] }
 0x324   :  { %4672 = vmatpush1.bf16.msra.mxu0 %v8792_v61  ;;  %4736 = vmatpush1.bf16.msra.mxu1 %v8870_v4  ;;  %v8874_v61 = vld [vmem:[#allocation133_spill] sm:$0xff] }
 0x325   :  { %4674 = vmatprep.subr.bf16.mxu0 %v8793_v39  ;;  %4738 = vmatprep.subr.bf16.mxu1 %v8871_v22  ;;  %v8875_v39 = vld [vmem:[#allocation134_spill] sm:$0xff] }
 0x328   :  { %4676 = vmatpush1.bf16.msra.mxu0 %v8794_v5  ;;  %4740 = vmatpush1.bf16.msra.mxu1 %v7087_v41  ;;  %v8876_v5 = vld [vmem:[#allocation10_spill] sm:$0xff]  ;;  %v8940_v41 = vld [vmem:[#allocation143_spill] sm:$0xff] }
 0x329   :  { %4678 = vmatprep.subr.bf16.mxu0 %v7019_v44  ;;  %4742 = vmatprep.subr.bf16.mxu1 %v8872_v43  ;;  %v8885_v43 = vld [vmem:[#allocation34_spill] sm:$0xff] }
 0x32c   :  { %4680 = vmatpush1.bf16.msra.mxu0 %v7025_v42  ;;  %4744 = vmatpush1.bf16.msra.mxu1 %v8873_v1  ;;  %v8877_v42 = vld [vmem:[#allocation26_spill] sm:$0xff]  ;;  %v8878_v1 = vld [vmem:[#allocation9_spill] sm:$0xff] }
 0x32d   :  { %4682 = vmatprep.subr.bf16.mxu0 %v7031_v60  ;;  %4746 = vmatprep.subr.bf16.mxu1 %v8874_v61  ;;  %v8879_v60 = vld [vmem:[#allocation28_spill] sm:$0xff]  ;;  %v8880_v61 = vld [vmem:[#allocation11_spill] sm:$0xff] }
 0x330   :  { %4684 = vmatpush1.bf16.msra.mxu0 %v8795_v35  ;;  %4748 = vmatpush1.bf16.msra.mxu1 %v8875_v39  ;;  %v8881_v35 = vld [vmem:[#allocation30_spill] sm:$0xff]  ;;  %v8882_v39 = vld [vmem:[#allocation12_spill] sm:$0xff] }
 0x331   :  { %4750 = vmatprep.subr.bf16.mxu0 %v8796_v24  ;;  %4814 = vmatprep.subr.bf16.mxu1 %v8876_v5  ;;  %v8883_v24 = vld [vmem:[#allocation32_spill] sm:$0xff]  ;;  %v8884_v5 = vld [vmem:[#allocation13_spill] sm:$0xff] }
 0x333   :  { %1839 = vmatmul.mubr.f32.vlgmr.msra.gmra.mrb[12].mxu0 %v7360_v51  ;;  %1910 = vmatmul.mubr.f32.vlgmr.msra.gmra.mrb[28].mxu1 %v7360_v51  ;;  %v8886_v51 = vld [vmem:[#allocation14_spill] sm:$0xff] }
 0x334   :  { %4752 = vmatpush1.bf16.msra.mxu0 %v8797_v34  ;;  %4816 = vmatpush1.bf16.msra.mxu1 %v8877_v42  ;;  %v8887_v34 = vld [vmem:[#allocation36_spill] sm:$0xff]  ;;  %v8888_v42 = vld [vmem:[#allocation15_spill] sm:$0xff] }
 0x335   :  { %4754 = vmatprep.subr.bf16.mxu0 %v8878_v1  ;;  %4818 = vmatprep.subr.bf16.mxu1 %v8879_v60  ;;  %v8889_v1 = vld [vmem:[#allocation38_spill] sm:$0xff]  ;;  %v8890_v60 = vld [vmem:[#allocation16_spill] sm:$0xff] }
 0x338   :  { %4756 = vmatpush1.bf16.msra.mxu0 %v8880_v61  ;;  %4820 = vmatpush1.bf16.msra.mxu1 %v8881_v35  ;;  %v8891_v61 = vld [vmem:[#allocation40_spill] sm:$0xff]  ;;  %v8892_v35 = vld [vmem:[#allocation17_spill] sm:$0xff] }
 0x339   :  { %4758 = vmatprep.subr.bf16.mxu0 %v8882_v39  ;;  %4822 = vmatprep.subr.bf16.mxu1 %v8883_v24  ;;  %v8893_v39 = vld [vmem:[#allocation42_spill] sm:$0xff] }
 0x33a   :  { %v8894_v24 = vld [vmem:[#allocation18_spill] sm:$0xff] }
 0x33c   :  { %4760 = vmatpush1.bf16.msra.mxu0 %v8884_v5  ;;  %4824 = vmatpush1.bf16.msra.mxu1 %v8885_v43  ;;  %v8895_v5 = vld [vmem:[#allocation44_spill] sm:$0xff]  ;;  %v8896_v43 = vld [vmem:[#allocation19_spill] sm:$0xff] }
 0x33d   :  { %4762 = vmatprep.subr.bf16.mxu0 %v8886_v51  ;;  %4826 = vmatprep.subr.bf16.mxu1 %v8887_v34  ;;  %v8897_v51 = vld [vmem:[#allocation46_spill] sm:$0xff]  ;;  %v8898_v34 = vld [vmem:[#allocation20_spill] sm:$0xff] }
 0x340   :  { %4764 = vmatpush1.bf16.msra.mxu0 %v8888_v42  ;;  %4828 = vmatpush1.bf16.msra.mxu1 %v8889_v1  ;;  %v8899_v42 = vld [vmem:[#allocation48_spill] sm:$0xff]  ;;  %v8900_v1 = vld [vmem:[#allocation21_spill] sm:$0xff] }
 0x341   :  { %4766 = vmatprep.subr.bf16.mxu0 %v8890_v60  ;;  %4830 = vmatprep.subr.bf16.mxu1 %v8891_v61  ;;  %v8901_v60 = vld [vmem:[#allocation50_spill] sm:$0xff] }
 0x342   :  { %v8902_v61 = vld [vmem:[#allocation22_spill] sm:$0xff] }
 0x344   :  { %4768 = vmatpush1.bf16.msra.mxu0 %v8892_v35  ;;  %4832 = vmatpush1.bf16.msra.mxu1 %v8893_v39  ;;  %v8903_v35 = vld [vmem:[#allocation52_spill] sm:$0xff]  ;;  %v8904_v39 = vld [vmem:[#allocation23_spill] sm:$0xff] }
 0x345   :  { %4770 = vmatprep.subr.bf16.mxu0 %v8894_v24  ;;  %4834 = vmatprep.subr.bf16.mxu1 %v8895_v5  ;;  %v8905_v24 = vld [vmem:[#allocation54_spill] sm:$0xff]  ;;  %v8906_v5 = vld [vmem:[#allocation24_spill] sm:$0xff] }
 0x348   :  { %4772 = vmatpush1.bf16.msra.mxu0 %v8896_v43  ;;  %4836 = vmatpush1.bf16.msra.mxu1 %v8897_v51  ;;  %v8907_v43 = vld [vmem:[#allocation55_spill] sm:$0xff]  ;;  %v8908_v51 = vld [vmem:[#allocation25_spill] sm:$0xff] }
 0x349   :  { %4774 = vmatprep.subr.bf16.mxu0 %v8898_v34  ;;  %4838 = vmatprep.subr.bf16.mxu1 %v8899_v42  ;;  %v8909_v34 = vld [vmem:[#allocation57_spill] sm:$0xff]  ;;  %v8910_v42 = vld [vmem:[#allocation27_spill] sm:$0xff] }
 0x34c   :  { %4776 = vmatpush1.bf16.msra.mxu0 %v8900_v1  ;;  %4840 = vmatpush1.bf16.msra.mxu1 %v8901_v60  ;;  %v8911_v1 = vld [vmem:[#allocation59_spill] sm:$0xff]  ;;  %v8912_v60 = vld [vmem:[#allocation29_spill] sm:$0xff] }
 0x34d   :  { %4778 = vmatprep.subr.bf16.mxu0 %v8902_v61  ;;  %4842 = vmatprep.subr.bf16.mxu1 %v8903_v35  ;;  %v8913_v61 = vld [vmem:[#allocation61_spill] sm:$0xff]  ;;  %v8914_v35 = vld [vmem:[#allocation31_spill] sm:$0xff] }
 0x350   :  { %4780 = vmatpush1.bf16.msra.mxu0 %v8904_v39  ;;  %4844 = vmatpush1.bf16.msra.mxu1 %v8905_v24  ;;  %v8915_v39 = vld [vmem:[#allocation63_spill] sm:$0xff]  ;;  %v8916_v24 = vld [vmem:[#allocation33_spill] sm:$0xff] }
 0x351   :  { %4782 = vmatprep.subr.bf16.mxu0 %v8906_v5  ;;  %4846 = vmatprep.subr.bf16.mxu1 %v8907_v43  ;;  %v8917_v5 = vld [vmem:[#allocation65_spill] sm:$0xff]  ;;  %v8918_v43 = vld [vmem:[#allocation35_spill] sm:$0xff] }
 0x354   :  { %4784 = vmatpush1.bf16.msra.mxu0 %v8908_v51  ;;  %4848 = vmatpush1.bf16.msra.mxu1 %v8909_v34  ;;  %v8919_v51 = vld [vmem:[#allocation67_spill] sm:$0xff]  ;;  %v8920_v34 = vld [vmem:[#allocation37_spill] sm:$0xff] }
 0x355   :  { %4786 = vmatprep.subr.bf16.mxu0 %v8910_v42  ;;  %4850 = vmatprep.subr.bf16.mxu1 %v8911_v1  ;;  %v8921_v42 = vld [vmem:[#allocation69_spill] sm:$0xff]  ;;  %v8922_v1 = vld [vmem:[#allocation39_spill] sm:$0xff] }
 0x358   :  { %4788 = vmatpush1.bf16.msra.mxu0 %v8912_v60  ;;  %4852 = vmatpush1.bf16.msra.mxu1 %v8913_v61  ;;  %v8923_v60 = vld [vmem:[#allocation71_spill] sm:$0xff]  ;;  %v8924_v61 = vld [vmem:[#allocation41_spill] sm:$0xff] }
 0x359   :  { %4790 = vmatprep.subr.bf16.mxu0 %v8914_v35  ;;  %4854 = vmatprep.subr.bf16.mxu1 %v8915_v39  ;;  %v8925_v35 = vld [vmem:[#allocation73_spill] sm:$0xff]  ;;  %v8926_v39 = vld [vmem:[#allocation43_spill] sm:$0xff] }
 0x35c   :  { %4792 = vmatpush1.bf16.msra.mxu0 %v8916_v24  ;;  %4856 = vmatpush1.bf16.msra.mxu1 %v8917_v5  ;;  %v8927_v24 = vld [vmem:[#allocation75_spill] sm:$0xff]  ;;  %v8928_v5 = vld [vmem:[#allocation45_spill] sm:$0xff] }
 0x35d   :  { %4794 = vmatprep.subr.bf16.mxu0 %v8918_v43  ;;  %4858 = vmatprep.subr.bf16.mxu1 %v8919_v51  ;;  %v8929_v43 = vld [vmem:[#allocation77_spill] sm:$0xff]  ;;  %v8930_v51 = vld [vmem:[#allocation47_spill] sm:$0xff] }
 0x360   :  { %4796 = vmatpush1.bf16.msra.mxu0 %v8920_v34  ;;  %4860 = vmatpush1.bf16.msra.mxu1 %v8921_v42  ;;  %v8931_v34 = vld [vmem:[#allocation79_spill] sm:$0xff]  ;;  %v8932_v42 = vld [vmem:[#allocation49_spill] sm:$0xff] }
 0x361   :  { %4798 = vmatprep.subr.bf16.mxu0 %v8922_v1  ;;  %4862 = vmatprep.subr.bf16.mxu1 %v8923_v60  ;;  %v8933_v1 = vld [vmem:[#allocation81_spill] sm:$0xff]  ;;  %v8934_v60 = vld [vmem:[#allocation51_spill] sm:$0xff] }
 0x364   :  { %4800 = vmatpush1.bf16.msra.mxu0 %v8924_v61  ;;  %4864 = vmatpush1.bf16.msra.mxu1 %v8925_v35  ;;  %v8935_v61 = vld [vmem:[#allocation83_spill] sm:$0xff]  ;;  %v8936_v35 = vld [vmem:[#allocation53_spill] sm:$0xff] }
 0x365   :  { %4802 = vmatprep.subr.bf16.mxu0 %v8926_v39  ;;  %4866 = vmatprep.subr.bf16.mxu1 %v8927_v24  ;;  %v8937_v39 = vld [vmem:[#allocation85_spill] sm:$0xff]  ;;  %v8938_v24 = vld [vmem:[#allocation56_spill] sm:$0xff] }
 0x368   :  { %4804 = vmatpush1.bf16.msra.mxu0 %v8928_v5  ;;  %4868 = vmatpush1.bf16.msra.mxu1 %v8929_v43  ;;  %v8939_v5 = vld [vmem:[#allocation88_spill] sm:$0xff] }
 0x369   :  { %4806 = vmatprep.subr.bf16.mxu0 %v8930_v51  ;;  %4870 = vmatprep.subr.bf16.mxu1 %v8931_v34 }
 0x36c   :  { %4808 = vmatpush1.bf16.msra.mxu0 %v8932_v42  ;;  %4872 = vmatpush1.bf16.msra.mxu1 %v8933_v1 }
 0x36d   :  { %4810 = vmatprep.subr.bf16.mxu0 %v8934_v60  ;;  %4874 = vmatprep.subr.bf16.mxu1 %v8935_v61 }
 0x370   :  { %4812 = vmatpush1.bf16.msra.mxu0 %v8936_v35  ;;  %4876 = vmatpush1.bf16.msra.mxu1 %v8937_v39 }
 0x371   :  { %4878 = vmatprep.subr.bf16.mxu0 %v8938_v24  ;;  %4942 = vmatprep.subr.bf16.mxu1 %v8939_v5 }
 0x3c6   :  { %v1698_v43 = vpop.f32.mrb[4].mxu0  ;;  %v1769_v51 = vpop.f32.mrb[12].mxu1 }
 0x3c7   :  { %v1700_v44 = vpop.f32.mrb[5].mxu0  ;;  %v1771_v34 = vpop.f32.mrb[13].mxu1  ;;  %v6067_v42 = vadd.f32 %v1698_v43, %v8940_v41  ;;  %v6091_v1 = vadd.f32 %v1769_v51, %v7182_v56 }
 0x3c8   :  { %v6068_v60 = vadd.f32 %v1700_v44, %v8847_v49  ;;  %v6092_v61 = vadd.f32 %v1771_v34, %v8848_v63 }
 0x3c9   :  { %v3908_v22 = vmul.f32 -1.442695, %v6067_v42  ;;  %v3910_v35 = vmul.f32 -1.442695, %v6091_v1  ;;  %v8942_v1 = vld [vmem:[#allocation147_spill] sm:$0xff] }
 0x3ca   :  { %v3909_v4 = vmul.f32 -1.442695, %v6068_v60  ;;  %v3911_v39 = vmul.f32 -1.442695, %v6092_v61  ;;  %v8941_v60 = vld [vmem:[#allocation148_spill] sm:$0xff] }
 0x3cb   :  { %6259 = vpow2.f32 %v3908_v22 }
 0x3cc   :  { %6261 = vpow2.f32 %v3910_v35 }
 0x3cd   :  { %6263 = vpow2.f32 %v3909_v4 }
 0x3ce   :  { %6265 = vpow2.f32 %v3911_v39 }
 0x3d5   :  { %v6260_v5 = vpop.eup %6259 }
 0x3d6   :  { %v6262_v24 = vpop.eup %6261  ;;  %v1930_v38 = vadd.f32 1.0, %v6260_v5 }
 0x3d7   :  { %v6264_v30 = vpop.eup %6263  ;;  %v1942_v43 = vadd.f32 1.0, %v6262_v24 }
 0x3d8   :  { %v6266_v27 = vpop.eup %6265  ;;  %v1931_v41 = vadd.f32 1.0, %v6264_v30  ;;  %6267 = vrcp.f32 %v1930_v38 }
 0x3d9   :  { %v1943_v51 = vadd.f32 1.0, %v6266_v27  ;;  %6269 = vrcp.f32 %v1942_v43 }
 0x3da   :  { %6271 = vrcp.f32 %v1931_v41 }
 0x3db   :  { %6273 = vrcp.f32 %v1943_v51 }
 0x3e2   :  { %v6268_v38 = vpop.eup %6267 }
 0x3e3   :  { %v6270_v30 = vpop.eup %6269 }
 0x3e4   :  { %v6272_v41 = vpop.eup %6271 }
 0x3e5   :  { %v6274_v24 = vpop.eup %6273 }
 0x406   :  { %v1840_v44 = vpop.f32.mrb[12].mxu0  ;;  %v1911_v34 = vpop.f32.mrb[28].mxu1 }
 0x407   :  { %v6107_v42 = vadd.f32 %v1840_v44, %v8849_v25  ;;  %v6123_v22 = vadd.f32 %v1911_v34, %v8941_v60  ;;  %v1842_v35 = vpop.f32.mrb[13].mxu0  ;;  %v1913_v4 = vpop.f32.mrb[29].mxu1  ;;  %v1962_v34 = vmul.f32 %v6270_v30, %v7354_v36 }
 0x408   :  { %v6108_v61 = vadd.f32 %v1842_v35, %v8942_v1  ;;  %v6124_v39 = vadd.f32 %v1913_v4, %v7204_v2  ;;  %v1963_v35 = vmul.f32 %v6274_v24, %v7356_v50  ;;  %v8946_v24 = vld [vmem:[#allocation97_spill] sm:$0xff] }
 0x409   :  { %6275 = vtanh.f32 %v6107_v42  ;;  %v3912_v5 = vmul.f32 -1.442695, %v6123_v22 }
 0x40a   :  { %6277 = vtanh.f32 %v6108_v61  ;;  %v3913_v27 = vmul.f32 -1.442695, %v6124_v39 }
 0x40b   :  { %6279 = vpow2.f32 %v3912_v5 }
 0x40c   :  { %6281 = vpow2.f32 %v3913_v27 }
 0x413   :  { %v6276_v43 = vpop.eup %6275 }
 0x414   :  { %v6278_v44 = vpop.eup %6277  ;;  %v1964_v60 = vmul.f32 %v6276_v43, %v6268_v38  ;;  %v8947_v43 = vld [vmem:[#allocation125_spill] sm:$0xff] }
 0x415   :  { %v6280_v51 = vpop.eup %6279  ;;  %v1965_v1 = vmul.f32 %v6278_v44, %v6272_v41  ;;  %v8945_v41 = vld [vmem:[#allocation95_spill] sm:$0xff]  ;;  %v8948_v44 = vld [vmem:[#allocation101_spill] sm:$0xff] }
 0x416   :  { %v6282_v4 = vpop.eup %6281  ;;  %v7504_v42 = vadd.f32 %v1964_v60, %v1962_v34  ;;  %v1956_v22 = vadd.f32 1.0, %v6280_v51  ;;  %v8943_v60 = vld [vmem:[#allocation86_spill] sm:$0xff]  ;;  %v8950_v51 = vld [vmem:[#allocation103_spill] sm:$0xff] }
 0x417   :  { %v7506_v61 = vadd.f32 %v1965_v1, %v1963_v35  ;;  %v1957_v39 = vadd.f32 1.0, %v6282_v4  ;;  %v8944_v1 = vld [vmem:[#allocation87_spill] sm:$0xff]  ;;  %v8949_v34 = vld [vmem:[#allocation126_spill] sm:$0xff]  ;;  %v8952_v4 = vld [vmem:[#allocation105_spill] sm:$0xff] }
 0x418   :  { %6283 = vtanh.f32 %v7504_v42  ;;  %v8951_v35 = vld [vmem:[#allocation127_spill] sm:$0xff] }
 0x419   :  { %6285 = vrcp.f32 %v1956_v22  ;;  %v8953_v22 = vld [vmem:[#allocation128_spill] sm:$0xff] }
 0x41a   :  { %6287 = vtanh.f32 %v7506_v61 }
 0x41b   :  { %6289 = vrcp.f32 %v1957_v39  ;;  %v8954_v39 = vld [vmem:[#allocation107_spill] sm:$0xff] }
 0x422   :  { %v6284_v5 = vpop.eup %6283 }
 0x423   :  { %v6286_v36 = vpop.eup %6285 }
 0x424   :  { %v6288_v27 = vpop.eup %6287  ;;  %v7510_v50 = vmul.f32 %v6286_v36, %v6284_v5  ;;  %v8955_v5 = vld [vmem:[#allocation129_spill] sm:$0xff] }
 0x425   :  { %v6290_v38 = vpop.eup %6289  ;;  %v8956_v36 = vld [vmem:[#allocation109_spill] sm:$0xff] }
 0x426   :  { %v1971_v30 = vmul.f32 %v6290_v38, %v6288_v27  ;;  %v8957_v27 = vld [vmem:[#allocation130_spill] sm:$0xff]  ;;  %v8958_v38 = vld [vmem:[#allocation111_spill] sm:$0xff] }
 0x428   :  { %2047 = vmatprep.mubr.f32.mxu0 %v1971_v30  ;;  %2118 = vmatprep.mubr.f32.mxu1 %v1971_v30 }
 0x429   :  { %2048 = vmatmul.mubr.f32.vlgmr.msra.gmra.mrb[6].mxu0 %v7510_v50  ;;  %2119 = vmatmul.mubr.f32.vlgmr.msra.gmra.mrb[14].mxu1 %v7510_v50 }
 0x42a   :  { %4880 = vmatpush1.bf16.msra.mxu0 %v8759_v45  ;;  %4944 = vmatpush1.bf16.msra.mxu1 %v8760_v52 }
 0x42b   :  { %2189 = vmatprep.mubr.f32.mxu0 %v1971_v30  ;;  %2260 = vmatprep.mubr.f32.mxu1 %v1971_v30  ;;  %v8959_v30 = vld [vmem:[#allocation131_spill] sm:$0xff] }
 0x42c   :  { %4882 = vmatprep.subr.bf16.mxu0 %v8761_v11  ;;  %4946 = vmatprep.subr.bf16.mxu1 %v8762_v62 }
 0x42e   :  { %4884 = vmatpush1.bf16.msra.mxu0 %v8763_v14  ;;  %4948 = vmatpush1.bf16.msra.mxu1 %v8764_v18 }
 0x42f   :  { %4886 = vmatprep.subr.bf16.mxu0 %v8851_v8  ;;  %4950 = vmatprep.subr.bf16.mxu1 %v8852_v37 }
 0x432   :  { %4888 = vmatpush1.bf16.msra.mxu0 %v8767_v15  ;;  %4952 = vmatpush1.bf16.msra.mxu1 %v8853_v10 }
 0x433   :  { %4890 = vmatprep.subr.bf16.mxu0 %v8769_v23  ;;  %4954 = vmatprep.subr.bf16.mxu1 %v8854_v9 }
 0x436   :  { %4892 = vmatpush1.bf16.msra.mxu0 %v8771_v7  ;;  %4956 = vmatpush1.bf16.msra.mxu1 %v8855_v58 }
 0x437   :  { %4894 = vmatprep.subr.bf16.mxu0 %v8773_v0  ;;  %4958 = vmatprep.subr.bf16.mxu1 %v8856_v29 }
 0x43a   :  { %4896 = vmatpush1.bf16.msra.mxu0 %v8775_v28  ;;  %4960 = vmatpush1.bf16.msra.mxu1 %v8857_v59 }
 0x43b   :  { %4898 = vmatprep.subr.bf16.mxu0 %v8777_v20  ;;  %4962 = vmatprep.subr.bf16.mxu1 %v8858_v13 }
 0x43e   :  { %4900 = vmatpush1.bf16.msra.mxu0 %v8778_v32  ;;  %4964 = vmatpush1.bf16.msra.mxu1 %v8859_v48 }
 0x43f   :  { %4902 = vmatprep.subr.bf16.mxu0 %v8779_v21  ;;  %4966 = vmatprep.subr.bf16.mxu1 %v8860_v54 }
 0x442   :  { %4904 = vmatpush1.bf16.msra.mxu0 %v8780_v55  ;;  %4968 = vmatpush1.bf16.msra.mxu1 %v8861_v33 }
 0x443   :  { %4906 = vmatprep.subr.bf16.mxu0 %v8781_v26  ;;  %4970 = vmatprep.subr.bf16.mxu1 %v8862_v46 }
 0x446   :  { %4908 = vmatpush1.bf16.msra.mxu0 %v8943_v60  ;;  %4972 = vmatpush1.bf16.msra.mxu1 %v8863_v53 }
 0x447   :  { %4910 = vmatprep.subr.bf16.mxu0 %v8944_v1  ;;  %4974 = vmatprep.subr.bf16.mxu1 %v8864_v31 }
 0x44a   :  { %4912 = vmatpush1.bf16.msra.mxu0 %v8784_v6  ;;  %4976 = vmatpush1.bf16.msra.mxu1 %v8865_v57 }
 0x44b   :  { %4914 = vmatprep.subr.bf16.mxu0 %v8785_v12  ;;  %4978 = vmatprep.subr.bf16.mxu1 %v8866_v47 }
 0x44e   :  { %4916 = vmatpush1.bf16.msra.mxu0 %v8786_v17  ;;  %4980 = vmatpush1.bf16.msra.mxu1 %v8867_v40 }
 0x44f   :  { %4918 = vmatprep.subr.bf16.mxu0 %v8945_v41  ;;  %4982 = vmatprep.subr.bf16.mxu1 %v8868_v19 }
 0x452   :  { %4920 = vmatpush1.bf16.msra.mxu0 %v8946_v24  ;;  %4984 = vmatpush1.bf16.msra.mxu1 %v8869_v3 }
 0x453   :  { %4922 = vmatprep.subr.bf16.mxu0 %v8789_v16  ;;  %4986 = vmatprep.subr.bf16.mxu1 %v8947_v43 }
 0x456   :  { %4924 = vmatpush1.bf16.msra.mxu0 %v8948_v44  ;;  %4988 = vmatpush1.bf16.msra.mxu1 %v8949_v34  ;;  %v8960_v34 = vld [vmem:[#allocation113_spill] sm:$0xff]  ;;  %v9032_v44 = vld [vmem:[#allocation143_spill] sm:$0xff] }
 0x457   :  { %4926 = vmatprep.subr.bf16.mxu0 %v8950_v51  ;;  %4990 = vmatprep.subr.bf16.mxu1 %v8951_v35  ;;  %v8961_v51 = vld [vmem:[#allocation132_spill] sm:$0xff]  ;;  %v8962_v35 = vld [vmem:[#allocation115_spill] sm:$0xff] }
 0x45a   :  { %4928 = vmatpush1.bf16.msra.mxu0 %v8952_v4  ;;  %4992 = vmatpush1.bf16.msra.mxu1 %v8953_v22  ;;  %v8963_v4 = vld [vmem:[#allocation133_spill] sm:$0xff] }
 0x45b   :  { %4930 = vmatprep.subr.bf16.mxu0 %v8954_v39  ;;  %4994 = vmatprep.subr.bf16.mxu1 %v8955_v5  ;;  %v8964_v22 = vld [vmem:[#allocation117_spill] sm:$0xff]  ;;  %v8965_v39 = vld [vmem:[#allocation134_spill] sm:$0xff]  ;;  %v8966_v5 = vld [vmem:[#allocation7_spill] sm:$0xff] }
 0x45e   :  { %4932 = vmatpush1.bf16.msra.mxu0 %v8956_v36  ;;  %4996 = vmatpush1.bf16.msra.mxu1 %v8957_v27  ;;  %v8967_v36 = vld [vmem:[#allocation10_spill] sm:$0xff] }
 0x45f   :  { %4934 = vmatprep.subr.bf16.mxu0 %v8958_v38  ;;  %4998 = vmatprep.subr.bf16.mxu1 %v8959_v30  ;;  %v8968_v30 = vld [vmem:[#allocation8_spill] sm:$0xff]  ;;  %v8977_v38 = vld [vmem:[#allocation34_spill] sm:$0xff] }
 0x462   :  { %4936 = vmatpush1.bf16.msra.mxu0 %v8960_v34  ;;  %5000 = vmatpush1.bf16.msra.mxu1 %v8961_v51  ;;  %v8969_v34 = vld [vmem:[#allocation26_spill] sm:$0xff]  ;;  %v8970_v51 = vld [vmem:[#allocation9_spill] sm:$0xff] }
 0x463   :  { %4938 = vmatprep.subr.bf16.mxu0 %v8962_v35  ;;  %5002 = vmatprep.subr.bf16.mxu1 %v8963_v4  ;;  %v8971_v35 = vld [vmem:[#allocation28_spill] sm:$0xff]  ;;  %v8972_v4 = vld [vmem:[#allocation11_spill] sm:$0xff] }
 0x466   :  { %4940 = vmatpush1.bf16.msra.mxu0 %v8964_v22  ;;  %5004 = vmatpush1.bf16.msra.mxu1 %v8965_v39  ;;  %v8973_v22 = vld [vmem:[#allocation30_spill] sm:$0xff]  ;;  %v8974_v39 = vld [vmem:[#allocation12_spill] sm:$0xff] }
 0x467   :  { %5006 = vmatprep.subr.bf16.mxu0 %v8966_v5  ;;  %5070 = vmatprep.subr.bf16.mxu1 %v8967_v36  ;;  %v8975_v5 = vld [vmem:[#allocation32_spill] sm:$0xff]  ;;  %v8976_v36 = vld [vmem:[#allocation13_spill] sm:$0xff] }
 0x469   :  { %2190 = vmatmul.mubr.f32.vlgmr.msra.gmra.mrb[14].mxu0 %v7510_v50  ;;  %2261 = vmatmul.mubr.f32.vlgmr.msra.gmra.mrb[30].mxu1 %v7510_v50  ;;  %v8978_v50 = vld [vmem:[#allocation14_spill] sm:$0xff] }
 0x46a   :  { %5008 = vmatpush1.bf16.msra.mxu0 %v8968_v30  ;;  %5072 = vmatpush1.bf16.msra.mxu1 %v8969_v34  ;;  %v8979_v30 = vld [vmem:[#allocation36_spill] sm:$0xff]  ;;  %v8980_v34 = vld [vmem:[#allocation15_spill] sm:$0xff] }
 0x46b   :  { %5010 = vmatprep.subr.bf16.mxu0 %v8970_v51  ;;  %5074 = vmatprep.subr.bf16.mxu1 %v8971_v35  ;;  %v8981_v51 = vld [vmem:[#allocation38_spill] sm:$0xff]  ;;  %v8982_v35 = vld [vmem:[#allocation16_spill] sm:$0xff] }
 0x46e   :  { %5012 = vmatpush1.bf16.msra.mxu0 %v8972_v4  ;;  %5076 = vmatpush1.bf16.msra.mxu1 %v8973_v22  ;;  %v8983_v4 = vld [vmem:[#allocation40_spill] sm:$0xff]  ;;  %v8984_v22 = vld [vmem:[#allocation17_spill] sm:$0xff] }
 0x46f   :  { %5014 = vmatprep.subr.bf16.mxu0 %v8974_v39  ;;  %5078 = vmatprep.subr.bf16.mxu1 %v8975_v5  ;;  %v8985_v39 = vld [vmem:[#allocation42_spill] sm:$0xff] }
 0x470   :  { %v8986_v5 = vld [vmem:[#allocation18_spill] sm:$0xff] }
 0x472   :  { %5016 = vmatpush1.bf16.msra.mxu0 %v8976_v36  ;;  %5080 = vmatpush1.bf16.msra.mxu1 %v8977_v38  ;;  %v8987_v36 = vld [vmem:[#allocation44_spill] sm:$0xff]  ;;  %v8988_v38 = vld [vmem:[#allocation19_spill] sm:$0xff] }
 0x473   :  { %5018 = vmatprep.subr.bf16.mxu0 %v8978_v50  ;;  %5082 = vmatprep.subr.bf16.mxu1 %v8979_v30  ;;  %v8989_v50 = vld [vmem:[#allocation46_spill] sm:$0xff]  ;;  %v8990_v30 = vld [vmem:[#allocation20_spill] sm:$0xff] }
 0x476   :  { %5020 = vmatpush1.bf16.msra.mxu0 %v8980_v34  ;;  %5084 = vmatpush1.bf16.msra.mxu1 %v8981_v51  ;;  %v8991_v34 = vld [vmem:[#allocation48_spill] sm:$0xff]  ;;  %v8992_v51 = vld [vmem:[#allocation21_spill] sm:$0xff] }
 0x477   :  { %5022 = vmatprep.subr.bf16.mxu0 %v8982_v35  ;;  %5086 = vmatprep.subr.bf16.mxu1 %v8983_v4  ;;  %v8993_v35 = vld [vmem:[#allocation50_spill] sm:$0xff] }
 0x478   :  { %v8994_v4 = vld [vmem:[#allocation22_spill] sm:$0xff] }
 0x47a   :  { %5024 = vmatpush1.bf16.msra.mxu0 %v8984_v22  ;;  %5088 = vmatpush1.bf16.msra.mxu1 %v8985_v39  ;;  %v8995_v22 = vld [vmem:[#allocation52_spill] sm:$0xff]  ;;  %v8996_v39 = vld [vmem:[#allocation23_spill] sm:$0xff] }
 0x47b   :  { %5026 = vmatprep.subr.bf16.mxu0 %v8986_v5  ;;  %5090 = vmatprep.subr.bf16.mxu1 %v8987_v36  ;;  %v8997_v5 = vld [vmem:[#allocation54_spill] sm:$0xff]  ;;  %v8998_v36 = vld [vmem:[#allocation24_spill] sm:$0xff] }
 0x47e   :  { %5028 = vmatpush1.bf16.msra.mxu0 %v8988_v38  ;;  %5092 = vmatpush1.bf16.msra.mxu1 %v8989_v50  ;;  %v8999_v38 = vld [vmem:[#allocation55_spill] sm:$0xff]  ;;  %v9000_v50 = vld [vmem:[#allocation25_spill] sm:$0xff] }
 0x47f   :  { %5030 = vmatprep.subr.bf16.mxu0 %v8990_v30  ;;  %5094 = vmatprep.subr.bf16.mxu1 %v8991_v34  ;;  %v9001_v30 = vld [vmem:[#allocation57_spill] sm:$0xff]  ;;  %v9002_v34 = vld [vmem:[#allocation27_spill] sm:$0xff] }
 0x482   :  { %5032 = vmatpush1.bf16.msra.mxu0 %v8992_v51  ;;  %5096 = vmatpush1.bf16.msra.mxu1 %v8993_v35  ;;  %v9003_v51 = vld [vmem:[#allocation59_spill] sm:$0xff]  ;;  %v9004_v35 = vld [vmem:[#allocation29_spill] sm:$0xff] }
 0x483   :  { %5034 = vmatprep.subr.bf16.mxu0 %v8994_v4  ;;  %5098 = vmatprep.subr.bf16.mxu1 %v8995_v22  ;;  %v9005_v4 = vld [vmem:[#allocation61_spill] sm:$0xff]  ;;  %v9006_v22 = vld [vmem:[#allocation31_spill] sm:$0xff] }
 0x486   :  { %5036 = vmatpush1.bf16.msra.mxu0 %v8996_v39  ;;  %5100 = vmatpush1.bf16.msra.mxu1 %v8997_v5  ;;  %v9007_v39 = vld [vmem:[#allocation63_spill] sm:$0xff]  ;;  %v9008_v5 = vld [vmem:[#allocation33_spill] sm:$0xff] }
 0x487   :  { %5038 = vmatprep.subr.bf16.mxu0 %v8998_v36  ;;  %5102 = vmatprep.subr.bf16.mxu1 %v8999_v38  ;;  %v9009_v36 = vld [vmem:[#allocation65_spill] sm:$0xff]  ;;  %v9010_v38 = vld [vmem:[#allocation35_spill] sm:$0xff] }
 0x48a   :  { %5040 = vmatpush1.bf16.msra.mxu0 %v9000_v50  ;;  %5104 = vmatpush1.bf16.msra.mxu1 %v9001_v30  ;;  %v9011_v50 = vld [vmem:[#allocation67_spill] sm:$0xff]  ;;  %v9012_v30 = vld [vmem:[#allocation37_spill] sm:$0xff] }
 0x48b   :  { %5042 = vmatprep.subr.bf16.mxu0 %v9002_v34  ;;  %5106 = vmatprep.subr.bf16.mxu1 %v9003_v51  ;;  %v9013_v34 = vld [vmem:[#allocation69_spill] sm:$0xff]  ;;  %v9014_v51 = vld [vmem:[#allocation39_spill] sm:$0xff] }
 0x48e   :  { %5044 = vmatpush1.bf16.msra.mxu0 %v9004_v35  ;;  %5108 = vmatpush1.bf16.msra.mxu1 %v9005_v4  ;;  %v9015_v35 = vld [vmem:[#allocation71_spill] sm:$0xff]  ;;  %v9016_v4 = vld [vmem:[#allocation41_spill] sm:$0xff] }
 0x48f   :  { %5046 = vmatprep.subr.bf16.mxu0 %v9006_v22  ;;  %5110 = vmatprep.subr.bf16.mxu1 %v9007_v39  ;;  %v9017_v22 = vld [vmem:[#allocation73_spill] sm:$0xff]  ;;  %v9018_v39 = vld [vmem:[#allocation43_spill] sm:$0xff] }
 0x492   :  { %5048 = vmatpush1.bf16.msra.mxu0 %v9008_v5  ;;  %5112 = vmatpush1.bf16.msra.mxu1 %v9009_v36  ;;  %v9019_v5 = vld [vmem:[#allocation75_spill] sm:$0xff]  ;;  %v9020_v36 = vld [vmem:[#allocation45_spill] sm:$0xff] }
 0x493   :  { %5050 = vmatprep.subr.bf16.mxu0 %v9010_v38  ;;  %5114 = vmatprep.subr.bf16.mxu1 %v9011_v50  ;;  %v9021_v38 = vld [vmem:[#allocation77_spill] sm:$0xff]  ;;  %v9022_v50 = vld [vmem:[#allocation47_spill] sm:$0xff] }
 0x496   :  { %5052 = vmatpush1.bf16.msra.mxu0 %v9012_v30  ;;  %5116 = vmatpush1.bf16.msra.mxu1 %v9013_v34  ;;  %v9023_v30 = vld [vmem:[#allocation79_spill] sm:$0xff]  ;;  %v9024_v34 = vld [vmem:[#allocation49_spill] sm:$0xff] }
 0x497   :  { %5054 = vmatprep.subr.bf16.mxu0 %v9014_v51  ;;  %5118 = vmatprep.subr.bf16.mxu1 %v9015_v35  ;;  %v9025_v51 = vld [vmem:[#allocation81_spill] sm:$0xff]  ;;  %v9026_v35 = vld [vmem:[#allocation51_spill] sm:$0xff] }
 0x49a   :  { %5056 = vmatpush1.bf16.msra.mxu0 %v9016_v4  ;;  %5120 = vmatpush1.bf16.msra.mxu1 %v9017_v22  ;;  %v9027_v4 = vld [vmem:[#allocation83_spill] sm:$0xff]  ;;  %v9028_v22 = vld [vmem:[#allocation53_spill] sm:$0xff] }
 0x49b   :  { %5058 = vmatprep.subr.bf16.mxu0 %v9018_v39  ;;  %5122 = vmatprep.subr.bf16.mxu1 %v9019_v5  ;;  %v9029_v39 = vld [vmem:[#allocation85_spill] sm:$0xff]  ;;  %v9030_v5 = vld [vmem:[#allocation56_spill] sm:$0xff] }
 0x49e   :  { %5060 = vmatpush1.bf16.msra.mxu0 %v9020_v36  ;;  %5124 = vmatpush1.bf16.msra.mxu1 %v9021_v38  ;;  %v9031_v36 = vld [vmem:[#allocation88_spill] sm:$0xff] }
 0x49f   :  { %5062 = vmatprep.subr.bf16.mxu0 %v9022_v50  ;;  %5126 = vmatprep.subr.bf16.mxu1 %v9023_v30 }
 0x4a2   :  { %5064 = vmatpush1.bf16.msra.mxu0 %v9024_v34  ;;  %5128 = vmatpush1.bf16.msra.mxu1 %v9025_v51 }
 0x4a3   :  { %5066 = vmatprep.subr.bf16.mxu0 %v9026_v35  ;;  %5130 = vmatprep.subr.bf16.mxu1 %v9027_v4 }
 0x4a6   :  { %5068 = vmatpush1.bf16.msra.mxu0 %v9028_v22  ;;  %5132 = vmatpush1.bf16.msra.mxu1 %v9029_v39 }
 0x4a7   :  { %5134 = vmatprep.subr.bf16.mxu0 %v9030_v5  ;;  %5198 = vmatprep.subr.bf16.mxu1 %v9031_v36 }
 0x4fc   :  { %v2049_v38 = vpop.f32.mrb[6].mxu0  ;;  %v2120_v50 = vpop.f32.mrb[14].mxu1 }
 0x4fd   :  { %v2051_v27 = vpop.f32.mrb[7].mxu0  ;;  %v2122_v30 = vpop.f32.mrb[15].mxu1  ;;  %v6069_v34 = vadd.f32 %v2049_v38, %v9032_v44  ;;  %v6093_v51 = vadd.f32 %v2120_v50, %v7182_v56 }
 0x4fe   :  { %v6070_v35 = vadd.f32 %v2051_v27, %v8847_v49  ;;  %v6094_v4 = vadd.f32 %v2122_v30, %v8848_v63 }
 0x4ff   :  { %v3914_v43 = vmul.f32 -1.442695, %v6069_v34  ;;  %v3916_v22 = vmul.f32 -1.442695, %v6093_v51  ;;  %v9033_v51 = vld [vmem:[#allocation148_spill] sm:$0xff] }
 0x500   :  { %v3915_v16 = vmul.f32 -1.442695, %v6070_v35  ;;  %v3917_v39 = vmul.f32 -1.442695, %v6094_v4  ;;  %v9034_v4 = vld [vmem:[#allocation147_spill] sm:$0xff] }
 0x501   :  { %6291 = vpow2.f32 %v3914_v43 }
 0x502   :  { %6293 = vpow2.f32 %v3916_v22 }
 0x503   :  { %6295 = vpow2.f32 %v3915_v16 }
 0x504   :  { %6297 = vpow2.f32 %v3917_v39 }
 0x50b   :  { %v6292_v36 = vpop.eup %6291 }
 0x50c   :  { %v6294_v5 = vpop.eup %6293  ;;  %v2281_v19 = vadd.f32 1.0, %v6292_v36 }
 0x50d   :  { %v6296_v3 = vpop.eup %6295  ;;  %v2293_v38 = vadd.f32 1.0, %v6294_v5 }
 0x50e   :  { %v6298_v24 = vpop.eup %6297  ;;  %v2282_v44 = vadd.f32 1.0, %v6296_v3  ;;  %6299 = vrcp.f32 %v2281_v19 }
 0x50f   :  { %v2294_v50 = vadd.f32 1.0, %v6298_v24  ;;  %6301 = vrcp.f32 %v2293_v38 }
 0x510   :  { %6303 = vrcp.f32 %v2282_v44 }
 0x511   :  { %6305 = vrcp.f32 %v2294_v50 }
 0x518   :  { %v6300_v19 = vpop.eup %6299 }
 0x519   :  { %v6302_v24 = vpop.eup %6301 }
 0x51a   :  { %v6304_v44 = vpop.eup %6303 }
 0x51b   :  { %v6306_v36 = vpop.eup %6305 }
 0x53c   :  { %v2191_v27 = vpop.f32.mrb[14].mxu0  ;;  %v2262_v30 = vpop.f32.mrb[30].mxu1 }
 0x53d   :  { %v6109_v34 = vadd.f32 %v2191_v27, %v8849_v25  ;;  %v6125_v43 = vadd.f32 %v2262_v30, %v9033_v51  ;;  %v2193_v35 = vpop.f32.mrb[15].mxu0  ;;  %v2264_v16 = vpop.f32.mrb[31].mxu1  ;;  %v2313_v30 = vmul.f32 %v6302_v24, %v7504_v42 }
 0x53e   :  { %v6110_v22 = vadd.f32 %v2193_v35, %v9034_v4  ;;  %v6126_v39 = vadd.f32 %v2264_v16, %v7204_v2  ;;  %v2314_v35 = vmul.f32 %v6306_v36, %v7506_v61  ;;  %v9038_v36 = vld [vmem:[#allocation99_spill] sm:$0xff] }
 0x53f   :  { %6307 = vtanh.f32 %v6109_v34  ;;  %v3918_v5 = vmul.f32 -1.442695, %v6125_v43 }
 0x540   :  { %6309 = vtanh.f32 %v6110_v22  ;;  %v3919_v3 = vmul.f32 -1.442695, %v6126_v39 }
 0x541   :  { %6311 = vpow2.f32 %v3918_v5 }
 0x542   :  { %6313 = vpow2.f32 %v3919_v3 }
 0x549   :  { %v6308_v38 = vpop.eup %6307 }
 0x54a   :  { %v6310_v27 = vpop.eup %6309  ;;  %v2315_v51 = vmul.f32 %v6308_v38, %v6300_v19  ;;  %v9039_v38 = vld [vmem:[#allocation125_spill] sm:$0xff] }
 0x54b   :  { %v6312_v50 = vpop.eup %6311  ;;  %v2316_v4 = vmul.f32 %v6310_v27, %v6304_v44  ;;  %v9037_v44 = vld [vmem:[#allocation124_spill] sm:$0xff]  ;;  %v9040_v27 = vld [vmem:[#allocation101_spill] sm:$0xff] }
 0x54c   :  { %v6314_v16 = vpop.eup %6313  ;;  %v7654_v34 = vadd.f32 %v2315_v51, %v2313_v30  ;;  %v2307_v43 = vadd.f32 1.0, %v6312_v50  ;;  %v9035_v51 = vld [vmem:[#allocation123_spill] sm:$0xff]  ;;  %v9041_v30 = vld [vmem:[#allocation126_spill] sm:$0xff] }
 0x54d   :  { %v7656_v22 = vadd.f32 %v2316_v4, %v2314_v35  ;;  %v2308_v39 = vadd.f32 1.0, %v6314_v16  ;;  %v9036_v4 = vld [vmem:[#allocation97_spill] sm:$0xff]  ;;  %v9042_v50 = vld [vmem:[#allocation103_spill] sm:$0xff] }
 0x54e   :  { %6315 = vtanh.f32 %v7654_v34  ;;  %v9043_v35 = vld [vmem:[#allocation127_spill] sm:$0xff]  ;;  %v9044_v16 = vld [vmem:[#allocation105_spill] sm:$0xff] }
 0x54f   :  { %6317 = vrcp.f32 %v2307_v43  ;;  %v9045_v43 = vld [vmem:[#allocation128_spill] sm:$0xff] }
 0x550   :  { %6319 = vtanh.f32 %v7656_v22 }
 0x551   :  { %6321 = vrcp.f32 %v2308_v39  ;;  %v9046_v39 = vld [vmem:[#allocation107_spill] sm:$0xff] }
 0x558   :  { %v6316_v5 = vpop.eup %6315 }
 0x559   :  { %v6318_v42 = vpop.eup %6317 }
 0x55a   :  { %v6320_v3 = vpop.eup %6319  ;;  %v7660_v61 = vmul.f32 %v6318_v42, %v6316_v5  ;;  %v9047_v5 = vld [vmem:[#allocation129_spill] sm:$0xff] }
 0x55b   :  { %v6322_v19 = vpop.eup %6321  ;;  %v9048_v42 = vld [vmem:[#allocation109_spill] sm:$0xff] }
 0x55c   :  { %v2322_v24 = vmul.f32 %v6322_v19, %v6320_v3  ;;  %v9049_v3 = vld [vmem:[#allocation130_spill] sm:$0xff]  ;;  %v9050_v19 = vld [vmem:[#allocation111_spill] sm:$0xff] }
 0x55e   :  { %2398 = vmatprep.mubr.f32.mxu0 %v2322_v24  ;;  %2469 = vmatprep.mubr.f32.mxu1 %v2322_v24 }
 0x55f   :  { %2399 = vmatmul.mubr.f32.vlgmr.msra.gmra.mrb[24].mxu0 %v7660_v61  ;;  %2470 = vmatmul.mubr.f32.vlgmr.msra.gmra.mrb[16].mxu1 %v7660_v61 }
 0x560   :  { %5136 = vmatpush1.bf16.msra.mxu0 %v8759_v45  ;;  %5200 = vmatpush1.bf16.msra.mxu1 %v8760_v52 }
 0x561   :  { %2540 = vmatprep.mubr.f32.mxu0 %v2322_v24  ;;  %2611 = vmatprep.mubr.f32.mxu1 %v2322_v24  ;;  %v9051_v24 = vld [vmem:[#allocation131_spill] sm:$0xff] }
 0x562   :  { %5138 = vmatprep.subr.bf16.mxu0 %v8761_v11  ;;  %5202 = vmatprep.subr.bf16.mxu1 %v8762_v62 }
 0x564   :  { %5140 = vmatpush1.bf16.msra.mxu0 %v8763_v14  ;;  %5204 = vmatpush1.bf16.msra.mxu1 %v8764_v18 }
 0x565   :  { %5142 = vmatprep.subr.bf16.mxu0 %v8851_v8  ;;  %5206 = vmatprep.subr.bf16.mxu1 %v8852_v37 }
 0x568   :  { %5144 = vmatpush1.bf16.msra.mxu0 %v8767_v15  ;;  %5208 = vmatpush1.bf16.msra.mxu1 %v8853_v10 }
 0x569   :  { %5146 = vmatprep.subr.bf16.mxu0 %v8769_v23  ;;  %5210 = vmatprep.subr.bf16.mxu1 %v8854_v9 }
 0x56c   :  { %5148 = vmatpush1.bf16.msra.mxu0 %v8771_v7  ;;  %5212 = vmatpush1.bf16.msra.mxu1 %v8855_v58 }
 0x56d   :  { %5150 = vmatprep.subr.bf16.mxu0 %v8773_v0  ;;  %5214 = vmatprep.subr.bf16.mxu1 %v8856_v29 }
 0x570   :  { %5152 = vmatpush1.bf16.msra.mxu0 %v8775_v28  ;;  %5216 = vmatpush1.bf16.msra.mxu1 %v8857_v59 }
 0x571   :  { %5154 = vmatprep.subr.bf16.mxu0 %v8777_v20  ;;  %5218 = vmatprep.subr.bf16.mxu1 %v8858_v13 }
 0x574   :  { %5156 = vmatpush1.bf16.msra.mxu0 %v8778_v32  ;;  %5220 = vmatpush1.bf16.msra.mxu1 %v8859_v48 }
 0x575   :  { %5158 = vmatprep.subr.bf16.mxu0 %v8779_v21  ;;  %5222 = vmatprep.subr.bf16.mxu1 %v8860_v54 }
 0x578   :  { %5160 = vmatpush1.bf16.msra.mxu0 %v8780_v55  ;;  %5224 = vmatpush1.bf16.msra.mxu1 %v8861_v33 }
 0x579   :  { %5162 = vmatprep.subr.bf16.mxu0 %v8781_v26  ;;  %5226 = vmatprep.subr.bf16.mxu1 %v8862_v46 }
 0x57c   :  { %5164 = vmatpush1.bf16.msra.mxu0 %v8943_v60  ;;  %5228 = vmatpush1.bf16.msra.mxu1 %v8863_v53 }
 0x57d   :  { %5166 = vmatprep.subr.bf16.mxu0 %v8944_v1  ;;  %5230 = vmatprep.subr.bf16.mxu1 %v8864_v31 }
 0x580   :  { %5168 = vmatpush1.bf16.msra.mxu0 %v8784_v6  ;;  %5232 = vmatpush1.bf16.msra.mxu1 %v8865_v57 }
 0x581   :  { %5170 = vmatprep.subr.bf16.mxu0 %v8785_v12  ;;  %5234 = vmatprep.subr.bf16.mxu1 %v8866_v47 }
 0x584   :  { %5172 = vmatpush1.bf16.msra.mxu0 %v8786_v17  ;;  %5236 = vmatpush1.bf16.msra.mxu1 %v8867_v40 }
 0x585   :  { %5174 = vmatprep.subr.bf16.mxu0 %v8945_v41  ;;  %5238 = vmatprep.subr.bf16.mxu1 %v9035_v51 }
 0x588   :  { %5176 = vmatpush1.bf16.msra.mxu0 %v9036_v4  ;;  %5240 = vmatpush1.bf16.msra.mxu1 %v9037_v44 }
 0x589   :  { %5178 = vmatprep.subr.bf16.mxu0 %v9038_v36  ;;  %5242 = vmatprep.subr.bf16.mxu1 %v9039_v38 }
 0x58c   :  { %5180 = vmatpush1.bf16.msra.mxu0 %v9040_v27  ;;  %5244 = vmatpush1.bf16.msra.mxu1 %v9041_v30  ;;  %v9052_v30 = vld [vmem:[#allocation113_spill] sm:$0xff] }
 0x58d   :  { %5182 = vmatprep.subr.bf16.mxu0 %v9042_v50  ;;  %5246 = vmatprep.subr.bf16.mxu1 %v9043_v35  ;;  %v9053_v50 = vld [vmem:[#allocation132_spill] sm:$0xff]  ;;  %v9054_v35 = vld [vmem:[#allocation115_spill] sm:$0xff] }
 0x590   :  { %5184 = vmatpush1.bf16.msra.mxu0 %v9044_v16  ;;  %5248 = vmatpush1.bf16.msra.mxu1 %v9045_v43  ;;  %v9055_v16 = vld [vmem:[#allocation133_spill] sm:$0xff] }
 0x591   :  { %5186 = vmatprep.subr.bf16.mxu0 %v9046_v39  ;;  %5250 = vmatprep.subr.bf16.mxu1 %v9047_v5  ;;  %v9056_v43 = vld [vmem:[#allocation117_spill] sm:$0xff]  ;;  %v9057_v39 = vld [vmem:[#allocation134_spill] sm:$0xff]  ;;  %v9058_v5 = vld [vmem:[#allocation7_spill] sm:$0xff] }
 0x594   :  { %5188 = vmatpush1.bf16.msra.mxu0 %v9048_v42  ;;  %5252 = vmatpush1.bf16.msra.mxu1 %v9049_v3  ;;  %v9059_v42 = vld [vmem:[#allocation10_spill] sm:$0xff] }
 0x595   :  { %5190 = vmatprep.subr.bf16.mxu0 %v9050_v19  ;;  %5254 = vmatprep.subr.bf16.mxu1 %v9051_v24  ;;  %v9060_v24 = vld [vmem:[#allocation8_spill] sm:$0xff]  ;;  %v9069_v19 = vld [vmem:[#allocation34_spill] sm:$0xff] }
 0x598   :  { %5192 = vmatpush1.bf16.msra.mxu0 %v9052_v30  ;;  %5256 = vmatpush1.bf16.msra.mxu1 %v9053_v50  ;;  %v9061_v30 = vld [vmem:[#allocation26_spill] sm:$0xff]  ;;  %v9062_v50 = vld [vmem:[#allocation9_spill] sm:$0xff] }
 0x599   :  { %5194 = vmatprep.subr.bf16.mxu0 %v9054_v35  ;;  %5258 = vmatprep.subr.bf16.mxu1 %v9055_v16  ;;  %v9063_v35 = vld [vmem:[#allocation28_spill] sm:$0xff]  ;;  %v9064_v16 = vld [vmem:[#allocation11_spill] sm:$0xff] }
 0x59c   :  { %5196 = vmatpush1.bf16.msra.mxu0 %v9056_v43  ;;  %5260 = vmatpush1.bf16.msra.mxu1 %v9057_v39  ;;  %v9065_v43 = vld [vmem:[#allocation30_spill] sm:$0xff]  ;;  %v9066_v39 = vld [vmem:[#allocation12_spill] sm:$0xff] }
 0x59d   :  { %5262 = vmatprep.subr.bf16.mxu0 %v9058_v5  ;;  %5326 = vmatprep.subr.bf16.mxu1 %v9059_v42  ;;  %v9067_v5 = vld [vmem:[#allocation32_spill] sm:$0xff]  ;;  %v9068_v42 = vld [vmem:[#allocation13_spill] sm:$0xff] }
 0x59f   :  { %2541 = vmatmul.mubr.f32.vlgmr.msra.gmra.mrb[16].mxu0 %v7660_v61  ;;  %2612 = vmatmul.mubr.f32.vlgmr.msra.gmra.mrb[32].mxu1 %v7660_v61  ;;  %v9070_v61 = vld [vmem:[#allocation14_spill] sm:$0xff] }
 0x5a0   :  { %5264 = vmatpush1.bf16.msra.mxu0 %v9060_v24  ;;  %5328 = vmatpush1.bf16.msra.mxu1 %v9061_v30  ;;  %v9071_v24 = vld [vmem:[#allocation36_spill] sm:$0xff]  ;;  %v9072_v30 = vld [vmem:[#allocation15_spill] sm:$0xff] }
 0x5a1   :  { %5266 = vmatprep.subr.bf16.mxu0 %v9062_v50  ;;  %5330 = vmatprep.subr.bf16.mxu1 %v9063_v35  ;;  %v9073_v50 = vld [vmem:[#allocation38_spill] sm:$0xff]  ;;  %v9074_v35 = vld [vmem:[#allocation16_spill] sm:$0xff] }
 0x5a4   :  { %5268 = vmatpush1.bf16.msra.mxu0 %v9064_v16  ;;  %5332 = vmatpush1.bf16.msra.mxu1 %v9065_v43  ;;  %v9075_v16 = vld [vmem:[#allocation40_spill] sm:$0xff]  ;;  %v9076_v43 = vld [vmem:[#allocation17_spill] sm:$0xff] }
 0x5a5   :  { %5270 = vmatprep.subr.bf16.mxu0 %v9066_v39  ;;  %5334 = vmatprep.subr.bf16.mxu1 %v9067_v5  ;;  %v9077_v39 = vld [vmem:[#allocation42_spill] sm:$0xff] }
 0x5a6   :  { %v9078_v5 = vld [vmem:[#allocation18_spill] sm:$0xff] }
 0x5a8   :  { %5272 = vmatpush1.bf16.msra.mxu0 %v9068_v42  ;;  %5336 = vmatpush1.bf16.msra.mxu1 %v9069_v19  ;;  %v9079_v42 = vld [vmem:[#allocation44_spill] sm:$0xff]  ;;  %v9080_v19 = vld [vmem:[#allocation19_spill] sm:$0xff] }
 0x5a9   :  { %5274 = vmatprep.subr.bf16.mxu0 %v9070_v61  ;;  %5338 = vmatprep.subr.bf16.mxu1 %v9071_v24  ;;  %v9081_v61 = vld [vmem:[#allocation46_spill] sm:$0xff]  ;;  %v9082_v24 = vld [vmem:[#allocation20_spill] sm:$0xff] }
 0x5ac   :  { %5276 = vmatpush1.bf16.msra.mxu0 %v9072_v30  ;;  %5340 = vmatpush1.bf16.msra.mxu1 %v9073_v50  ;;  %v9083_v30 = vld [vmem:[#allocation48_spill] sm:$0xff]  ;;  %v9084_v50 = vld [vmem:[#allocation21_spill] sm:$0xff] }
 0x5ad   :  { %5278 = vmatprep.subr.bf16.mxu0 %v9074_v35  ;;  %5342 = vmatprep.subr.bf16.mxu1 %v9075_v16  ;;  %v9085_v35 = vld [vmem:[#allocation50_spill] sm:$0xff] }
 0x5ae   :  { %v9086_v16 = vld [vmem:[#allocation22_spill] sm:$0xff] }
 0x5b0   :  { %5280 = vmatpush1.bf16.msra.mxu0 %v9076_v43  ;;  %5344 = vmatpush1.bf16.msra.mxu1 %v9077_v39  ;;  %v9087_v43 = vld [vmem:[#allocation52_spill] sm:$0xff]  ;;  %v9088_v39 = vld [vmem:[#allocation23_spill] sm:$0xff] }
 0x5b1   :  { %5282 = vmatprep.subr.bf16.mxu0 %v9078_v5  ;;  %5346 = vmatprep.subr.bf16.mxu1 %v9079_v42  ;;  %v9089_v5 = vld [vmem:[#allocation54_spill] sm:$0xff]  ;;  %v9090_v42 = vld [vmem:[#allocation24_spill] sm:$0xff] }
 0x5b4   :  { %5284 = vmatpush1.bf16.msra.mxu0 %v9080_v19  ;;  %5348 = vmatpush1.bf16.msra.mxu1 %v9081_v61  ;;  %v9091_v19 = vld [vmem:[#allocation55_spill] sm:$0xff]  ;;  %v9092_v61 = vld [vmem:[#allocation25_spill] sm:$0xff] }
 0x5b5   :  { %5286 = vmatprep.subr.bf16.mxu0 %v9082_v24  ;;  %5350 = vmatprep.subr.bf16.mxu1 %v9083_v30  ;;  %v9093_v24 = vld [vmem:[#allocation57_spill] sm:$0xff]  ;;  %v9094_v30 = vld [vmem:[#allocation27_spill] sm:$0xff] }
 0x5b8   :  { %5288 = vmatpush1.bf16.msra.mxu0 %v9084_v50  ;;  %5352 = vmatpush1.bf16.msra.mxu1 %v9085_v35  ;;  %v9095_v50 = vld [vmem:[#allocation59_spill] sm:$0xff]  ;;  %v9096_v35 = vld [vmem:[#allocation29_spill] sm:$0xff] }
 0x5b9   :  { %5290 = vmatprep.subr.bf16.mxu0 %v9086_v16  ;;  %5354 = vmatprep.subr.bf16.mxu1 %v9087_v43  ;;  %v9097_v16 = vld [vmem:[#allocation61_spill] sm:$0xff]  ;;  %v9098_v43 = vld [vmem:[#allocation31_spill] sm:$0xff] }
 0x5bc   :  { %5292 = vmatpush1.bf16.msra.mxu0 %v9088_v39  ;;  %5356 = vmatpush1.bf16.msra.mxu1 %v9089_v5  ;;  %v9099_v39 = vld [vmem:[#allocation63_spill] sm:$0xff]  ;;  %v9100_v5 = vld [vmem:[#allocation33_spill] sm:$0xff] }
 0x5bd   :  { %5294 = vmatprep.subr.bf16.mxu0 %v9090_v42  ;;  %5358 = vmatprep.subr.bf16.mxu1 %v9091_v19  ;;  %v9101_v42 = vld [vmem:[#allocation65_spill] sm:$0xff]  ;;  %v9102_v19 = vld [vmem:[#allocation35_spill] sm:$0xff] }
 0x5c0   :  { %5296 = vmatpush1.bf16.msra.mxu0 %v9092_v61  ;;  %5360 = vmatpush1.bf16.msra.mxu1 %v9093_v24  ;;  %v9103_v61 = vld [vmem:[#allocation67_spill] sm:$0xff]  ;;  %v9104_v24 = vld [vmem:[#allocation37_spill] sm:$0xff] }
 0x5c1   :  { %5298 = vmatprep.subr.bf16.mxu0 %v9094_v30  ;;  %5362 = vmatprep.subr.bf16.mxu1 %v9095_v50  ;;  %v9105_v30 = vld [vmem:[#allocation69_spill] sm:$0xff]  ;;  %v9106_v50 = vld [vmem:[#allocation39_spill] sm:$0xff] }
 0x5c4   :  { %5300 = vmatpush1.bf16.msra.mxu0 %v9096_v35  ;;  %5364 = vmatpush1.bf16.msra.mxu1 %v9097_v16  ;;  %v9107_v35 = vld [vmem:[#allocation71_spill] sm:$0xff]  ;;  %v9108_v16 = vld [vmem:[#allocation41_spill] sm:$0xff] }
 0x5c5   :  { %5302 = vmatprep.subr.bf16.mxu0 %v9098_v43  ;;  %5366 = vmatprep.subr.bf16.mxu1 %v9099_v39  ;;  %v9109_v43 = vld [vmem:[#allocation73_spill] sm:$0xff]  ;;  %v9110_v39 = vld [vmem:[#allocation43_spill] sm:$0xff] }
 0x5c8   :  { %5304 = vmatpush1.bf16.msra.mxu0 %v9100_v5  ;;  %5368 = vmatpush1.bf16.msra.mxu1 %v9101_v42  ;;  %v9111_v5 = vld [vmem:[#allocation75_spill] sm:$0xff]  ;;  %v9112_v42 = vld [vmem:[#allocation45_spill] sm:$0xff] }
 0x5c9   :  { %5306 = vmatprep.subr.bf16.mxu0 %v9102_v19  ;;  %5370 = vmatprep.subr.bf16.mxu1 %v9103_v61  ;;  %v9113_v19 = vld [vmem:[#allocation77_spill] sm:$0xff]  ;;  %v9114_v61 = vld [vmem:[#allocation47_spill] sm:$0xff] }
 0x5cc   :  { %5308 = vmatpush1.bf16.msra.mxu0 %v9104_v24  ;;  %5372 = vmatpush1.bf16.msra.mxu1 %v9105_v30  ;;  %v9115_v24 = vld [vmem:[#allocation79_spill] sm:$0xff]  ;;  %v9116_v30 = vld [vmem:[#allocation49_spill] sm:$0xff] }
 0x5cd   :  { %5310 = vmatprep.subr.bf16.mxu0 %v9106_v50  ;;  %5374 = vmatprep.subr.bf16.mxu1 %v9107_v35  ;;  %v9117_v50 = vld [vmem:[#allocation81_spill] sm:$0xff]  ;;  %v9118_v35 = vld [vmem:[#allocation51_spill] sm:$0xff] }
 0x5d0   :  { %5312 = vmatpush1.bf16.msra.mxu0 %v9108_v16  ;;  %5376 = vmatpush1.bf16.msra.mxu1 %v9109_v43  ;;  %v9119_v16 = vld [vmem:[#allocation83_spill] sm:$0xff]  ;;  %v9120_v43 = vld [vmem:[#allocation53_spill] sm:$0xff] }
 0x5d1   :  { %5314 = vmatprep.subr.bf16.mxu0 %v9110_v39  ;;  %5378 = vmatprep.subr.bf16.mxu1 %v9111_v5  ;;  %v9121_v39 = vld [vmem:[#allocation85_spill] sm:$0xff]  ;;  %v9122_v5 = vld [vmem:[#allocation56_spill] sm:$0xff] }
 0x5d4   :  { %5316 = vmatpush1.bf16.msra.mxu0 %v9112_v42  ;;  %5380 = vmatpush1.bf16.msra.mxu1 %v9113_v19  ;;  %v9123_v42 = vld [vmem:[#allocation88_spill] sm:$0xff]  ;;  %v9124_v19 = vld [vmem:[#allocation143_spill] sm:$0xff] }
 0x5d5   :  { %5318 = vmatprep.subr.bf16.mxu0 %v9114_v61  ;;  %5382 = vmatprep.subr.bf16.mxu1 %v9115_v24  ;;  %v9125_v61 = vld [vmem:[#allocation135_spill] sm:$0xff]  ;;  %v9126_v24 = vld [vmem:[#allocation136_spill] sm:$0xff] }
 0x5d6   :  { %v238_v3 = vadd.f32 %v9125_v61, %v9124_v19 }
 0x5d8   :  { %5320 = vmatpush1.bf16.msra.mxu0 %v9116_v30  ;;  %5384 = vmatpush1.bf16.msra.mxu1 %v9117_v50  ;;  %v240_v30 = vadd.f32 %v9126_v24, %v8847_v49 }
 0x5d9   :  { %5322 = vmatprep.subr.bf16.mxu0 %v9118_v35  ;;  %5386 = vmatprep.subr.bf16.mxu1 %v9119_v16 }
 0x5dc   :  { %5324 = vmatpush1.bf16.msra.mxu0 %v9120_v43  ;;  %5388 = vmatpush1.bf16.msra.mxu1 %v9121_v39 }
 0x5dd   :  { %5390 = vmatprep.subr.bf16.mxu0 %v9122_v5  ;;  %5454 = vmatprep.subr.bf16.mxu1 %v9123_v42 }
 0x632   :  { %v2400_v27 = vpop.f32.mrb[24].mxu0  ;;  %v2471_v50 = vpop.f32.mrb[16].mxu1 }
 0x633   :  { %v2618_v38 = vadd.f32 %v2400_v27, %v238_v3  ;;  %v2402_v35 = vpop.f32.mrb[25].mxu0  ;;  %v2473_v36 = vpop.f32.mrb[17].mxu1  ;;  %v6095_v43 = vadd.f32 %v2471_v50, %v7182_v56 }
 0x634   :  { %v2619_v16 = vadd.f32 %v2402_v35, %v240_v30  ;;  %v6096_v39 = vadd.f32 %v2473_v36, %v8848_v63  ;;  %v9127_v35 = vld [vmem:[#allocation148_spill] sm:$0xff] }
 0x635   :  { %v3920_v44 = vmul.f32 -1.442695, %v2618_v38  ;;  %v3922_v5 = vmul.f32 -1.442695, %v6095_v43  ;;  %v9128_v43 = vld [vmem:[#allocation147_spill] sm:$0xff] }
 0x636   :  { %v3921_v4 = vmul.f32 -1.442695, %v2619_v16  ;;  %v3923_v42 = vmul.f32 -1.442695, %v6096_v39 }
 0x637   :  { %6323 = vpow2.f32 %v3920_v44 }
 0x638   :  { %6325 = vpow2.f32 %v3922_v5 }
 0x639   :  { %6327 = vpow2.f32 %v3921_v4 }
 0x63a   :  { %6329 = vpow2.f32 %v3923_v42 }
 0x641   :  { %v6324_v61 = vpop.eup %6323 }
 0x642   :  { %v6326_v24 = vpop.eup %6325  ;;  %v2632_v27 = vadd.f32 1.0, %v6324_v61 }
 0x643   :  { %v6328_v49 = vpop.eup %6327  ;;  %v2644_v3 = vadd.f32 1.0, %v6326_v24 }
 0x644   :  { %v6330_v19 = vpop.eup %6329  ;;  %v2633_v51 = vadd.f32 1.0, %v6328_v49  ;;  %6331 = vrcp.f32 %v2632_v27 }
 0x645   :  { %v2645_v30 = vadd.f32 1.0, %v6330_v19  ;;  %6333 = vrcp.f32 %v2644_v3 }
 0x646   :  { %6335 = vrcp.f32 %v2633_v51 }
 0x647   :  { %6337 = vrcp.f32 %v2645_v30 }
 0x64e   :  { %v6332_v19 = vpop.eup %6331 }
 0x64f   :  { %v6334_v61 = vpop.eup %6333 }
 0x650   :  { %v6336_v51 = vpop.eup %6335 }
 0x651   :  { %v6338_v24 = vpop.eup %6337 }
 0x672   :  { %v2542_v50 = vpop.f32.mrb[16].mxu0  ;;  %v2613_v36 = vpop.f32.mrb[32].mxu1 }
 0x673   :  { %v6111_v38 = vadd.f32 %v2542_v50, %v8849_v25  ;;  %v6127_v44 = vadd.f32 %v2613_v36, %v9127_v35  ;;  %v2544_v16 = vpop.f32.mrb[17].mxu0  ;;  %v2615_v4 = vpop.f32.mrb[33].mxu1  ;;  %v2664_v50 = vmul.f32 %v6334_v61, %v7654_v34 }
 0x674   :  { %v6112_v39 = vadd.f32 %v2544_v16, %v9128_v43  ;;  %v6128_v5 = vadd.f32 %v2615_v4, %v7204_v2  ;;  %v2665_v16 = vmul.f32 %v6338_v24, %v7656_v22  ;;  %v9131_v24 = vld [vmem:[#allocation124_spill] sm:$0xff] }
 0x675   :  { %6339 = vtanh.f32 %v6111_v38  ;;  %v3924_v42 = vmul.f32 -1.442695, %v6127_v44 }
 0x676   :  { %6341 = vtanh.f32 %v6112_v39  ;;  %v3925_v49 = vmul.f32 -1.442695, %v6128_v5 }
 0x677   :  { %6343 = vpow2.f32 %v3924_v42 }
 0x678   :  { %6345 = vpow2.f32 %v3925_v49 }
 0x67f   :  { %v6340_v27 = vpop.eup %6339 }
 0x680   :  { %v6342_v3 = vpop.eup %6341  ;;  %v2666_v36 = vmul.f32 %v6340_v27, %v6332_v19  ;;  %v9132_v27 = vld [vmem:[#allocation99_spill] sm:$0xff] }
 0x681   :  { %v6344_v30 = vpop.eup %6343  ;;  %v2667_v43 = vmul.f32 %v6342_v3, %v6336_v51  ;;  %v9130_v51 = vld [vmem:[#allocation97_spill] sm:$0xff] }
 0x682   :  { %v6346_v4 = vpop.eup %6345  ;;  %v7806_v38 = vadd.f32 %v2666_v36, %v2664_v50  ;;  %v2658_v44 = vadd.f32 1.0, %v6344_v30  ;;  %v9133_v3 = vld [vmem:[#allocation125_spill] sm:$0xff]  ;;  %v9135_v36 = vld [vmem:[#allocation126_spill] sm:$0xff]  ;;  %v9136_v30 = vld [vmem:[#allocation103_spill] sm:$0xff] }
 0x683   :  { %v7808_v39 = vadd.f32 %v2667_v43, %v2665_v16  ;;  %v2659_v5 = vadd.f32 1.0, %v6346_v4  ;;  %v9129_v43 = vld [vmem:[#allocation123_spill] sm:$0xff]  ;;  %v9134_v50 = vld [vmem:[#allocation101_spill] sm:$0xff] }
 0x684   :  { %6347 = vtanh.f32 %v7806_v38  ;;  %v9137_v16 = vld [vmem:[#allocation127_spill] sm:$0xff]  ;;  %v9138_v4 = vld [vmem:[#allocation105_spill] sm:$0xff] }
 0x685   :  { %6349 = vrcp.f32 %v2658_v44  ;;  %v9139_v44 = vld [vmem:[#allocation128_spill] sm:$0xff] }
 0x686   :  { %6351 = vtanh.f32 %v7808_v39 }
 0x687   :  { %6353 = vrcp.f32 %v2659_v5  ;;  %v9140_v5 = vld [vmem:[#allocation107_spill] sm:$0xff] }
 0x68e   :  { %v6348_v42 = vpop.eup %6347 }
 0x68f   :  { %v6350_v34 = vpop.eup %6349 }
 0x690   :  { %v6352_v49 = vpop.eup %6351  ;;  %v7812_v22 = vmul.f32 %v6350_v34, %v6348_v42  ;;  %v9141_v42 = vld [vmem:[#allocation129_spill] sm:$0xff] }
 0x691   :  { %v6354_v19 = vpop.eup %6353  ;;  %v9142_v34 = vld [vmem:[#allocation109_spill] sm:$0xff] }
 0x692   :  { %v2673_v61 = vmul.f32 %v6354_v19, %v6352_v49  ;;  %v9143_v49 = vld [vmem:[#allocation130_spill] sm:$0xff]  ;;  %v9144_v19 = vld [vmem:[#allocation111_spill] sm:$0xff] }
 0x694   :  { %2749 = vmatprep.mubr.f32.mxu0 %v2673_v61  ;;  %2820 = vmatprep.mubr.f32.mxu1 %v2673_v61 }
 0x695   :  { %2750 = vmatmul.mubr.f32.vlgmr.msra.gmra.mrb[26].mxu0 %v7812_v22  ;;  %2821 = vmatmul.mubr.f32.vlgmr.msra.gmra.mrb[18].mxu1 %v7812_v22 }
 0x696   :  { %5392 = vmatpush1.bf16.msra.mxu0 %v8759_v45  ;;  %5456 = vmatpush1.bf16.msra.mxu1 %v8760_v52 }
 0x697   :  { %2891 = vmatprep.mubr.f32.mxu0 %v2673_v61  ;;  %2962 = vmatprep.mubr.f32.mxu1 %v2673_v61  ;;  %v9145_v61 = vld [vmem:[#allocation131_spill] sm:$0xff] }
 0x698   :  { %5394 = vmatprep.subr.bf16.mxu0 %v8761_v11  ;;  %5458 = vmatprep.subr.bf16.mxu1 %v8762_v62 }
 0x69a   :  { %5396 = vmatpush1.bf16.msra.mxu0 %v8763_v14  ;;  %5460 = vmatpush1.bf16.msra.mxu1 %v8764_v18 }
 0x69b   :  { %5398 = vmatprep.subr.bf16.mxu0 %v8851_v8  ;;  %5462 = vmatprep.subr.bf16.mxu1 %v8852_v37 }
 0x69e   :  { %5400 = vmatpush1.bf16.msra.mxu0 %v8767_v15  ;;  %5464 = vmatpush1.bf16.msra.mxu1 %v8853_v10 }
 0x69f   :  { %5402 = vmatprep.subr.bf16.mxu0 %v8769_v23  ;;  %5466 = vmatprep.subr.bf16.mxu1 %v8854_v9 }
 0x6a2   :  { %5404 = vmatpush1.bf16.msra.mxu0 %v8771_v7  ;;  %5468 = vmatpush1.bf16.msra.mxu1 %v8855_v58 }
 0x6a3   :  { %5406 = vmatprep.subr.bf16.mxu0 %v8773_v0  ;;  %5470 = vmatprep.subr.bf16.mxu1 %v8856_v29 }
 0x6a6   :  { %5408 = vmatpush1.bf16.msra.mxu0 %v8775_v28  ;;  %5472 = vmatpush1.bf16.msra.mxu1 %v8857_v59 }
 0x6a7   :  { %5410 = vmatprep.subr.bf16.mxu0 %v8777_v20  ;;  %5474 = vmatprep.subr.bf16.mxu1 %v8858_v13 }
 0x6aa   :  { %5412 = vmatpush1.bf16.msra.mxu0 %v8778_v32  ;;  %5476 = vmatpush1.bf16.msra.mxu1 %v8859_v48 }
 0x6ab   :  { %5414 = vmatprep.subr.bf16.mxu0 %v8779_v21  ;;  %5478 = vmatprep.subr.bf16.mxu1 %v8860_v54 }
 0x6ae   :  { %5416 = vmatpush1.bf16.msra.mxu0 %v8780_v55  ;;  %5480 = vmatpush1.bf16.msra.mxu1 %v8861_v33 }
 0x6af   :  { %5418 = vmatprep.subr.bf16.mxu0 %v8781_v26  ;;  %5482 = vmatprep.subr.bf16.mxu1 %v8862_v46 }
 0x6b2   :  { %5420 = vmatpush1.bf16.msra.mxu0 %v8943_v60  ;;  %5484 = vmatpush1.bf16.msra.mxu1 %v8863_v53 }
 0x6b3   :  { %5422 = vmatprep.subr.bf16.mxu0 %v8944_v1  ;;  %5486 = vmatprep.subr.bf16.mxu1 %v8864_v31 }
 0x6b6   :  { %5424 = vmatpush1.bf16.msra.mxu0 %v8784_v6  ;;  %5488 = vmatpush1.bf16.msra.mxu1 %v8865_v57 }
 0x6b7   :  { %5426 = vmatprep.subr.bf16.mxu0 %v8785_v12  ;;  %5490 = vmatprep.subr.bf16.mxu1 %v8866_v47 }
 0x6ba   :  { %5428 = vmatpush1.bf16.msra.mxu0 %v8786_v17  ;;  %5492 = vmatpush1.bf16.msra.mxu1 %v8867_v40 }
 0x6bb   :  { %5430 = vmatprep.subr.bf16.mxu0 %v8945_v41  ;;  %5494 = vmatprep.subr.bf16.mxu1 %v9129_v43 }
 0x6be   :  { %5432 = vmatpush1.bf16.msra.mxu0 %v9130_v51  ;;  %5496 = vmatpush1.bf16.msra.mxu1 %v9131_v24 }
 0x6bf   :  { %5434 = vmatprep.subr.bf16.mxu0 %v9132_v27  ;;  %5498 = vmatprep.subr.bf16.mxu1 %v9133_v3 }
 0x6c2   :  { %5436 = vmatpush1.bf16.msra.mxu0 %v9134_v50  ;;  %5500 = vmatpush1.bf16.msra.mxu1 %v9135_v36  ;;  %v9146_v36 = vld [vmem:[#allocation113_spill] sm:$0xff]  ;;  %v9221_v50 = vld [vmem:[#allocation138_spill] sm:$0xff] }
 0x6c3   :  { %5438 = vmatprep.subr.bf16.mxu0 %v9136_v30  ;;  %5502 = vmatprep.subr.bf16.mxu1 %v9137_v16  ;;  %v9147_v30 = vld [vmem:[#allocation132_spill] sm:$0xff]  ;;  %v9148_v16 = vld [vmem:[#allocation115_spill] sm:$0xff] }
 0x6c6   :  { %5440 = vmatpush1.bf16.msra.mxu0 %v9138_v4  ;;  %5504 = vmatpush1.bf16.msra.mxu1 %v9139_v44  ;;  %v9149_v4 = vld [vmem:[#allocation133_spill] sm:$0xff] }
 0x6c7   :  { %5442 = vmatprep.subr.bf16.mxu0 %v9140_v5  ;;  %5506 = vmatprep.subr.bf16.mxu1 %v9141_v42  ;;  %v9150_v44 = vld [vmem:[#allocation117_spill] sm:$0xff]  ;;  %v9151_v5 = vld [vmem:[#allocation134_spill] sm:$0xff]  ;;  %v9152_v42 = vld [vmem:[#allocation7_spill] sm:$0xff] }
 0x6ca   :  { %5444 = vmatpush1.bf16.msra.mxu0 %v9142_v34  ;;  %5508 = vmatpush1.bf16.msra.mxu1 %v9143_v49  ;;  %v9153_v34 = vld [vmem:[#allocation10_spill] sm:$0xff] }
 0x6cb   :  { %5446 = vmatprep.subr.bf16.mxu0 %v9144_v19  ;;  %5510 = vmatprep.subr.bf16.mxu1 %v9145_v61  ;;  %v9154_v61 = vld [vmem:[#allocation8_spill] sm:$0xff]  ;;  %v9163_v19 = vld [vmem:[#allocation34_spill] sm:$0xff] }
 0x6ce   :  { %5448 = vmatpush1.bf16.msra.mxu0 %v9146_v36  ;;  %5512 = vmatpush1.bf16.msra.mxu1 %v9147_v30  ;;  %v9155_v36 = vld [vmem:[#allocation26_spill] sm:$0xff]  ;;  %v9156_v30 = vld [vmem:[#allocation9_spill] sm:$0xff] }
 0x6cf   :  { %5450 = vmatprep.subr.bf16.mxu0 %v9148_v16  ;;  %5514 = vmatprep.subr.bf16.mxu1 %v9149_v4  ;;  %v9157_v16 = vld [vmem:[#allocation28_spill] sm:$0xff]  ;;  %v9158_v4 = vld [vmem:[#allocation11_spill] sm:$0xff] }
 0x6d2   :  { %5452 = vmatpush1.bf16.msra.mxu0 %v9150_v44  ;;  %5516 = vmatpush1.bf16.msra.mxu1 %v9151_v5  ;;  %v9159_v44 = vld [vmem:[#allocation30_spill] sm:$0xff]  ;;  %v9160_v5 = vld [vmem:[#allocation12_spill] sm:$0xff] }
 0x6d3   :  { %5518 = vmatprep.subr.bf16.mxu0 %v9152_v42  ;;  %5582 = vmatprep.subr.bf16.mxu1 %v9153_v34  ;;  %v9161_v42 = vld [vmem:[#allocation32_spill] sm:$0xff]  ;;  %v9162_v34 = vld [vmem:[#allocation13_spill] sm:$0xff] }
 0x6d5   :  { %2892 = vmatmul.mubr.f32.vlgmr.msra.gmra.mrb[18].mxu0 %v7812_v22  ;;  %2963 = vmatmul.mubr.f32.vlgmr.msra.gmra.mrb[34].mxu1 %v7812_v22  ;;  %v9164_v22 = vld [vmem:[#allocation14_spill] sm:$0xff] }
 0x6d6   :  { %5520 = vmatpush1.bf16.msra.mxu0 %v9154_v61  ;;  %5584 = vmatpush1.bf16.msra.mxu1 %v9155_v36  ;;  %v9165_v61 = vld [vmem:[#allocation36_spill] sm:$0xff]  ;;  %v9166_v36 = vld [vmem:[#allocation15_spill] sm:$0xff] }
 0x6d7   :  { %5522 = vmatprep.subr.bf16.mxu0 %v9156_v30  ;;  %5586 = vmatprep.subr.bf16.mxu1 %v9157_v16  ;;  %v9167_v30 = vld [vmem:[#allocation38_spill] sm:$0xff]  ;;  %v9168_v16 = vld [vmem:[#allocation16_spill] sm:$0xff] }
 0x6da   :  { %5524 = vmatpush1.bf16.msra.mxu0 %v9158_v4  ;;  %5588 = vmatpush1.bf16.msra.mxu1 %v9159_v44  ;;  %v9169_v4 = vld [vmem:[#allocation40_spill] sm:$0xff]  ;;  %v9170_v44 = vld [vmem:[#allocation17_spill] sm:$0xff] }
 0x6db   :  { %5526 = vmatprep.subr.bf16.mxu0 %v9160_v5  ;;  %5590 = vmatprep.subr.bf16.mxu1 %v9161_v42  ;;  %v9171_v5 = vld [vmem:[#allocation42_spill] sm:$0xff] }
 0x6dc   :  { %v9172_v42 = vld [vmem:[#allocation18_spill] sm:$0xff] }
 0x6de   :  { %5528 = vmatpush1.bf16.msra.mxu0 %v9162_v34  ;;  %5592 = vmatpush1.bf16.msra.mxu1 %v9163_v19  ;;  %v9173_v34 = vld [vmem:[#allocation44_spill] sm:$0xff]  ;;  %v9174_v19 = vld [vmem:[#allocation19_spill] sm:$0xff] }
 0x6df   :  { %5530 = vmatprep.subr.bf16.mxu0 %v9164_v22  ;;  %5594 = vmatprep.subr.bf16.mxu1 %v9165_v61  ;;  %v9175_v22 = vld [vmem:[#allocation46_spill] sm:$0xff]  ;;  %v9176_v61 = vld [vmem:[#allocation20_spill] sm:$0xff] }
 0x6e2   :  { %5532 = vmatpush1.bf16.msra.mxu0 %v9166_v36  ;;  %5596 = vmatpush1.bf16.msra.mxu1 %v9167_v30  ;;  %v9177_v36 = vld [vmem:[#allocation48_spill] sm:$0xff]  ;;  %v9178_v30 = vld [vmem:[#allocation21_spill] sm:$0xff] }
 0x6e3   :  { %5534 = vmatprep.subr.bf16.mxu0 %v9168_v16  ;;  %5598 = vmatprep.subr.bf16.mxu1 %v9169_v4  ;;  %v9179_v16 = vld [vmem:[#allocation50_spill] sm:$0xff] }
 0x6e4   :  { %v9180_v4 = vld [vmem:[#allocation22_spill] sm:$0xff] }
 0x6e6   :  { %5536 = vmatpush1.bf16.msra.mxu0 %v9170_v44  ;;  %5600 = vmatpush1.bf16.msra.mxu1 %v9171_v5  ;;  %v9181_v44 = vld [vmem:[#allocation52_spill] sm:$0xff]  ;;  %v9182_v5 = vld [vmem:[#allocation23_spill] sm:$0xff] }
 0x6e7   :  { %5538 = vmatprep.subr.bf16.mxu0 %v9172_v42  ;;  %5602 = vmatprep.subr.bf16.mxu1 %v9173_v34  ;;  %v9183_v42 = vld [vmem:[#allocation54_spill] sm:$0xff]  ;;  %v9184_v34 = vld [vmem:[#allocation24_spill] sm:$0xff] }
 0x6ea   :  { %5540 = vmatpush1.bf16.msra.mxu0 %v9174_v19  ;;  %5604 = vmatpush1.bf16.msra.mxu1 %v9175_v22  ;;  %v9185_v19 = vld [vmem:[#allocation55_spill] sm:$0xff]  ;;  %v9186_v22 = vld [vmem:[#allocation25_spill] sm:$0xff] }
 0x6eb   :  { %5542 = vmatprep.subr.bf16.mxu0 %v9176_v61  ;;  %5606 = vmatprep.subr.bf16.mxu1 %v9177_v36  ;;  %v9187_v61 = vld [vmem:[#allocation57_spill] sm:$0xff]  ;;  %v9188_v36 = vld [vmem:[#allocation27_spill] sm:$0xff] }
 0x6ee   :  { %5544 = vmatpush1.bf16.msra.mxu0 %v9178_v30  ;;  %5608 = vmatpush1.bf16.msra.mxu1 %v9179_v16  ;;  %v9189_v30 = vld [vmem:[#allocation59_spill] sm:$0xff]  ;;  %v9190_v16 = vld [vmem:[#allocation29_spill] sm:$0xff] }
 0x6ef   :  { %5546 = vmatprep.subr.bf16.mxu0 %v9180_v4  ;;  %5610 = vmatprep.subr.bf16.mxu1 %v9181_v44  ;;  %v9191_v4 = vld [vmem:[#allocation61_spill] sm:$0xff]  ;;  %v9192_v44 = vld [vmem:[#allocation31_spill] sm:$0xff] }
 0x6f2   :  { %5548 = vmatpush1.bf16.msra.mxu0 %v9182_v5  ;;  %5612 = vmatpush1.bf16.msra.mxu1 %v9183_v42  ;;  %v9193_v5 = vld [vmem:[#allocation63_spill] sm:$0xff]  ;;  %v9194_v42 = vld [vmem:[#allocation33_spill] sm:$0xff] }
 0x6f3   :  { %5550 = vmatprep.subr.bf16.mxu0 %v9184_v34  ;;  %5614 = vmatprep.subr.bf16.mxu1 %v9185_v19  ;;  %v9195_v34 = vld [vmem:[#allocation65_spill] sm:$0xff]  ;;  %v9196_v19 = vld [vmem:[#allocation35_spill] sm:$0xff] }
 0x6f6   :  { %5552 = vmatpush1.bf16.msra.mxu0 %v9186_v22  ;;  %5616 = vmatpush1.bf16.msra.mxu1 %v9187_v61  ;;  %v9197_v22 = vld [vmem:[#allocation67_spill] sm:$0xff]  ;;  %v9198_v61 = vld [vmem:[#allocation37_spill] sm:$0xff] }
 0x6f7   :  { %5554 = vmatprep.subr.bf16.mxu0 %v9188_v36  ;;  %5618 = vmatprep.subr.bf16.mxu1 %v9189_v30  ;;  %v9199_v36 = vld [vmem:[#allocation69_spill] sm:$0xff]  ;;  %v9200_v30 = vld [vmem:[#allocation39_spill] sm:$0xff] }
 0x6fa   :  { %5556 = vmatpush1.bf16.msra.mxu0 %v9190_v16  ;;  %5620 = vmatpush1.bf16.msra.mxu1 %v9191_v4  ;;  %v9201_v16 = vld [vmem:[#allocation71_spill] sm:$0xff]  ;;  %v9202_v4 = vld [vmem:[#allocation41_spill] sm:$0xff] }
 0x6fb   :  { %5558 = vmatprep.subr.bf16.mxu0 %v9192_v44  ;;  %5622 = vmatprep.subr.bf16.mxu1 %v9193_v5  ;;  %v9203_v44 = vld [vmem:[#allocation73_spill] sm:$0xff]  ;;  %v9204_v5 = vld [vmem:[#allocation43_spill] sm:$0xff] }
 0x6fe   :  { %5560 = vmatpush1.bf16.msra.mxu0 %v9194_v42  ;;  %5624 = vmatpush1.bf16.msra.mxu1 %v9195_v34  ;;  %v9205_v42 = vld [vmem:[#allocation75_spill] sm:$0xff]  ;;  %v9206_v34 = vld [vmem:[#allocation45_spill] sm:$0xff] }
 0x6ff   :  { %5562 = vmatprep.subr.bf16.mxu0 %v9196_v19  ;;  %5626 = vmatprep.subr.bf16.mxu1 %v9197_v22  ;;  %v9207_v19 = vld [vmem:[#allocation77_spill] sm:$0xff]  ;;  %v9208_v22 = vld [vmem:[#allocation47_spill] sm:$0xff] }
 0x702   :  { %5564 = vmatpush1.bf16.msra.mxu0 %v9198_v61  ;;  %5628 = vmatpush1.bf16.msra.mxu1 %v9199_v36  ;;  %v9209_v61 = vld [vmem:[#allocation79_spill] sm:$0xff]  ;;  %v9210_v36 = vld [vmem:[#allocation49_spill] sm:$0xff] }
 0x703   :  { %5566 = vmatprep.subr.bf16.mxu0 %v9200_v30  ;;  %5630 = vmatprep.subr.bf16.mxu1 %v9201_v16  ;;  %v9211_v30 = vld [vmem:[#allocation81_spill] sm:$0xff]  ;;  %v9212_v16 = vld [vmem:[#allocation51_spill] sm:$0xff] }
 0x706   :  { %5568 = vmatpush1.bf16.msra.mxu0 %v9202_v4  ;;  %5632 = vmatpush1.bf16.msra.mxu1 %v9203_v44  ;;  %v9213_v4 = vld [vmem:[#allocation83_spill] sm:$0xff]  ;;  %v9214_v44 = vld [vmem:[#allocation53_spill] sm:$0xff] }
 0x707   :  { %5570 = vmatprep.subr.bf16.mxu0 %v9204_v5  ;;  %5634 = vmatprep.subr.bf16.mxu1 %v9205_v42  ;;  %v9215_v5 = vld [vmem:[#allocation85_spill] sm:$0xff]  ;;  %v9216_v42 = vld [vmem:[#allocation56_spill] sm:$0xff] }
 0x70a   :  { %5572 = vmatpush1.bf16.msra.mxu0 %v9206_v34  ;;  %5636 = vmatpush1.bf16.msra.mxu1 %v9207_v19  ;;  %v9217_v34 = vld [vmem:[#allocation88_spill] sm:$0xff]  ;;  %v9218_v19 = vld [vmem:[#allocation143_spill] sm:$0xff] }
 0x70b   :  { %5574 = vmatprep.subr.bf16.mxu0 %v9208_v22  ;;  %5638 = vmatprep.subr.bf16.mxu1 %v9209_v61  ;;  %v9219_v22 = vld [vmem:[#allocation137_spill] sm:$0xff]  ;;  %v9220_v61 = vld [vmem:[#allocation144_spill] sm:$0xff] }
 0x70c   :  { %v244_v49 = vadd.f32 %v9219_v22, %v9218_v19 }
 0x70e   :  { %5576 = vmatpush1.bf16.msra.mxu0 %v9210_v36  ;;  %5640 = vmatpush1.bf16.msra.mxu1 %v9211_v30  ;;  %v246_v36 = vadd.f32 %v9221_v50, %v9220_v61 }
 0x70f   :  { %5578 = vmatprep.subr.bf16.mxu0 %v9212_v16  ;;  %5642 = vmatprep.subr.bf16.mxu1 %v9213_v4 }
 0x712   :  { %5580 = vmatpush1.bf16.msra.mxu0 %v9214_v44  ;;  %5644 = vmatpush1.bf16.msra.mxu1 %v9215_v5 }
 0x713   :  { %5646 = vmatprep.subr.bf16.mxu0 %v9216_v42  ;;  %5710 = vmatprep.subr.bf16.mxu1 %v9217_v34 }
 0x768   :  { %v2751_v3 = vpop.f32.mrb[26].mxu0  ;;  %v2822_v30 = vpop.f32.mrb[18].mxu1 }
 0x769   :  { %v2969_v27 = vadd.f32 %v2751_v3, %v244_v49  ;;  %v2753_v16 = vpop.f32.mrb[27].mxu0  ;;  %v2824_v24 = vpop.f32.mrb[19].mxu1  ;;  %v6097_v44 = vadd.f32 %v2822_v30, %v7182_v56 }
 0x76a   :  { %v2970_v4 = vadd.f32 %v2753_v16, %v246_v36  ;;  %v6098_v5 = vadd.f32 %v2824_v24, %v8848_v63 }
 0x76b   :  { %v3926_v51 = vmul.f32 -1.442695, %v2969_v27  ;;  %v3928_v42 = vmul.f32 -1.442695, %v6097_v44 }
 0x76c   :  { %v3927_v43 = vmul.f32 -1.442695, %v2970_v4  ;;  %v3929_v34 = vmul.f32 -1.442695, %v6098_v5  ;;  %v9222_v4 = vld [vmem:[#allocation147_spill] sm:$0xff] }
 0x76d   :  { %6355 = vpow2.f32 %v3926_v51 }
 0x76e   :  { %6357 = vpow2.f32 %v3928_v42 }
 0x76f   :  { %6359 = vpow2.f32 %v3927_v43 }
 0x770   :  { %6361 = vpow2.f32 %v3929_v34 }
 0x777   :  { %v6356_v22 = vpop.eup %6355 }
 0x778   :  { %v6358_v50 = vpop.eup %6357  ;;  %v2983_v3 = vadd.f32 1.0, %v6356_v22 }
 0x779   :  { %v6360_v61 = vpop.eup %6359  ;;  %v2995_v49 = vadd.f32 1.0, %v6358_v50 }
 0x77a   :  { %v6362_v19 = vpop.eup %6361  ;;  %v2984_v41 = vadd.f32 1.0, %v6360_v61  ;;  %6363 = vrcp.f32 %v2983_v3 }
 0x77b   :  { %v2996_v36 = vadd.f32 1.0, %v6362_v19  ;;  %6365 = vrcp.f32 %v2995_v49 }
 0x77c   :  { %6367 = vrcp.f32 %v2984_v41 }
 0x77d   :  { %6369 = vrcp.f32 %v2996_v36 }
 0x784   :  { %v6364_v19 = vpop.eup %6363 }
 0x785   :  { %v6366_v61 = vpop.eup %6365 }
 0x786   :  { %v6368_v41 = vpop.eup %6367  ;;  %v3015_v49 = vmul.f32 %v6366_v61, %v7806_v38 }
 0x787   :  { %v6370_v22 = vpop.eup %6369 }
 0x7a8   :  { %v2893_v30 = vpop.f32.mrb[18].mxu0  ;;  %v2964_v24 = vpop.f32.mrb[34].mxu1 }
 0x7a9   :  { %v6113_v27 = vadd.f32 %v2893_v30, %v8849_v25  ;;  %v6129_v51 = vadd.f32 %v2964_v24, %v9127_v35  ;;  %v2895_v16 = vpop.f32.mrb[19].mxu0  ;;  %v2966_v43 = vpop.f32.mrb[35].mxu1  ;;  %v3016_v24 = vmul.f32 %v6370_v22, %v7808_v39  ;;  %v9224_v22 = vld [vmem:[#allocation123_spill] sm:$0xff] }
 0x7aa   :  { %v6114_v44 = vadd.f32 %v2895_v16, %v9222_v4  ;;  %v6130_v5 = vadd.f32 %v2966_v43, %v7204_v2 }
 0x7ab   :  { %6371 = vtanh.f32 %v6113_v27  ;;  %v3930_v42 = vmul.f32 -1.442695, %v6129_v51 }
 0x7ac   :  { %6373 = vtanh.f32 %v6114_v44  ;;  %v3931_v34 = vmul.f32 -1.442695, %v6130_v5 }
 0x7ad   :  { %6375 = vpow2.f32 %v3930_v42 }
 0x7ae   :  { %6377 = vpow2.f32 %v3931_v34 }
 0x7b5   :  { %v6372_v50 = vpop.eup %6371 }
 0x7b6   :  { %v6374_v3 = vpop.eup %6373  ;;  %v3017_v30 = vmul.f32 %v6372_v50, %v6364_v19  ;;  %v9225_v50 = vld [vmem:[#allocation97_spill] sm:$0xff] }
 0x7b7   :  { %v6376_v36 = vpop.eup %6375  ;;  %v3018_v16 = vmul.f32 %v6374_v3, %v6368_v41  ;;  %v9223_v41 = vld [vmem:[#allocation95_spill] sm:$0xff]  ;;  %v9226_v3 = vld [vmem:[#allocation124_spill] sm:$0xff] }
 0x7b8   :  { %v6378_v43 = vpop.eup %6377  ;;  %v7958_v27 = vadd.f32 %v3017_v30, %v3015_v49  ;;  %v3009_v51 = vadd.f32 1.0, %v6376_v36  ;;  %v9227_v49 = vld [vmem:[#allocation99_spill] sm:$0xff]  ;;  %v9228_v30 = vld [vmem:[#allocation125_spill] sm:$0xff] }
 0x7b9   :  { %v7960_v44 = vadd.f32 %v3018_v16, %v3016_v24  ;;  %v3010_v5 = vadd.f32 1.0, %v6378_v43  ;;  %v9229_v36 = vld [vmem:[#allocation101_spill] sm:$0xff]  ;;  %v9230_v24 = vld [vmem:[#allocation126_spill] sm:$0xff]  ;;  %v9231_v16 = vld [vmem:[#allocation103_spill] sm:$0xff] }
 0x7ba   :  { %6379 = vtanh.f32 %v7958_v27  ;;  %v9232_v43 = vld [vmem:[#allocation127_spill] sm:$0xff] }
 0x7bb   :  { %6381 = vrcp.f32 %v3009_v51  ;;  %v9233_v51 = vld [vmem:[#allocation105_spill] sm:$0xff] }
 0x7bc   :  { %6383 = vtanh.f32 %v7960_v44 }
 0x7bd   :  { %6385 = vrcp.f32 %v3010_v5  ;;  %v9234_v5 = vld [vmem:[#allocation128_spill] sm:$0xff] }
 0x7c4   :  { %v6380_v42 = vpop.eup %6379 }
 0x7c5   :  { %v6382_v38 = vpop.eup %6381 }
 0x7c6   :  { %v6384_v34 = vpop.eup %6383  ;;  %v7964_v39 = vmul.f32 %v6382_v38, %v6380_v42  ;;  %v9235_v42 = vld [vmem:[#allocation107_spill] sm:$0xff]  ;;  %v9236_v38 = vld [vmem:[#allocation129_spill] sm:$0xff] }
 0x7c7   :  { %v6386_v19 = vpop.eup %6385 }
 0x7c8   :  { %v3024_v61 = vmul.f32 %v6386_v19, %v6384_v34  ;;  %v9237_v34 = vld [vmem:[#allocation109_spill] sm:$0xff]  ;;  %v9238_v19 = vld [vmem:[#allocation130_spill] sm:$0xff] }
 0x7ca   :  { %3100 = vmatprep.mubr.f32.mxu0 %v3024_v61  ;;  %3171 = vmatprep.mubr.f32.mxu1 %v3024_v61 }
 0x7cb   :  { %3101 = vmatmul.mubr.f32.vlgmr.msra.gmra.mrb[28].mxu0 %v7964_v39  ;;  %3172 = vmatmul.mubr.f32.vlgmr.msra.gmra.mrb[20].mxu1 %v7964_v39 }
 0x7cc   :  { %5648 = vmatpush1.bf16.msra.mxu0 %v8759_v45  ;;  %5712 = vmatpush1.bf16.msra.mxu1 %v8760_v52 }
 0x7cd   :  { %3242 = vmatprep.mubr.f32.mxu0 %v3024_v61  ;;  %3313 = vmatprep.mubr.f32.mxu1 %v3024_v61  ;;  %v9239_v61 = vld [vmem:[#allocation111_spill] sm:$0xff] }
 0x7ce   :  { %5650 = vmatprep.subr.bf16.mxu0 %v8761_v11  ;;  %5714 = vmatprep.subr.bf16.mxu1 %v8762_v62 }
 0x7d0   :  { %5652 = vmatpush1.bf16.msra.mxu0 %v8763_v14  ;;  %5716 = vmatpush1.bf16.msra.mxu1 %v8764_v18 }
 0x7d1   :  { %5654 = vmatprep.subr.bf16.mxu0 %v8851_v8  ;;  %5718 = vmatprep.subr.bf16.mxu1 %v8852_v37 }
 0x7d4   :  { %5656 = vmatpush1.bf16.msra.mxu0 %v8767_v15  ;;  %5720 = vmatpush1.bf16.msra.mxu1 %v8853_v10 }
 0x7d5   :  { %5658 = vmatprep.subr.bf16.mxu0 %v8769_v23  ;;  %5722 = vmatprep.subr.bf16.mxu1 %v8854_v9 }
 0x7d8   :  { %5660 = vmatpush1.bf16.msra.mxu0 %v8771_v7  ;;  %5724 = vmatpush1.bf16.msra.mxu1 %v8855_v58 }
 0x7d9   :  { %5662 = vmatprep.subr.bf16.mxu0 %v8773_v0  ;;  %5726 = vmatprep.subr.bf16.mxu1 %v8856_v29 }
 0x7dc   :  { %5664 = vmatpush1.bf16.msra.mxu0 %v8775_v28  ;;  %5728 = vmatpush1.bf16.msra.mxu1 %v8857_v59 }
 0x7dd   :  { %5666 = vmatprep.subr.bf16.mxu0 %v8777_v20  ;;  %5730 = vmatprep.subr.bf16.mxu1 %v8858_v13 }
 0x7e0   :  { %5668 = vmatpush1.bf16.msra.mxu0 %v8778_v32  ;;  %5732 = vmatpush1.bf16.msra.mxu1 %v8859_v48 }
 0x7e1   :  { %5670 = vmatprep.subr.bf16.mxu0 %v8779_v21  ;;  %5734 = vmatprep.subr.bf16.mxu1 %v8860_v54 }
 0x7e4   :  { %5672 = vmatpush1.bf16.msra.mxu0 %v8780_v55  ;;  %5736 = vmatpush1.bf16.msra.mxu1 %v8861_v33 }
 0x7e5   :  { %5674 = vmatprep.subr.bf16.mxu0 %v8781_v26  ;;  %5738 = vmatprep.subr.bf16.mxu1 %v8862_v46 }
 0x7e8   :  { %5676 = vmatpush1.bf16.msra.mxu0 %v8943_v60  ;;  %5740 = vmatpush1.bf16.msra.mxu1 %v8863_v53 }
 0x7e9   :  { %5678 = vmatprep.subr.bf16.mxu0 %v8944_v1  ;;  %5742 = vmatprep.subr.bf16.mxu1 %v8864_v31 }
 0x7ec   :  { %5680 = vmatpush1.bf16.msra.mxu0 %v8784_v6  ;;  %5744 = vmatpush1.bf16.msra.mxu1 %v8865_v57 }
 0x7ed   :  { %5682 = vmatprep.subr.bf16.mxu0 %v8785_v12  ;;  %5746 = vmatprep.subr.bf16.mxu1 %v8866_v47 }
 0x7f0   :  { %5684 = vmatpush1.bf16.msra.mxu0 %v8786_v17  ;;  %5748 = vmatpush1.bf16.msra.mxu1 %v8867_v40 }
 0x7f1   :  { %5686 = vmatprep.subr.bf16.mxu0 %v9223_v41  ;;  %5750 = vmatprep.subr.bf16.mxu1 %v9224_v22 }
 0x7f4   :  { %5688 = vmatpush1.bf16.msra.mxu0 %v9225_v50  ;;  %5752 = vmatpush1.bf16.msra.mxu1 %v9226_v3 }
 0x7f5   :  { %5690 = vmatprep.subr.bf16.mxu0 %v9227_v49  ;;  %5754 = vmatprep.subr.bf16.mxu1 %v9228_v30  ;;  %v9316_v30 = vld [vmem:[#allocation140_spill] sm:$0xff] }
 0x7f8   :  { %5692 = vmatpush1.bf16.msra.mxu0 %v9229_v36  ;;  %5756 = vmatpush1.bf16.msra.mxu1 %v9230_v24  ;;  %v9240_v36 = vld [vmem:[#allocation131_spill] sm:$0xff]  ;;  %v9241_v24 = vld [vmem:[#allocation113_spill] sm:$0xff] }
 0x7f9   :  { %5694 = vmatprep.subr.bf16.mxu0 %v9231_v16  ;;  %5758 = vmatprep.subr.bf16.mxu1 %v9232_v43  ;;  %v9242_v16 = vld [vmem:[#allocation132_spill] sm:$0xff]  ;;  %v9243_v43 = vld [vmem:[#allocation115_spill] sm:$0xff] }
 0x7fc   :  { %5696 = vmatpush1.bf16.msra.mxu0 %v9233_v51  ;;  %5760 = vmatpush1.bf16.msra.mxu1 %v9234_v5  ;;  %v9244_v51 = vld [vmem:[#allocation133_spill] sm:$0xff] }
 0x7fd   :  { %5698 = vmatprep.subr.bf16.mxu0 %v9235_v42  ;;  %5762 = vmatprep.subr.bf16.mxu1 %v9236_v38  ;;  %v9245_v5 = vld [vmem:[#allocation117_spill] sm:$0xff]  ;;  %v9246_v42 = vld [vmem:[#allocation134_spill] sm:$0xff]  ;;  %v9247_v38 = vld [vmem:[#allocation7_spill] sm:$0xff] }
 0x800   :  { %5700 = vmatpush1.bf16.msra.mxu0 %v9237_v34  ;;  %5764 = vmatpush1.bf16.msra.mxu1 %v9238_v19  ;;  %v9248_v34 = vld [vmem:[#allocation10_spill] sm:$0xff] }
 0x801   :  { %5702 = vmatprep.subr.bf16.mxu0 %v9239_v61  ;;  %5766 = vmatprep.subr.bf16.mxu1 %v9240_v36  ;;  %v9249_v36 = vld [vmem:[#allocation8_spill] sm:$0xff]  ;;  %v9258_v61 = vld [vmem:[#allocation34_spill] sm:$0xff] }
 0x804   :  { %5704 = vmatpush1.bf16.msra.mxu0 %v9241_v24  ;;  %5768 = vmatpush1.bf16.msra.mxu1 %v9242_v16  ;;  %v9250_v24 = vld [vmem:[#allocation26_spill] sm:$0xff]  ;;  %v9251_v16 = vld [vmem:[#allocation9_spill] sm:$0xff] }
 0x805   :  { %5706 = vmatprep.subr.bf16.mxu0 %v9243_v43  ;;  %5770 = vmatprep.subr.bf16.mxu1 %v9244_v51  ;;  %v9252_v43 = vld [vmem:[#allocation28_spill] sm:$0xff]  ;;  %v9253_v51 = vld [vmem:[#allocation11_spill] sm:$0xff] }
 0x808   :  { %5708 = vmatpush1.bf16.msra.mxu0 %v9245_v5  ;;  %5772 = vmatpush1.bf16.msra.mxu1 %v9246_v42  ;;  %v9254_v5 = vld [vmem:[#allocation30_spill] sm:$0xff]  ;;  %v9255_v42 = vld [vmem:[#allocation12_spill] sm:$0xff] }
 0x809   :  { %5774 = vmatprep.subr.bf16.mxu0 %v9247_v38  ;;  %5838 = vmatprep.subr.bf16.mxu1 %v9248_v34  ;;  %v9256_v38 = vld [vmem:[#allocation32_spill] sm:$0xff]  ;;  %v9257_v34 = vld [vmem:[#allocation13_spill] sm:$0xff] }
 0x80b   :  { %3243 = vmatmul.mubr.f32.vlgmr.msra.gmra.mrb[20].mxu0 %v7964_v39  ;;  %3314 = vmatmul.mubr.f32.vlgmr.msra.gmra.mrb[36].mxu1 %v7964_v39  ;;  %v9259_v39 = vld [vmem:[#allocation14_spill] sm:$0xff] }
 0x80c   :  { %5776 = vmatpush1.bf16.msra.mxu0 %v9249_v36  ;;  %5840 = vmatpush1.bf16.msra.mxu1 %v9250_v24  ;;  %v9260_v36 = vld [vmem:[#allocation36_spill] sm:$0xff]  ;;  %v9261_v24 = vld [vmem:[#allocation15_spill] sm:$0xff] }
 0x80d   :  { %5778 = vmatprep.subr.bf16.mxu0 %v9251_v16  ;;  %5842 = vmatprep.subr.bf16.mxu1 %v9252_v43  ;;  %v9262_v16 = vld [vmem:[#allocation38_spill] sm:$0xff]  ;;  %v9263_v43 = vld [vmem:[#allocation16_spill] sm:$0xff] }
 0x810   :  { %5780 = vmatpush1.bf16.msra.mxu0 %v9253_v51  ;;  %5844 = vmatpush1.bf16.msra.mxu1 %v9254_v5  ;;  %v9264_v51 = vld [vmem:[#allocation40_spill] sm:$0xff]  ;;  %v9265_v5 = vld [vmem:[#allocation17_spill] sm:$0xff] }
 0x811   :  { %5782 = vmatprep.subr.bf16.mxu0 %v9255_v42  ;;  %5846 = vmatprep.subr.bf16.mxu1 %v9256_v38  ;;  %v9266_v42 = vld [vmem:[#allocation42_spill] sm:$0xff] }
 0x812   :  { %v9267_v38 = vld [vmem:[#allocation18_spill] sm:$0xff] }
 0x814   :  { %5784 = vmatpush1.bf16.msra.mxu0 %v9257_v34  ;;  %5848 = vmatpush1.bf16.msra.mxu1 %v9258_v61  ;;  %v9268_v34 = vld [vmem:[#allocation44_spill] sm:$0xff]  ;;  %v9269_v61 = vld [vmem:[#allocation19_spill] sm:$0xff] }
 0x815   :  { %5786 = vmatprep.subr.bf16.mxu0 %v9259_v39  ;;  %5850 = vmatprep.subr.bf16.mxu1 %v9260_v36  ;;  %v9270_v39 = vld [vmem:[#allocation46_spill] sm:$0xff]  ;;  %v9271_v36 = vld [vmem:[#allocation20_spill] sm:$0xff] }
 0x818   :  { %5788 = vmatpush1.bf16.msra.mxu0 %v9261_v24  ;;  %5852 = vmatpush1.bf16.msra.mxu1 %v9262_v16  ;;  %v9272_v24 = vld [vmem:[#allocation48_spill] sm:$0xff]  ;;  %v9273_v16 = vld [vmem:[#allocation21_spill] sm:$0xff] }
 0x819   :  { %5790 = vmatprep.subr.bf16.mxu0 %v9263_v43  ;;  %5854 = vmatprep.subr.bf16.mxu1 %v9264_v51  ;;  %v9274_v43 = vld [vmem:[#allocation50_spill] sm:$0xff] }
 0x81a   :  { %v9275_v51 = vld [vmem:[#allocation22_spill] sm:$0xff] }
 0x81c   :  { %5792 = vmatpush1.bf16.msra.mxu0 %v9265_v5  ;;  %5856 = vmatpush1.bf16.msra.mxu1 %v9266_v42  ;;  %v9276_v5 = vld [vmem:[#allocation52_spill] sm:$0xff]  ;;  %v9277_v42 = vld [vmem:[#allocation23_spill] sm:$0xff] }
 0x81d   :  { %5794 = vmatprep.subr.bf16.mxu0 %v9267_v38  ;;  %5858 = vmatprep.subr.bf16.mxu1 %v9268_v34  ;;  %v9278_v38 = vld [vmem:[#allocation54_spill] sm:$0xff]  ;;  %v9279_v34 = vld [vmem:[#allocation24_spill] sm:$0xff] }
 0x820   :  { %5796 = vmatpush1.bf16.msra.mxu0 %v9269_v61  ;;  %5860 = vmatpush1.bf16.msra.mxu1 %v9270_v39  ;;  %v9280_v61 = vld [vmem:[#allocation55_spill] sm:$0xff]  ;;  %v9281_v39 = vld [vmem:[#allocation25_spill] sm:$0xff] }
 0x821   :  { %5798 = vmatprep.subr.bf16.mxu0 %v9271_v36  ;;  %5862 = vmatprep.subr.bf16.mxu1 %v9272_v24  ;;  %v9282_v36 = vld [vmem:[#allocation57_spill] sm:$0xff]  ;;  %v9283_v24 = vld [vmem:[#allocation27_spill] sm:$0xff] }
 0x824   :  { %5800 = vmatpush1.bf16.msra.mxu0 %v9273_v16  ;;  %5864 = vmatpush1.bf16.msra.mxu1 %v9274_v43  ;;  %v9284_v16 = vld [vmem:[#allocation59_spill] sm:$0xff]  ;;  %v9285_v43 = vld [vmem:[#allocation29_spill] sm:$0xff] }
 0x825   :  { %5802 = vmatprep.subr.bf16.mxu0 %v9275_v51  ;;  %5866 = vmatprep.subr.bf16.mxu1 %v9276_v5  ;;  %v9286_v51 = vld [vmem:[#allocation61_spill] sm:$0xff]  ;;  %v9287_v5 = vld [vmem:[#allocation31_spill] sm:$0xff] }
 0x828   :  { %5804 = vmatpush1.bf16.msra.mxu0 %v9277_v42  ;;  %5868 = vmatpush1.bf16.msra.mxu1 %v9278_v38  ;;  %v9288_v42 = vld [vmem:[#allocation63_spill] sm:$0xff]  ;;  %v9289_v38 = vld [vmem:[#allocation33_spill] sm:$0xff] }
 0x829   :  { %5806 = vmatprep.subr.bf16.mxu0 %v9279_v34  ;;  %5870 = vmatprep.subr.bf16.mxu1 %v9280_v61  ;;  %v9290_v34 = vld [vmem:[#allocation65_spill] sm:$0xff]  ;;  %v9291_v61 = vld [vmem:[#allocation35_spill] sm:$0xff] }
 0x82c   :  { %5808 = vmatpush1.bf16.msra.mxu0 %v9281_v39  ;;  %5872 = vmatpush1.bf16.msra.mxu1 %v9282_v36  ;;  %v9292_v39 = vld [vmem:[#allocation67_spill] sm:$0xff]  ;;  %v9293_v36 = vld [vmem:[#allocation37_spill] sm:$0xff] }
 0x82d   :  { %5810 = vmatprep.subr.bf16.mxu0 %v9283_v24  ;;  %5874 = vmatprep.subr.bf16.mxu1 %v9284_v16  ;;  %v9294_v24 = vld [vmem:[#allocation69_spill] sm:$0xff]  ;;  %v9295_v16 = vld [vmem:[#allocation39_spill] sm:$0xff] }
 0x830   :  { %5812 = vmatpush1.bf16.msra.mxu0 %v9285_v43  ;;  %5876 = vmatpush1.bf16.msra.mxu1 %v9286_v51  ;;  %v9296_v43 = vld [vmem:[#allocation71_spill] sm:$0xff]  ;;  %v9297_v51 = vld [vmem:[#allocation41_spill] sm:$0xff] }
 0x831   :  { %5814 = vmatprep.subr.bf16.mxu0 %v9287_v5  ;;  %5878 = vmatprep.subr.bf16.mxu1 %v9288_v42  ;;  %v9298_v5 = vld [vmem:[#allocation73_spill] sm:$0xff]  ;;  %v9299_v42 = vld [vmem:[#allocation43_spill] sm:$0xff] }
 0x834   :  { %5816 = vmatpush1.bf16.msra.mxu0 %v9289_v38  ;;  %5880 = vmatpush1.bf16.msra.mxu1 %v9290_v34  ;;  %v9300_v38 = vld [vmem:[#allocation75_spill] sm:$0xff]  ;;  %v9301_v34 = vld [vmem:[#allocation45_spill] sm:$0xff] }
 0x835   :  { %5818 = vmatprep.subr.bf16.mxu0 %v9291_v61  ;;  %5882 = vmatprep.subr.bf16.mxu1 %v9292_v39  ;;  %v9302_v61 = vld [vmem:[#allocation77_spill] sm:$0xff]  ;;  %v9303_v39 = vld [vmem:[#allocation47_spill] sm:$0xff] }
 0x838   :  { %5820 = vmatpush1.bf16.msra.mxu0 %v9293_v36  ;;  %5884 = vmatpush1.bf16.msra.mxu1 %v9294_v24  ;;  %v9304_v36 = vld [vmem:[#allocation79_spill] sm:$0xff]  ;;  %v9305_v24 = vld [vmem:[#allocation49_spill] sm:$0xff] }
 0x839   :  { %5822 = vmatprep.subr.bf16.mxu0 %v9295_v16  ;;  %5886 = vmatprep.subr.bf16.mxu1 %v9296_v43  ;;  %v9306_v16 = vld [vmem:[#allocation81_spill] sm:$0xff]  ;;  %v9307_v43 = vld [vmem:[#allocation51_spill] sm:$0xff] }
 0x83c   :  { %5824 = vmatpush1.bf16.msra.mxu0 %v9297_v51  ;;  %5888 = vmatpush1.bf16.msra.mxu1 %v9298_v5  ;;  %v9308_v51 = vld [vmem:[#allocation83_spill] sm:$0xff]  ;;  %v9309_v5 = vld [vmem:[#allocation53_spill] sm:$0xff] }
 0x83d   :  { %5826 = vmatprep.subr.bf16.mxu0 %v9299_v42  ;;  %5890 = vmatprep.subr.bf16.mxu1 %v9300_v38  ;;  %v9310_v42 = vld [vmem:[#allocation85_spill] sm:$0xff]  ;;  %v9311_v38 = vld [vmem:[#allocation56_spill] sm:$0xff] }
 0x840   :  { %5828 = vmatpush1.bf16.msra.mxu0 %v9301_v34  ;;  %5892 = vmatpush1.bf16.msra.mxu1 %v9302_v61  ;;  %v9312_v34 = vld [vmem:[#allocation88_spill] sm:$0xff]  ;;  %v9313_v61 = vld [vmem:[#allocation143_spill] sm:$0xff] }
 0x841   :  { %5830 = vmatprep.subr.bf16.mxu0 %v9303_v39  ;;  %5894 = vmatprep.subr.bf16.mxu1 %v9304_v36  ;;  %v9314_v39 = vld [vmem:[#allocation139_spill] sm:$0xff]  ;;  %v9315_v36 = vld [vmem:[#allocation144_spill] sm:$0xff] }
 0x842   :  { %v250_v19 = vadd.f32 %v9314_v39, %v9313_v61 }
 0x844   :  { %5832 = vmatpush1.bf16.msra.mxu0 %v9305_v24  ;;  %5896 = vmatpush1.bf16.msra.mxu1 %v9306_v16  ;;  %v252_v24 = vadd.f32 %v9316_v30, %v9315_v36 }
 0x845   :  { %5834 = vmatprep.subr.bf16.mxu0 %v9307_v43  ;;  %5898 = vmatprep.subr.bf16.mxu1 %v9308_v51 }
 0x848   :  { %5836 = vmatpush1.bf16.msra.mxu0 %v9309_v5  ;;  %5900 = vmatpush1.bf16.msra.mxu1 %v9310_v42 }
 0x849   :  { %5902 = vmatprep.subr.bf16.mxu0 %v9311_v38  ;;  %5966 = vmatprep.subr.bf16.mxu1 %v9312_v34 }
 0x89e   :  { %v3102_v49 = vpop.f32.mrb[28].mxu0  ;;  %v3173_v16 = vpop.f32.mrb[20].mxu1 }
 0x89f   :  { %v3320_v3 = vadd.f32 %v3102_v49, %v250_v19  ;;  %v3104_v43 = vpop.f32.mrb[29].mxu0  ;;  %v3175_v50 = vpop.f32.mrb[21].mxu1  ;;  %v6099_v5 = vadd.f32 %v3173_v16, %v7182_v56 }
 0x8a0   :  { %v3321_v51 = vadd.f32 %v3104_v43, %v252_v24  ;;  %v6100_v42 = vadd.f32 %v3175_v50, %v8848_v63 }
 0x8a1   :  { %v3932_v22 = vmul.f32 -1.442695, %v3320_v3  ;;  %v3934_v38 = vmul.f32 -1.442695, %v6099_v5 }
 0x8a2   :  { %v3933_v41 = vmul.f32 -1.442695, %v3321_v51  ;;  %v3935_v34 = vmul.f32 -1.442695, %v6100_v42 }
 0x8a3   :  { %6387 = vpow2.f32 %v3932_v22 }
 0x8a4   :  { %6389 = vpow2.f32 %v3934_v38 }
 0x8a5   :  { %6391 = vpow2.f32 %v3933_v41 }
 0x8a6   :  { %6393 = vpow2.f32 %v3935_v34 }
 0x8ad   :  { %v6388_v39 = vpop.eup %6387 }
 0x8ae   :  { %v6390_v30 = vpop.eup %6389  ;;  %v3334_v49 = vadd.f32 1.0, %v6388_v39 }
 0x8af   :  { %v6392_v36 = vpop.eup %6391  ;;  %v3346_v19 = vadd.f32 1.0, %v6390_v30 }
 0x8b0   :  { %v6394_v61 = vpop.eup %6393  ;;  %v3335_v40 = vadd.f32 1.0, %v6392_v36  ;;  %6395 = vrcp.f32 %v3334_v49 }
 0x8b1   :  { %v3347_v24 = vadd.f32 1.0, %v6394_v61  ;;  %6397 = vrcp.f32 %v3346_v19 }
 0x8b2   :  { %6399 = vrcp.f32 %v3335_v40 }
 0x8b3   :  { %6401 = vrcp.f32 %v3347_v24 }
 0x8ba   :  { %v6396_v36 = vpop.eup %6395 }
 0x8bb   :  { %v6398_v38 = vpop.eup %6397 }
 0x8bc   :  { %v6400_v40 = vpop.eup %6399  ;;  %v3366_v49 = vmul.f32 %v6398_v38, %v7958_v27  ;;  %v3747_v38 = vld [vmem:[%s8299_s4 + $0xa0] sm:$0xff] }
 0x8bd   :  { %v6402_v34 = vpop.eup %6401 }
 0x8de   :  { %v3244_v16 = vpop.f32.mrb[20].mxu0  ;;  %v3315_v50 = vpop.f32.mrb[36].mxu1 }
 0x8df   :  { %v6115_v3 = vadd.f32 %v3244_v16, %v8849_v25  ;;  %v6131_v22 = vadd.f32 %v3315_v50, %v9127_v35  ;;  %v3246_v43 = vpop.f32.mrb[21].mxu0  ;;  %v3317_v41 = vpop.f32.mrb[37].mxu1  ;;  %v3367_v16 = vmul.f32 %v6402_v34, %v7960_v44 }
 0x8e0   :  { %v6116_v51 = vadd.f32 %v3246_v43, %v9222_v4  ;;  %v6132_v5 = vadd.f32 %v3317_v41, %v7204_v2 }
 0x8e1   :  { %6403 = vtanh.f32 %v6115_v3  ;;  %v3936_v42 = vmul.f32 -1.442695, %v6131_v22 }
 0x8e2   :  { %6405 = vtanh.f32 %v6116_v51  ;;  %v3937_v61 = vmul.f32 -1.442695, %v6132_v5 }
 0x8e3   :  { %6407 = vpow2.f32 %v3936_v42 }
 0x8e4   :  { %6409 = vpow2.f32 %v3937_v61 }
 0x8eb   :  { %v6404_v39 = vpop.eup %6403 }
 0x8ec   :  { %v6406_v30 = vpop.eup %6405  ;;  %v3368_v19 = vmul.f32 %v6404_v39, %v6396_v36  ;;  %v3731_v39 = vld [vmem:[%s8299_s4 + $0x20] sm:$0xff] }
 0x8ed   :  { %v6408_v24 = vpop.eup %6407  ;;  %v3369_v50 = vmul.f32 %v6406_v30, %v6400_v40  ;;  %v3748_v40 = vld [vmem:[%s8299_s4 + $0xa8] sm:$0xff] }
 0x8ee   :  { %v6410_v43 = vpop.eup %6409  ;;  %v8110_v3 = vadd.f32 %v3368_v19, %v3366_v49  ;;  %v3360_v22 = vadd.f32 1.0, %v6408_v24  ;;  %v6037_v34 = vpack.c.bf16 %v3748_v40, %v3747_v38  ;;  %v3732_v30 = vld [vmem:[%s8299_s4 + $0x28] sm:$0xff]  ;;  %v3749_v19 = vld [vmem:[%s8299_s4 + $0xb0] sm:$0xff]  ;;  %v3750_v24 = vld [vmem:[%s8299_s4 + $0xb8] sm:$0xff] }
 0x8ef   :  { %v8112_v41 = vadd.f32 %v3369_v50, %v3367_v16  ;;  %v3361_v51 = vadd.f32 1.0, %v6410_v43  ;;  %v6039_v49 = vpack.c.bf16 %v3732_v30, %v3731_v39  ;;  %v6041_v16 = vpack.c.bf16 %v3750_v24, %v3749_v19  ;;  %v3733_v50 = vld [vmem:[%s8299_s4 + $0x30] sm:$0xff]  ;;  %v3734_v43 = vld [vmem:[%s8299_s4 + $0x38] sm:$0xff] }
 0x8f0   :  { %6411 = vtanh.f32 %v8110_v3 }
 0x8f1   :  { %6413 = vrcp.f32 %v3360_v22  ;;  %v6043_v22 = vpack.c.bf16 %v3734_v43, %v3733_v50 }
 0x8f2   :  { %6415 = vtanh.f32 %v8112_v41 }
 0x8f3   :  { %6417 = vrcp.f32 %v3361_v51  ;;  %v3751_v51 = vld [vmem:[%s8299_s4 + $0xc0] sm:$0xff] }
 0x8fa   :  { %v6412_v5 = vpop.eup %6411 }
 0x8fb   :  { %v6414_v27 = vpop.eup %6413 }
 0x8fc   :  { %v6416_v42 = vpop.eup %6415  ;;  %v8116_v44 = vmul.f32 %v6414_v27, %v6412_v5  ;;  %v3752_v5 = vld [vmem:[%s8299_s4 + $0xc8] sm:$0xff] }
 0x8fd   :  { %v6418_v61 = vpop.eup %6417  ;;  %v6045_v27 = vpack.c.bf16 %v3752_v5, %v3751_v51 }
 0x8fe   :  { %v3375_v36 = vmul.f32 %v6418_v61, %v6416_v42  ;;  %v3735_v42 = vld [vmem:[%s8299_s4 + $0x40] sm:$0xff]  ;;  %v3736_v61 = vld [vmem:[%s8299_s4 + $0x48] sm:$0xff] }
 0x900   :  { %3451 = vmatprep.mubr.f32.mxu0 %v3375_v36  ;;  %3522 = vmatprep.mubr.f32.mxu1 %v3375_v36 }
 0x901   :  { %3452 = vmatmul.mubr.f32.vlgmr.msra.gmra.mrb[30].mxu0 %v8116_v44  ;;  %3523 = vmatmul.mubr.f32.vlgmr.msra.gmra.mrb[22].mxu1 %v8116_v44 }
 0x902   :  { %5904 = vmatpush1.bf16.msra.mxu0 %v8759_v45  ;;  %5968 = vmatpush1.bf16.msra.mxu1 %v8760_v52  ;;  %v9317_v45 = vld [vmem:[#allocation122_spill] sm:$0xff]  ;;  %v9318_v52 = vld [vmem:[#allocation95_spill] sm:$0xff] }
 0x903   :  { %3593 = vmatprep.mubr.f32.mxu0 %v3375_v36  ;;  %3664 = vmatprep.mubr.f32.mxu1 %v3375_v36  ;;  %v6047_v36 = vpack.c.bf16 %v3736_v61, %v3735_v42 }
 0x904   :  { %5906 = vmatprep.subr.bf16.mxu0 %v8761_v11  ;;  %5970 = vmatprep.subr.bf16.mxu1 %v8762_v62  ;;  %v9319_v11 = vld [vmem:[#allocation123_spill] sm:$0xff]  ;;  %v9320_v62 = vld [vmem:[#allocation97_spill] sm:$0xff] }
 0x906   :  { %5908 = vmatpush1.bf16.msra.mxu0 %v8763_v14  ;;  %5972 = vmatpush1.bf16.msra.mxu1 %v8764_v18  ;;  %v9321_v14 = vld [vmem:[#allocation124_spill] sm:$0xff]  ;;  %v9322_v18 = vld [vmem:[#allocation99_spill] sm:$0xff] }
 0x907   :  { %5910 = vmatprep.subr.bf16.mxu0 %v8851_v8  ;;  %5974 = vmatprep.subr.bf16.mxu1 %v8852_v37  ;;  %v9336_v8 = vld [vmem:[#allocation113_spill] sm:$0xff]  ;;  %v9337_v37 = vld [vmem:[#allocation132_spill] sm:$0xff] }
 0x90a   :  { %5912 = vmatpush1.bf16.msra.mxu0 %v8767_v15  ;;  %5976 = vmatpush1.bf16.msra.mxu1 %v8853_v10  ;;  %v9326_v15 = vld [vmem:[#allocation103_spill] sm:$0xff] }
 0x90b   :  { %5914 = vmatprep.subr.bf16.mxu0 %v8769_v23  ;;  %5978 = vmatprep.subr.bf16.mxu1 %v8854_v9  ;;  %v9329_v23 = vld [vmem:[#allocation128_spill] sm:$0xff]  ;;  %v9338_v10 = vld [vmem:[#allocation115_spill] sm:$0xff]  ;;  %v9339_v9 = vld [vmem:[#allocation133_spill] sm:$0xff] }
 0x90e   :  { %5916 = vmatpush1.bf16.msra.mxu0 %v8771_v7  ;;  %5980 = vmatpush1.bf16.msra.mxu1 %v8855_v58  ;;  %v9331_v7 = vld [vmem:[#allocation129_spill] sm:$0xff] }
 0x90f   :  { %5918 = vmatprep.subr.bf16.mxu0 %v8773_v0  ;;  %5982 = vmatprep.subr.bf16.mxu1 %v8856_v29  ;;  %v9333_v0 = vld [vmem:[#allocation130_spill] sm:$0xff]  ;;  %v9340_v58 = vld [vmem:[#allocation117_spill] sm:$0xff] }
 0x910   :  { %v9341_v29 = vld [vmem:[#allocation134_spill] sm:$0xff] }
 0x912   :  { %5920 = vmatpush1.bf16.msra.mxu0 %v8775_v28  ;;  %5984 = vmatpush1.bf16.msra.mxu1 %v8857_v59  ;;  %v9335_v28 = vld [vmem:[#allocation131_spill] sm:$0xff] }
 0x913   :  { %5922 = vmatprep.subr.bf16.mxu0 %v8777_v20  ;;  %5986 = vmatprep.subr.bf16.mxu1 %v8858_v13  ;;  %v9324_v20 = vld [vmem:[#allocation101_spill] sm:$0xff]  ;;  %v3743_v59 = vld [vmem:[%s8299_s4 + $0x80] sm:$0xff]  ;;  %v3744_v13 = vld [vmem:[%s8299_s4 + $0x88] sm:$0xff] }
 0x916   :  { %5924 = vmatpush1.bf16.msra.mxu0 %v8778_v32  ;;  %5988 = vmatpush1.bf16.msra.mxu1 %v8859_v48  ;;  %v9328_v32 = vld [vmem:[#allocation105_spill] sm:$0xff]  ;;  %v6029_v48 = vpack.c.bf16 %v3744_v13, %v3743_v59 }
 0x917   :  { %5926 = vmatprep.subr.bf16.mxu0 %v8779_v21  ;;  %5990 = vmatprep.subr.bf16.mxu1 %v8860_v54  ;;  %v9330_v21 = vld [vmem:[#allocation107_spill] sm:$0xff] }
 0x918   :  { %v3727_v54 = vld [vmem:[%s8299_s4] sm:$0xff] }
 0x91a   :  { %5928 = vmatpush1.bf16.msra.mxu0 %v8780_v55  ;;  %5992 = vmatpush1.bf16.msra.mxu1 %v8861_v33  ;;  %v9332_v55 = vld [vmem:[#allocation109_spill] sm:$0xff]  ;;  %v3728_v33 = vld [vmem:[%s8299_s4 + $0x8] sm:$0xff] }
 0x91b   :  { %5930 = vmatprep.subr.bf16.mxu0 %v8781_v26  ;;  %5994 = vmatprep.subr.bf16.mxu1 %v8862_v46  ;;  %v9334_v26 = vld [vmem:[#allocation111_spill] sm:$0xff]  ;;  %v6031_v46 = vpack.c.bf16 %v3728_v33, %v3727_v54 }
 0x91e   :  { %5932 = vmatpush1.bf16.msra.mxu0 %v8943_v60  ;;  %5996 = vmatpush1.bf16.msra.mxu1 %v8863_v53  ;;  %v3745_v53 = vld [vmem:[%s8299_s4 + $0x90] sm:$0xff]  ;;  %v3730_v60 = vld [vmem:[%s8299_s4 + $0x18] sm:$0xff] }
 0x91f   :  { %5934 = vmatprep.subr.bf16.mxu0 %v8944_v1  ;;  %5998 = vmatprep.subr.bf16.mxu1 %v8864_v31  ;;  %v3746_v31 = vld [vmem:[%s8299_s4 + $0x98] sm:$0xff] }
 0x922   :  { %5936 = vmatpush1.bf16.msra.mxu0 %v8784_v6  ;;  %6000 = vmatpush1.bf16.msra.mxu1 %v8865_v57  ;;  %v9323_v6 = vld [vmem:[#allocation125_spill] sm:$0xff]  ;;  %v6033_v57 = vpack.c.bf16 %v3746_v31, %v3745_v53 }
 0x923   :  { %5938 = vmatprep.subr.bf16.mxu0 %v8785_v12  ;;  %6002 = vmatprep.subr.bf16.mxu1 %v8866_v47  ;;  %v9325_v12 = vld [vmem:[#allocation126_spill] sm:$0xff]  ;;  %v3729_v47 = vld [vmem:[%s8299_s4 + $0x10] sm:$0xff] }
 0x924   :  { %v6035_v1 = vpack.c.bf16 %v3730_v60, %v3729_v47 }
 0x926   :  { %5940 = vmatpush1.bf16.msra.mxu0 %v8786_v17  ;;  %6004 = vmatpush1.bf16.msra.mxu1 %v9317_v45  ;;  %v9327_v17 = vld [vmem:[#allocation127_spill] sm:$0xff]  ;;  %v3754_v45 = vld [vmem:[%s8299_s4 + $0xd8] sm:$0xff] }
 0x927   :  { %5942 = vmatprep.subr.bf16.mxu0 %v9318_v52  ;;  %6006 = vmatprep.subr.bf16.mxu1 %v9319_v11  ;;  %v3737_v11 = vld [vmem:[%s8299_s4 + $0x50] sm:$0xff] }
 0x92a   :  { %5944 = vmatpush1.bf16.msra.mxu0 %v9320_v62  ;;  %6008 = vmatpush1.bf16.msra.mxu1 %v9321_v14  ;;  %v3738_v62 = vld [vmem:[%s8299_s4 + $0x58] sm:$0xff]  ;;  %v3755_v14 = vld [vmem:[%s8299_s4 + $0xe0] sm:$0xff] }
 0x92b   :  { %5946 = vmatprep.subr.bf16.mxu0 %v9322_v18  ;;  %6010 = vmatprep.subr.bf16.mxu1 %v9323_v6  ;;  %v6051_v18 = vpack.c.bf16 %v3738_v62, %v3737_v11  ;;  %v3756_v6 = vld [vmem:[%s8299_s4 + $0xe8] sm:$0xff] }
 0x92e   :  { %5948 = vmatpush1.bf16.msra.mxu0 %v9324_v20  ;;  %6012 = vmatpush1.bf16.msra.mxu1 %v9325_v12  ;;  %v3739_v20 = vld [vmem:[%s8299_s4 + $0x60] sm:$0xff]  ;;  %v3740_v12 = vld [vmem:[%s8299_s4 + $0x68] sm:$0xff] }
 0x92f   :  { %5950 = vmatprep.subr.bf16.mxu0 %v9326_v15  ;;  %6014 = vmatprep.subr.bf16.mxu1 %v9327_v17  ;;  %v6053_v15 = vpack.c.bf16 %v3756_v6, %v3755_v14  ;;  %v3757_v17 = vld [vmem:[%s8299_s4 + $0xf0] sm:$0xff] }
 0x932   :  { %5952 = vmatpush1.bf16.msra.mxu0 %v9328_v32  ;;  %6016 = vmatpush1.bf16.msra.mxu1 %v9329_v23  ;;  %v3758_v32 = vld [vmem:[%s8299_s4 + $0xf8] sm:$0xff]  ;;  %v6055_v23 = vpack.c.bf16 %v3740_v12, %v3739_v20 }
 0x933   :  { %5954 = vmatprep.subr.bf16.mxu0 %v9330_v21  ;;  %6018 = vmatprep.subr.bf16.mxu1 %v9331_v7  ;;  %v6057_v21 = vpack.c.bf16 %v3758_v32, %v3757_v17  ;;  %v3741_v7 = vld [vmem:[%s8299_s4 + $0x70] sm:$0xff] }
 0x936   :  { %5956 = vmatpush1.bf16.msra.mxu0 %v9332_v55  ;;  %6020 = vmatpush1.bf16.msra.mxu1 %v9333_v0  ;;  %v3742_v55 = vld [vmem:[%s8299_s4 + $0x78] sm:$0xff] }
 0x937   :  { %5958 = vmatprep.subr.bf16.mxu0 %v9334_v26  ;;  %6022 = vmatprep.subr.bf16.mxu1 %v9335_v28  ;;  %v6059_v0 = vpack.c.bf16 %v3742_v55, %v3741_v7  ;;  %v9342_v26 = vld [vmem:[#allocation143_spill] sm:$0xff]  ;;  %v9343_v28 = vld [vmem:[#allocation141_spill] sm:$0xff] }
 0x93a   :  { %5960 = vmatpush1.bf16.msra.mxu0 %v9336_v8  ;;  %6024 = vmatpush1.bf16.msra.mxu1 %v9337_v37  ;;  %v256_v8 = vadd.f32 %v9343_v28, %v9342_v26  ;;  %v9344_v37 = vld [vmem:[#allocation144_spill] sm:$0xff] }
 0x93b   :  { %5962 = vmatprep.subr.bf16.mxu0 %v9338_v10  ;;  %6026 = vmatprep.subr.bf16.mxu1 %v9339_v9  ;;  %v9345_v10 = vld [vmem:[#allocation142_spill] sm:$0xff] }
 0x93c   :  { %v258_v9 = vadd.f32 %v9345_v10, %v9344_v37 }
 0x93e   :  { %5964 = vmatpush1.bf16.msra.mxu0 %v9340_v58  ;;  %6028 = vmatpush1.bf16.msra.mxu1 %v9341_v29 }
 0x93f   :  { %6030 = vmatprep.subr.bf16.mxu0 %v6029_v48 }
 0x941   :  { %3594 = vmatmul.mubr.f32.vlgmr.msra.gmra.mrb[22].mxu0 %v8116_v44  ;;  %3665 = vmatmul.mubr.f32.vlgmr.msra.gmra.mrb[38].mxu1 %v8116_v44  ;;  %v3753_v44 = vld [vmem:[%s8299_s4 + $0xd0] sm:$0xff] }
 0x942   :  { %6032 = vmatpush3.bf16.msra.mxu0 %v6031_v46  ;;  %v6049_v52 = vpack.c.bf16 %v3754_v45, %v3753_v44 }
 0x943   :  { %6034 = vmatprep.subr.bf16.mxu0 %v6033_v57 }
 0x946   :  { %6036 = vmatpush3.bf16.msra.mxu0 %v6035_v1 }
 0x947   :  { %6038 = vmatprep.subr.bf16.mxu0 %v6037_v34 }
 0x94a   :  { %6040 = vmatpush3.bf16.msra.mxu0 %v6039_v49 }
 0x94b   :  { %6042 = vmatprep.subr.bf16.mxu0 %v6041_v16 }
 0x94e   :  { %6044 = vmatpush3.bf16.msra.mxu0 %v6043_v22 }
 0x94f   :  { %6046 = vmatprep.subr.bf16.mxu0 %v6045_v27 }
 0x952   :  { %6048 = vmatpush3.bf16.msra.mxu0 %v6047_v36 }
 0x953   :  { %6050 = vmatprep.subr.bf16.mxu0 %v6049_v52 }
 0x956   :  { %6052 = vmatpush3.bf16.msra.mxu0 %v6051_v18 }
 0x957   :  { %6054 = vmatprep.subr.bf16.mxu0 %v6053_v15 }
 0x95a   :  { %6056 = vmatpush3.bf16.msra.mxu0 %v6055_v23 }
 0x95b   :  { %6058 = vmatprep.subr.bf16.mxu0 %v6057_v21 }
 0x95e   :  { %6060 = vmatpush3.bf16.msra.mxu0 %v6059_v0 }
 0x9d4   :  { %v3453_v58 = vpop.f32.mrb[30].mxu0  ;;  %v3524_v29 = vpop.f32.mrb[22].mxu1 }
 0x9d5   :  { %v3671_v59 = vadd.f32 %v3453_v58, %v256_v8  ;;  %v3455_v13 = vpop.f32.mrb[31].mxu0  ;;  %v3526_v48 = vpop.f32.mrb[23].mxu1  ;;  %v6101_v33 = vadd.f32 %v3524_v29, %v7182_v56 }
 0x9d6   :  { %v3672_v54 = vadd.f32 %v3455_v13, %v258_v9  ;;  %v6102_v46 = vadd.f32 %v3526_v48, %v8848_v63 }
 0x9d7   :  { %v3938_v53 = vmul.f32 -1.442695, %v3671_v59  ;;  %v3940_v31 = vmul.f32 -1.442695, %v6101_v33 }
 0x9d8   :  { %v3939_v57 = vmul.f32 -1.442695, %v3672_v54  ;;  %v3941_v47 = vmul.f32 -1.442695, %v6102_v46 }
 0x9d9   :  { %6419 = vpow2.f32 %v3938_v53 }
 0x9da   :  { %6421 = vpow2.f32 %v3940_v31 }
 0x9db   :  { %6423 = vpow2.f32 %v3939_v57 }
 0x9dc   :  { %6425 = vpow2.f32 %v3941_v47 }
 0x9e3   :  { %v6420_v60 = vpop.eup %6419 }
 0x9e4   :  { %v6422_v1 = vpop.eup %6421  ;;  %v3685_v34 = vadd.f32 1.0, %v6420_v60 }
 0x9e5   :  { %v6424_v38 = vpop.eup %6423  ;;  %v3697_v39 = vadd.f32 1.0, %v6422_v1 }
 0x9e6   :  { %v6426_v40 = vpop.eup %6425  ;;  %v3686_v30 = vadd.f32 1.0, %v6424_v38  ;;  %6427 = vrcp.f32 %v3685_v34 }
 0x9e7   :  { %v3698_v49 = vadd.f32 1.0, %v6426_v40  ;;  %6429 = vrcp.f32 %v3697_v39 }
 0x9e8   :  { %6431 = vrcp.f32 %v3686_v30 }
 0x9e9   :  { %6433 = vrcp.f32 %v3698_v49 }
 0x9f0   :  { %v6428_v27 = vpop.eup %6427 }
 0x9f1   :  { %v6430_v42 = vpop.eup %6429 }
 0x9f2   :  { %v6432_v61 = vpop.eup %6431 }
 0x9f3   :  { %v6434_v36 = vpop.eup %6433 }
 0xa14   :  { %v3595_v56 = vpop.f32.mrb[22].mxu0  ;;  %v3666_v63 = vpop.f32.mrb[38].mxu1 }
 0xa15   :  { %v6117_v19 = vadd.f32 %v3595_v56, %v8849_v25  ;;  %v6133_v24 = vadd.f32 %v3666_v63, %v9127_v35  ;;  %v3597_v16 = vpop.f32.mrb[23].mxu0  ;;  %v3668_v50 = vpop.f32.mrb[39].mxu1  ;;  %v3717_v35 = vmul.f32 %v6430_v42, %v8110_v3 }
 0xa16   :  { %v6118_v43 = vadd.f32 %v3597_v16, %v9222_v4  ;;  %v6134_v22 = vadd.f32 %v3668_v50, %v7204_v2  ;;  %v3718_v4 = vmul.f32 %v6434_v36, %v8112_v41  ;;  %v3944_v41 = vld [vmem:[#allocation3] ss:$0 sm:$0xff] }
 0xa17   :  { %6435 = vtanh.f32 %v6117_v19  ;;  %v3942_v51 = vmul.f32 -1.442695, %v6133_v24 }
 0xa18   :  { %6437 = vtanh.f32 %v6118_v43  ;;  %v3943_v5 = vmul.f32 -1.442695, %v6134_v22 }
 0xa19   :  { %6439 = vpow2.f32 %v3942_v51 }
 0xa1a   :  { %6441 = vpow2.f32 %v3943_v5 }
 0xa21   :  { %v6436_v25 = vpop.eup %6435 }
 0xa22   :  { %v6438_v44 = vpop.eup %6437  ;;  %v3719_v45 = vmul.f32 %v6436_v25, %v6428_v27 }
 0xa23   :  { %v6440_v52 = vpop.eup %6439  ;;  %v3720_v11 = vmul.f32 %v6438_v44, %v6432_v61 }
 0xa24   :  { %v6442_v2 = vpop.eup %6441  ;;  %v3721_v62 = vadd.f32 %v3719_v45, %v3717_v35  ;;  %v3711_v14 = vadd.f32 1.0, %v6440_v52 }
 0xa25   :  { %v3722_v18 = vadd.f32 %v3720_v11, %v3718_v4  ;;  %v3712_v6 = vadd.f32 1.0, %v6442_v2 }
 0xa26   :  { %6443 = vtanh.f32 %v3721_v62 }
 0xa27   :  { %6445 = vrcp.f32 %v3711_v14 }
 0xa28   :  { %6447 = vtanh.f32 %v3722_v18 }
 0xa29   :  { %6449 = vrcp.f32 %v3712_v6 }
 0xa30   :  { %v6444_v20 = vpop.eup %6443 }
 0xa31   :  { %v6446_v12 = vpop.eup %6445 }
 0xa32   :  { %v6448_v15 = vpop.eup %6447  ;;  %v3725_v17 = vmul.f32 %v6446_v12, %v6444_v20 }
 0xa33   :  { %v6450_v32 = vpop.eup %6449 }
 0xa34   :  { %v3726_v3 = vmul.f32 %v6450_v32, %v6448_v15 }
 0xa36   :  { %3830 = vmatprep.mubr.f32.mxu0 %v3726_v3 }
 0xa37   :  { %3831 = vmatmul.mubr.f32.vlgmr.msra.gmra.mrb[32].mxu0 %v3725_v17 }
 0xb0a   :  { %v3978_v23 = vpop.f32.mrb[32].mxu0 }
 0xb0b   :  { %v3979_v21 = vpop.f32.mrb[33].mxu0 }
 0xb0c   :  { %v3980_v7 = vadd.f32 %v3979_v21, %v3978_v23 }
 0xb0e   :  { %v3833_v55 = vadd.f32 %v3980_v7, %v3944_v41 }
 0xb10   :  { %v3945_v0 = vmul.f32 -1.442695, %v3833_v55 }
 0xb12   :  { %6451 = vpow2.f32 %v3945_v0 }
 0xb1c   :  { %v6452_v26 = vpop.eup %6451 }
 0xb1d   :  { %v3839_v28 = vadd.f32 1.0, %v6452_v26 }
 0xb1f   :  { %6453 = vrcp.f32 %v3839_v28 }
 0xb29   :  { %v6454_v8 = vpop.eup %6453 }
 0xb2a   :  { %3843 = vst.msk [vmem:[%s8301_s6] sm:$0xff] %vm3842_vm2, %v6454_v8 }
 0xb2b   :  { %3848 = vsyncpa [#allocation5], 1 }

</bundles_post_ra>
